<compile_context>
chip_gen: v7x
topology: tpu7x:2x2x1
jax: 0.10.0
libtpu: 0.0.40
codegen_flags: <defaults>
</compile_context>

<pallas_src>
import functools
import math

import jax
import jax.numpy as jnp
from jax.experimental import pallas as pl
from jax.experimental.pallas import tpu as pltpu

VMEM_LIMIT = 48 * 1024 * 1024   # safe on v5e/v6e (128 MiB) and v7x (64 MiB)
_BM = 256                        # row tile: 128-aligned (v5e) and 256-aligned (v6e/v7x)


def _round_up(x, m):
    return ((x + m - 1) // m) * m


# ----------------------------------------------------------------------------
# Pallas kernels
# ----------------------------------------------------------------------------

def _matmul_bias_kernel(x_ref, w_ref, b_ref, o_ref, *, relu):
    acc = jnp.dot(x_ref[...], w_ref[...], preferred_element_type=jnp.float32)
    acc = acc + b_ref[...]                       # (1, N) broadcast over rows
    if relu:
        acc = jnp.maximum(acc, 0.0)
    o_ref[...] = acc.astype(o_ref.dtype)


def matmul_bias(x, w, b, relu=False, out_dtype=jnp.float32):
    """y = x @ w + b (optionally ReLU).  x:(M,K)  w:(K,N)  b:(N,).

    bf16 inputs, f32 accumulation. Rows are tiled in 256-row blocks with a
    padded grid (padded rows are sliced off afterwards)."""
    M, K = x.shape
    N = w.shape[1]
    x = x.astype(jnp.bfloat16)
    w = w.astype(jnp.bfloat16)
    b2 = b.astype(jnp.float32).reshape(1, N)

    if M > _BM:
        bm = _BM
        m_pad = _round_up(M, bm)
    else:
        bm = _round_up(M, 8)
        m_pad = bm
    if m_pad != M:
        x = jnp.pad(x, ((0, m_pad - M), (0, 0)))

    out = pl.pallas_call(
        functools.partial(_matmul_bias_kernel, relu=relu),
        out_shape=jax.ShapeDtypeStruct((m_pad, N), out_dtype),
        grid=(m_pad // bm,),
        in_specs=[
            pl.BlockSpec((bm, K), lambda i: (i, 0)),
            pl.BlockSpec((K, N), lambda i: (0, 0)),
            pl.BlockSpec((1, N), lambda i: (0, 0)),
        ],
        out_specs=pl.BlockSpec((bm, N), lambda i: (i, 0)),
        compiler_params=pltpu.CompilerParams(
            dimension_semantics=("parallel",),
            vmem_limit_bytes=VMEM_LIMIT),
    )(x, w, b2)
    return out[:M] if m_pad != M else out


def _head_kernel(h_ref, w1_ref, b1_ref, w2_ref, b2_ref, w3_ref, b3_ref, o_ref):
    # Fused 3-layer MLP: relu(h@W1+b1) -> relu(@W2+b2) -> @W3+b3.
    a = jnp.dot(h_ref[...], w1_ref[...], preferred_element_type=jnp.float32) + b1_ref[...]
    a = jnp.maximum(a, 0.0).astype(jnp.bfloat16)
    a = jnp.dot(a, w2_ref[...], preferred_element_type=jnp.float32) + b2_ref[...]
    a = jnp.maximum(a, 0.0).astype(jnp.bfloat16)
    a = jnp.dot(a, w3_ref[...], preferred_element_type=jnp.float32) + b3_ref[...]
    o_ref[...] = a.astype(o_ref.dtype)


def embedding_head(h, w1, b1, w2, b2, w3, b3):
    """Fused embedding head; intermediates (bm,256)/(bm,512) stay in VMEM."""
    M, H = h.shape
    N1, N2, N3 = w1.shape[1], w2.shape[1], w3.shape[1]
    h = h.astype(jnp.bfloat16)
    if M > _BM:
        bm = _BM
        m_pad = _round_up(M, bm)
    else:
        bm = _round_up(M, 8)
        m_pad = bm
    if m_pad != M:
        h = jnp.pad(h, ((0, m_pad - M), (0, 0)))

    out = pl.pallas_call(
        _head_kernel,
        out_shape=jax.ShapeDtypeStruct((m_pad, N3), jnp.float32),
        grid=(m_pad // bm,),
        in_specs=[
            pl.BlockSpec((bm, H), lambda i: (i, 0)),
            pl.BlockSpec((H, N1), lambda i: (0, 0)),
            pl.BlockSpec((1, N1), lambda i: (0, 0)),
            pl.BlockSpec((N1, N2), lambda i: (0, 0)),
            pl.BlockSpec((1, N2), lambda i: (0, 0)),
            pl.BlockSpec((N2, N3), lambda i: (0, 0)),
            pl.BlockSpec((1, N3), lambda i: (0, 0)),
        ],
        out_specs=pl.BlockSpec((bm, N3), lambda i: (i, 0)),
        compiler_params=pltpu.CompilerParams(
            dimension_semantics=("parallel",),
            vmem_limit_bytes=VMEM_LIMIT),
    )(h,
      w1.astype(jnp.bfloat16), b1.astype(jnp.float32).reshape(1, N1),
      w2.astype(jnp.bfloat16), b2.astype(jnp.float32).reshape(1, N2),
      w3.astype(jnp.bfloat16), b3.astype(jnp.float32).reshape(1, N3))
    return out[:M] if m_pad != M else out


def _gru_kernel(gx_ref, whh_ref, bhh_ref, h0_ref, hs_ref, *, T, H):
    w = whh_ref[...]          # (H, 3H) bf16, resident for the whole sequence
    b = bhh_ref[...]          # (1, 3H) f32

    def step(t, h):
        gx = gx_ref[t]        # (B, 3H) f32, precomputed x @ W_ih^T + b_ih
        gh = jnp.dot(h.astype(jnp.bfloat16), w,
                     preferred_element_type=jnp.float32) + b
        r = jax.nn.sigmoid(gx[:, 0:H] + gh[:, 0:H])
        z = jax.nn.sigmoid(gx[:, H:2 * H] + gh[:, H:2 * H])
        n = jnp.tanh(gx[:, 2 * H:3 * H] + r * gh[:, 2 * H:3 * H])
        h_new = (1.0 - z) * n + z * h
        hs_ref[t] = h_new
        return h_new

    jax.lax.fori_loop(0, T, step, h0_ref[...])


def gru_forward(gates_x_tbh, w_hh_t, b_hh, h0):
    """Single-invocation GRU.  gates_x_tbh:(T,B,3H)  w_hh_t:(H,3H)  h0:(B,H)."""
    T, B, G = gates_x_tbh.shape
    H = G // 3
    return pl.pallas_call(
        functools.partial(_gru_kernel, T=T, H=H),
        out_shape=jax.ShapeDtypeStruct((T, B, H), jnp.float32),
        grid=(1,),
        in_specs=[
            pl.BlockSpec((T, B, G), lambda i: (0, 0, 0)),
            pl.BlockSpec((H, G), lambda i: (0, 0)),
            pl.BlockSpec((1, G), lambda i: (0, 0)),
            pl.BlockSpec((B, H), lambda i: (0, 0)),
        ],
        out_specs=pl.BlockSpec((T, B, H), lambda i: (0, 0, 0)),
        compiler_params=pltpu.CompilerParams(
            dimension_semantics=("arbitrary",),
            vmem_limit_bytes=VMEM_LIMIT),
    )(gates_x_tbh.astype(jnp.float32),
      w_hh_t.astype(jnp.bfloat16),
      b_hh.astype(jnp.float32).reshape(1, G),
      h0.astype(jnp.float32))


# ----------------------------------------------------------------------------
# Conv via XLA-native patch extraction (NHWC) + Pallas matmul (hot path)
# ----------------------------------------------------------------------------

def conv2d_nhwc(x, w_flat, b, kh, kw, stride, pad, relu=True):
    """x:(N,H,W,C) bf16, w_flat:(C*kh*kw, O) channel-major flatten of OIHW."""
    N = x.shape[0]
    patches = jax.lax.conv_general_dilated_patches(
        x, (kh, kw), (stride, stride), ((pad, pad), (pad, pad)),
        dimension_numbers=("NHWC", "HWIO", "NHWC"))
    # patches: (N, Ho, Wo, C*kh*kw), feature dim ordered (c, kh, kw) — matches
    # the PyTorch OIHW weight flatten.
    _, Ho, Wo, CKK = patches.shape
    y = matmul_bias(patches.reshape(N * Ho * Wo, CKK), w_flat, b,
                    relu=relu, out_dtype=jnp.bfloat16)
    return y.reshape(N, Ho, Wo, w_flat.shape[1])


# ----------------------------------------------------------------------------
# Parameter preparation (one-time: transposes, bf16 casts, fc/gru_ih fold)
# ----------------------------------------------------------------------------

def prepare_params(p):
    q = {}
    for name in ("conv1", "conv2", "conv3"):
        w = p[f"{name}_w"]                                    # (O, C, kh, kw)
        q[f"{name}_wf"] = w.reshape(w.shape[0], -1).T.astype(jnp.bfloat16)
        q[f"{name}_b"] = p[f"{name}_b"].astype(jnp.float32)

    # Fold fc (no nonlinearity after it) into the GRU input projection,
    # and permute its input rows from CHW-flatten (PyTorch) to HWC-flatten
    # (our NHWC activation layout).
    fc_w, fc_b = p["fc_w"], p["fc_b"]                         # (obs, C*Hc*Wc)
    w_ih, b_ih = p["gru_w_ih"], p["gru_b_ih"]                 # (3H, obs)
    w_enc = fc_w.T @ w_ih.T                                   # (C*Hc*Wc, 3H)
    b_enc = fc_b @ w_ih.T + b_ih                              # (3H,)
    C = p["conv3_w"].shape[0]
    side = int(round(math.sqrt(fc_w.shape[1] // C)))
    w_enc = (w_enc.reshape(C, side, side, -1)
                  .transpose(1, 2, 0, 3)
                  .reshape(C * side * side, -1))
    q["enc_gates_w"] = w_enc.astype(jnp.bfloat16)
    q["enc_gates_b"] = b_enc.astype(jnp.float32)

    q["gru_w_hh_t"] = p["gru_w_hh"].T.astype(jnp.bfloat16)    # (H, 3H)
    q["gru_b_hh"] = p["gru_b_hh"].astype(jnp.float32)

    for head in ("anchor", "posneg"):
        for i in (1, 2, 3):
            q[f"{head}_w{i}t"] = p[f"{head}_w{i}"].T.astype(jnp.bfloat16)
            q[f"{head}_b{i}"] = p[f"{head}_b{i}"].astype(jnp.float32)
    return q


# ----------------------------------------------------------------------------
# KoopmanMapping forward
# ----------------------------------------------------------------------------

def koopman_forward(params, trajectories, anchor=True, h_0=None):
    B, T = trajectories.shape[0], trajectories.shape[1]
    x = trajectories.reshape((-1,) + trajectories.shape[2:])  # (B*T, 3, 64, 64)
    x = x.astype(jnp.bfloat16).transpose(0, 2, 3, 1)          # NHWC bf16

    # image encoder (conv stack)
    x = conv2d_nhwc(x, params["conv1_wf"], params["conv1_b"], 8, 8, 4, 2)
    x = conv2d_nhwc(x, params["conv2_wf"], params["conv2_b"], 4, 4, 2, 1)
    x = conv2d_nhwc(x, params["conv3_wf"], params["conv3_b"], 3, 3, 1, 0)
    feat = x.reshape(B * T, -1)                               # HWC flatten

    # fused (fc + GRU input projection):  gates_x = feat @ W_enc + b_enc
    G = params["enc_gates_w"].shape[1]
    H = G // 3
    gates_x = matmul_bias(feat, params["enc_gates_w"], params["enc_gates_b"])
    gates_x = gates_x.reshape(B, T, G).transpose(1, 0, 2)     # (T, B, 3H)

    h0 = (jnp.zeros((B, H), jnp.float32) if h_0 is None
          else h_0.reshape(B, H).astype(jnp.float32))
    hs_tbh = gru_forward(gates_x, params["gru_w_hh_t"], params["gru_b_hh"], h0)
    hidden_state = hs_tbh.transpose(1, 0, 2)                  # (B, T, H)
    h_n = hidden_state[:, -1, :][None]                        # (1, B, H)

    # fused 3-layer embedding head
    head = "anchor" if anchor else "posneg"
    z = embedding_head(hidden_state.reshape(B * T, H),
                       params[f"{head}_w1t"], params[f"{head}_b1"],
                       params[f"{head}_w2t"], params[f"{head}_b2"],
                       params[f"{head}_w3t"], params[f"{head}_b3"])
    return z.reshape(B, T, -1), h_n, hidden_state


# ----------------------------------------------------------------------------
# Deterministic parameter init (PyTorch-style uniform(-1/sqrt(fan_in), ...))
# ----------------------------------------------------------------------------

def init_params(key, obs_dim, hidden_dim, embedding_dim):
    keys = iter(jax.random.split(key, 32))

    def u(shape, fan_in):
        bound = 1.0 / float(fan_in) ** 0.5
        return jax.random.uniform(next(keys), shape, jnp.float32, -bound, bound)

    p = {}
    p["conv1_w"] = u((32, 3, 8, 8), 3 * 8 * 8)
    p["conv1_b"] = u((32,), 3 * 8 * 8)
    p["conv2_w"] = u((64, 32, 4, 4), 32 * 4 * 4)
    p["conv2_b"] = u((64,), 32 * 4 * 4)
    p["conv3_w"] = u((64, 64, 3, 3), 64 * 3 * 3)
    p["conv3_b"] = u((64,), 64 * 3 * 3)
    p["fc_w"] = u((obs_dim, 64 * 6 * 6), 64 * 6 * 6)
    p["fc_b"] = u((obs_dim,), 64 * 6 * 6)

    p["gru_w_ih"] = u((3 * hidden_dim, obs_dim), hidden_dim)
    p["gru_w_hh"] = u((3 * hidden_dim, hidden_dim), hidden_dim)
    p["gru_b_ih"] = u((3 * hidden_dim,), hidden_dim)
    p["gru_b_hh"] = u((3 * hidden_dim,), hidden_dim)

    for head in ("anchor", "posneg"):
        p[f"{head}_w1"] = u((256, hidden_dim), hidden_dim)
        p[f"{head}_b1"] = u((256,), hidden_dim)
        p[f"{head}_w2"] = u((512, 256), 256)
        p[f"{head}_b2"] = u((512,), 256)
        p[f"{head}_w3"] = u((embedding_dim, 512), 512)
        p[f"{head}_b3"] = u((embedding_dim,), 512)
    return p


# ----------------------------------------------------------------------------
# Pure-JAX reference (for a sanity check; uses the raw PyTorch-layout params)
# ----------------------------------------------------------------------------

def ref_forward(params, trajectories, anchor=True):
    B, T = trajectories.shape[:2]
    x = trajectories.reshape((-1,) + trajectories.shape[2:])

    def conv_ref(x, w, b, s, p):
        y = jax.lax.conv_general_dilated(
            x, w, window_strides=(s, s), padding=((p, p), (p, p)),
            dimension_numbers=("NCHW", "OIHW", "NCHW"))
        return jax.nn.relu(y + b[None, :, None, None])

    x = conv_ref(x, params["conv1_w"], params["conv1_b"], 4, 2)
    x = conv_ref(x, params["conv2_w"], params["conv2_b"], 2, 1)
    x = conv_ref(x, params["conv3_w"], params["conv3_b"], 1, 0)
    x = x.reshape(B * T, -1)
    obs = (x @ params["fc_w"].T + params["fc_b"]).reshape(B, T, -1)

    H = params["gru_w_hh"].shape[1]
    h = jnp.zeros((B, H), jnp.float32)
    outs = []
    for t in range(T):
        xt = obs[:, t]
        gx = xt @ params["gru_w_ih"].T + params["gru_b_ih"]
        gh = h @ params["gru_w_hh"].T + params["gru_b_hh"]
        r = jax.nn.sigmoid(gx[:, :H] + gh[:, :H])
        z = jax.nn.sigmoid(gx[:, H:2 * H] + gh[:, H:2 * H])
        n = jnp.tanh(gx[:, 2 * H:] + r * gh[:, 2 * H:])
        h = (1 - z) * n + z * h
        outs.append(h)
    hidden_state = jnp.stack(outs, axis=1)
    h_n = h[None]

    head = "anchor" if anchor else "posneg"
    zz = hidden_state.reshape(B * T, H)
    zz = jax.nn.relu(zz @ params[f"{head}_w1"].T + params[f"{head}_b1"])
    zz = jax.nn.relu(zz @ params[f"{head}_w2"].T + params[f"{head}_b2"])
    zz = zz @ params[f"{head}_w3"].T + params[f"{head}_b3"]
    return zz.reshape(B, T, -1), h_n, hidden_state


# ----------------------------------------------------------------------------

if __name__ == "__main__":
    B, T = 2, 4
    obs_dim, hidden_dim, embedding_dim, image_size = 16, 32, 16, 64

    key = jax.random.PRNGKey(0)
    pkey, xkey = jax.random.split(key)
    raw_params = init_params(pkey, obs_dim, hidden_dim, embedding_dim)
    params = prepare_params(raw_params)
    trajectories = jax.random.normal(
        xkey, (B, T, 3, image_size, image_size), jnp.float32)

    fwd = jax.jit(functools.partial(koopman_forward, anchor=True))
    z_anchor, h_n, hidden_state = fwd(params, trajectories)
    jax.block_until_ready((z_anchor, h_n, hidden_state))

    # shape / semantics checks against a pure-JAX reference
    assert z_anchor.shape == (B, T, embedding_dim)
    assert h_n.shape == (1, B, hidden_dim)
    assert hidden_state.shape == (B, T, hidden_dim)

    z_ref, h_n_ref, hs_ref = ref_forward(raw_params, trajectories, anchor=True)
    assert float(jnp.max(jnp.abs(z_anchor - z_ref))) < 5e-2
    assert float(jnp.max(jnp.abs(h_n - h_n_ref))) < 5e-2
    assert float(jnp.max(jnp.abs(hidden_state - hs_ref))) < 5e-2

    print("KERNEL_OK")
</pallas_src>

<mosaic_0001>
module attributes {stable_mosaic.version = 11 : i64} {
  func.func @_matmul_bias_kernel(%arg0: i32, %arg1: memref<256x192xbf16, #tpu.memory_space<vmem>>, %arg2: memref<192x32xbf16, #tpu.memory_space<vmem>>, %arg3: memref<1x32xf32, #tpu.memory_space<vmem>>, %arg4: memref<256x32xbf16, #tpu.memory_space<vmem>>) attributes {dimension_semantics = [#tpu.dimension_semantics<parallel>], iteration_bounds = array<i64: 8>, scalar_prefetch = 0 : i64, scratch_operands = 0 : i64, tpu.core_type = #tpu.core_type<tc>, window_params = [{transform_indices = @transform_0, window_bounds = array<i64: 256, 192>}, {pipeline_mode = #tpu.pipeline_mode<synchronous>, transform_indices = @transform_1, window_bounds = array<i64: 192, 32>}, {pipeline_mode = #tpu.pipeline_mode<synchronous>, transform_indices = @transform_2, window_bounds = array<i64: 1, 32>}, {transform_indices = @transform_3, window_bounds = array<i64: 256, 32>}]} {
    %c0 = arith.constant 0 : index
    %c0_0 = arith.constant 0 : index
    %0 = vector.load %arg1[%c0, %c0_0] : memref<256x192xbf16, #tpu.memory_space<vmem>>, vector<256x192xbf16>
    %c0_1 = arith.constant 0 : index
    %c0_2 = arith.constant 0 : index
    %1 = vector.load %arg2[%c0_1, %c0_2] : memref<192x32xbf16, #tpu.memory_space<vmem>>, vector<192x32xbf16>
    %cst = arith.constant dense<0.000000e+00> : vector<256x32xf32>
    %2 = tpu.matmul %0, %1, %cst {dimension_numbers = #tpu.dot_dimension_numbers<[1], [0], [0], [1], [0, 0, 1, 1], [], []>} : vector<256x192xbf16>, vector<192x32xbf16>, vector<256x32xf32> -> vector<256x32xf32>
    %c0_3 = arith.constant 0 : index
    %c0_4 = arith.constant 0 : index
    %3 = vector.load %arg3[%c0_3, %c0_4] : memref<1x32xf32, #tpu.memory_space<vmem>>, vector<1x32xf32>
    %4 = vector.broadcast %3 : vector<1x32xf32> to vector<256x32xf32>
    %5 = arith.addf %2, %4 : vector<256x32xf32>
    %cst_5 = arith.constant 0.000000e+00 : f32
    %6 = vector.broadcast %cst_5 : f32 to vector<256x32xf32>
    %7 = arith.maximumf %5, %6 : vector<256x32xf32>
    %8 = arith.truncf %7 : vector<256x32xf32> to vector<256x32xbf16>
    %c0_6 = arith.constant 0 : index
    %c0_7 = arith.constant 0 : index
    %9 = vector.load %arg4[%c0_6, %c0_7] : memref<256x32xbf16, #tpu.memory_space<vmem>>, vector<256x32xbf16>
    tpu.vector_store %arg4[%c0_6, %c0_7], %8 {strides = array<i32>} : memref<256x32xbf16, #tpu.memory_space<vmem>>, vector<256x32xbf16>,
    return
  }
  func.func @transform_0(%arg0: i32) -> (i32, i32) {
    %c0_i32 = arith.constant 0 : i32
    %c0_i32_0 = arith.constant 0 : i32
    return %arg0, %c0_i32 : i32, i32
  }
  func.func @transform_1(%arg0: i32) -> (i32, i32) {
    %c0_i32 = arith.constant 0 : i32
    %c0_i32_0 = arith.constant 0 : i32
    %c0_i32_1 = arith.constant 0 : i32
    return %c0_i32, %c0_i32_0 : i32, i32
  }
  func.func @transform_2(%arg0: i32) -> (i32, i32) {
    %c0_i32 = arith.constant 0 : i32
    %c0_i32_0 = arith.constant 0 : i32
    %c0_i32_1 = arith.constant 0 : i32
    return %c0_i32, %c0_i32_0 : i32, i32
  }
  func.func @transform_3(%arg0: i32) -> (i32, i32) {
    %c0_i32 = arith.constant 0 : i32
    %c0_i32_0 = arith.constant 0 : i32
    return %arg0, %c0_i32 : i32, i32
  }
}

module attributes {stable_mosaic.version = 11 : i64} {
  func.func @_matmul_bias_kernel(%arg0: i32, %arg1: memref<256x512xbf16, #tpu.memory_space<vmem>>, %arg2: memref<512x64xbf16, #tpu.memory_space<vmem>>, %arg3: memref<1x64xf32, #tpu.memory_space<vmem>>, %arg4: memref<256x64xbf16, #tpu.memory_space<vmem>>) attributes {dimension_semantics = [#tpu.dimension_semantics<parallel>], iteration_bounds = array<i64: 2>, scalar_prefetch = 0 : i64, scratch_operands = 0 : i64, tpu.core_type = #tpu.core_type<tc>, window_params = [{transform_indices = @transform_0, window_bounds = array<i64: 256, 512>}, {pipeline_mode = #tpu.pipeline_mode<synchronous>, transform_indices = @transform_1, window_bounds = array<i64: 512, 64>}, {pipeline_mode = #tpu.pipeline_mode<synchronous>, transform_indices = @transform_2, window_bounds = array<i64: 1, 64>}, {transform_indices = @transform_3, window_bounds = array<i64: 256, 64>}]} {
    %c0 = arith.constant 0 : index
    %c0_0 = arith.constant 0 : index
    %0 = vector.load %arg1[%c0, %c0_0] : memref<256x512xbf16, #tpu.memory_space<vmem>>, vector<256x512xbf16>
    %c0_1 = arith.constant 0 : index
    %c0_2 = arith.constant 0 : index
    %1 = vector.load %arg2[%c0_1, %c0_2] : memref<512x64xbf16, #tpu.memory_space<vmem>>, vector<512x64xbf16>
    %cst = arith.constant dense<0.000000e+00> : vector<256x64xf32>
    %2 = tpu.matmul %0, %1, %cst {dimension_numbers = #tpu.dot_dimension_numbers<[1], [0], [0], [1], [0, 0, 1, 1], [], []>} : vector<256x512xbf16>, vector<512x64xbf16>, vector<256x64xf32> -> vector<256x64xf32>
    %c0_3 = arith.constant 0 : index
    %c0_4 = arith.constant 0 : index
    %3 = vector.load %arg3[%c0_3, %c0_4] : memref<1x64xf32, #tpu.memory_space<vmem>>, vector<1x64xf32>
    %4 = vector.broadcast %3 : vector<1x64xf32> to vector<256x64xf32>
    %5 = arith.addf %2, %4 : vector<256x64xf32>
    %cst_5 = arith.constant 0.000000e+00 : f32
    %6 = vector.broadcast %cst_5 : f32 to vector<256x64xf32>
    %7 = arith.maximumf %5, %6 : vector<256x64xf32>
    %8 = arith.truncf %7 : vector<256x64xf32> to vector<256x64xbf16>
    %c0_6 = arith.constant 0 : index
    %c0_7 = arith.constant 0 : index
    %9 = vector.load %arg4[%c0_6, %c0_7] : memref<256x64xbf16, #tpu.memory_space<vmem>>, vector<256x64xbf16>
    tpu.vector_store %arg4[%c0_6, %c0_7], %8 {strides = array<i32>} : memref<256x64xbf16, #tpu.memory_space<vmem>>, vector<256x64xbf16>,
    return
  }
  func.func @transform_0(%arg0: i32) -> (i32, i32) {
    %c0_i32 = arith.constant 0 : i32
    %c0_i32_0 = arith.constant 0 : i32
    return %arg0, %c0_i32 : i32, i32
  }
  func.func @transform_1(%arg0: i32) -> (i32, i32) {
    %c0_i32 = arith.constant 0 : i32
    %c0_i32_0 = arith.constant 0 : i32
    %c0_i32_1 = arith.constant 0 : i32
    return %c0_i32, %c0_i32_0 : i32, i32
  }
  func.func @transform_2(%arg0: i32) -> (i32, i32) {
    %c0_i32 = arith.constant 0 : i32
    %c0_i32_0 = arith.constant 0 : i32
    %c0_i32_1 = arith.constant 0 : i32
    return %c0_i32, %c0_i32_0 : i32, i32
  }
  func.func @transform_3(%arg0: i32) -> (i32, i32) {
    %c0_i32 = arith.constant 0 : i32
    %c0_i32_0 = arith.constant 0 : i32
    return %arg0, %c0_i32 : i32, i32
  }
}

module attributes {stable_mosaic.version = 11 : i64} {
  func.func @_matmul_bias_kernel(%arg0: i32, %arg1: memref<256x576xbf16, #tpu.memory_space<vmem>>, %arg2: memref<576x64xbf16, #tpu.memory_space<vmem>>, %arg3: memref<1x64xf32, #tpu.memory_space<vmem>>, %arg4: memref<256x64xbf16, #tpu.memory_space<vmem>>) attributes {dimension_semantics = [#tpu.dimension_semantics<parallel>], iteration_bounds = array<i64: 2>, scalar_prefetch = 0 : i64, scratch_operands = 0 : i64, tpu.core_type = #tpu.core_type<tc>, window_params = [{transform_indices = @transform_0, window_bounds = array<i64: 256, 576>}, {pipeline_mode = #tpu.pipeline_mode<synchronous>, transform_indices = @transform_1, window_bounds = array<i64: 576, 64>}, {pipeline_mode = #tpu.pipeline_mode<synchronous>, transform_indices = @transform_2, window_bounds = array<i64: 1, 64>}, {transform_indices = @transform_3, window_bounds = array<i64: 256, 64>}]} {
    %c0 = arith.constant 0 : index
    %c0_0 = arith.constant 0 : index
    %0 = vector.load %arg1[%c0, %c0_0] : memref<256x576xbf16, #tpu.memory_space<vmem>>, vector<256x576xbf16>
    %c0_1 = arith.constant 0 : index
    %c0_2 = arith.constant 0 : index
    %1 = vector.load %arg2[%c0_1, %c0_2] : memref<576x64xbf16, #tpu.memory_space<vmem>>, vector<576x64xbf16>
    %cst = arith.constant dense<0.000000e+00> : vector<256x64xf32>
    %2 = tpu.matmul %0, %1, %cst {dimension_numbers = #tpu.dot_dimension_numbers<[1], [0], [0], [1], [0, 0, 1, 1], [], []>} : vector<256x576xbf16>, vector<576x64xbf16>, vector<256x64xf32> -> vector<256x64xf32>
    %c0_3 = arith.constant 0 : index
    %c0_4 = arith.constant 0 : index
    %3 = vector.load %arg3[%c0_3, %c0_4] : memref<1x64xf32, #tpu.memory_space<vmem>>, vector<1x64xf32>
    %4 = vector.broadcast %3 : vector<1x64xf32> to vector<256x64xf32>
    %5 = arith.addf %2, %4 : vector<256x64xf32>
    %cst_5 = arith.constant 0.000000e+00 : f32
    %6 = vector.broadcast %cst_5 : f32 to vector<256x64xf32>
    %7 = arith.maximumf %5, %6 : vector<256x64xf32>
    %8 = arith.truncf %7 : vector<256x64xf32> to vector<256x64xbf16>
    %c0_6 = arith.constant 0 : index
    %c0_7 = arith.constant 0 : index
    %9 = vector.load %arg4[%c0_6, %c0_7] : memref<256x64xbf16, #tpu.memory_space<vmem>>, vector<256x64xbf16>
    tpu.vector_store %arg4[%c0_6, %c0_7], %8 {strides = array<i32>} : memref<256x64xbf16, #tpu.memory_space<vmem>>, vector<256x64xbf16>,
    return
  }
  func.func @transform_0(%arg0: i32) -> (i32, i32) {
    %c0_i32 = arith.constant 0 : i32
    %c0_i32_0 = arith.constant 0 : i32
    return %arg0, %c0_i32 : i32, i32
  }
  func.func @transform_1(%arg0: i32) -> (i32, i32) {
    %c0_i32 = arith.constant 0 : i32
    %c0_i32_0 = arith.constant 0 : i32
    %c0_i32_1 = arith.constant 0 : i32
    return %c0_i32, %c0_i32_0 : i32, i32
  }
  func.func @transform_2(%arg0: i32) -> (i32, i32) {
    %c0_i32 = arith.constant 0 : i32
    %c0_i32_0 = arith.constant 0 : i32
    %c0_i32_1 = arith.constant 0 : i32
    return %c0_i32, %c0_i32_0 : i32, i32
  }
  func.func @transform_3(%arg0: i32) -> (i32, i32) {
    %c0_i32 = arith.constant 0 : i32
    %c0_i32_0 = arith.constant 0 : i32
    return %arg0, %c0_i32 : i32, i32
  }
}

module attributes {stable_mosaic.version = 11 : i64} {
  func.func @_matmul_bias_kernel(%arg0: i32, %arg1: memref<8x2304xbf16, #tpu.memory_space<vmem>>, %arg2: memref<2304x96xbf16, #tpu.memory_space<vmem>>, %arg3: memref<1x96xf32, #tpu.memory_space<vmem>>, %arg4: memref<8x96xf32, #tpu.memory_space<vmem>>) attributes {dimension_semantics = [#tpu.dimension_semantics<parallel>], iteration_bounds = array<i64: 1>, scalar_prefetch = 0 : i64, scratch_operands = 0 : i64, tpu.core_type = #tpu.core_type<tc>, window_params = [{transform_indices = @transform_0, window_bounds = array<i64: 8, 2304>}, {pipeline_mode = #tpu.pipeline_mode<synchronous>, transform_indices = @transform_1, window_bounds = array<i64: 2304, 96>}, {pipeline_mode = #tpu.pipeline_mode<synchronous>, transform_indices = @transform_2, window_bounds = array<i64: 1, 96>}, {transform_indices = @transform_3, window_bounds = array<i64: 8, 96>}]} {
    %c0 = arith.constant 0 : index
    %c0_0 = arith.constant 0 : index
    %0 = vector.load %arg1[%c0, %c0_0] : memref<8x2304xbf16, #tpu.memory_space<vmem>>, vector<8x2304xbf16>
    %c0_1 = arith.constant 0 : index
    %c0_2 = arith.constant 0 : index
    %1 = vector.load %arg2[%c0_1, %c0_2] : memref<2304x96xbf16, #tpu.memory_space<vmem>>, vector<2304x96xbf16>
    %cst = arith.constant dense<0.000000e+00> : vector<8x96xf32>
    %2 = tpu.matmul %0, %1, %cst {dimension_numbers = #tpu.dot_dimension_numbers<[1], [0], [0], [1], [0, 0, 1, 1], [], []>} : vector<8x2304xbf16>, vector<2304x96xbf16>, vector<8x96xf32> -> vector<8x96xf32>
    %c0_3 = arith.constant 0 : index
    %c0_4 = arith.constant 0 : index
    %3 = vector.load %arg3[%c0_3, %c0_4] : memref<1x96xf32, #tpu.memory_space<vmem>>, vector<1x96xf32>
    %4 = vector.broadcast %3 : vector<1x96xf32> to vector<8x96xf32>
    %5 = arith.addf %2, %4 : vector<8x96xf32>
    %c0_5 = arith.constant 0 : index
    %c0_6 = arith.constant 0 : index
    %6 = vector.load %arg4[%c0_5, %c0_6] : memref<8x96xf32, #tpu.memory_space<vmem>>, vector<8x96xf32>
    tpu.vector_store %arg4[%c0_5, %c0_6], %5 {strides = array<i32>} : memref<8x96xf32, #tpu.memory_space<vmem>>, vector<8x96xf32>,
    return
  }
  func.func @transform_0(%arg0: i32) -> (i32, i32) {
    %c0_i32 = arith.constant 0 : i32
    %c0_i32_0 = arith.constant 0 : i32
    return %arg0, %c0_i32 : i32, i32
  }
  func.func @transform_1(%arg0: i32) -> (i32, i32) {
    %c0_i32 = arith.constant 0 : i32
    %c0_i32_0 = arith.constant 0 : i32
    %c0_i32_1 = arith.constant 0 : i32
    return %c0_i32, %c0_i32_0 : i32, i32
  }
  func.func @transform_2(%arg0: i32) -> (i32, i32) {
    %c0_i32 = arith.constant 0 : i32
    %c0_i32_0 = arith.constant 0 : i32
    %c0_i32_1 = arith.constant 0 : i32
    return %c0_i32, %c0_i32_0 : i32, i32
  }
  func.func @transform_3(%arg0: i32) -> (i32, i32) {
    %c0_i32 = arith.constant 0 : i32
    %c0_i32_0 = arith.constant 0 : i32
    return %arg0, %c0_i32 : i32, i32
  }
}

module attributes {stable_mosaic.version = 11 : i64} {
  func.func @_gru_kernel(%arg0: i32, %arg1: memref<4x2x96xf32, #tpu.memory_space<vmem>>, %arg2: memref<32x96xbf16, #tpu.memory_space<vmem>>, %arg3: memref<1x96xf32, #tpu.memory_space<vmem>>, %arg4: memref<2x32xf32, #tpu.memory_space<vmem>>, %arg5: memref<4x2x32xf32, #tpu.memory_space<vmem>>) attributes {dimension_semantics = [#tpu.dimension_semantics<arbitrary>], iteration_bounds = array<i64: 1>, scalar_prefetch = 0 : i64, scratch_operands = 0 : i64, tpu.core_type = #tpu.core_type<tc>, window_params = [{pipeline_mode = #tpu.pipeline_mode<synchronous>, transform_indices = @transform_0, window_bounds = array<i64: 4, 2, 96>}, {pipeline_mode = #tpu.pipeline_mode<synchronous>, transform_indices = @transform_1, window_bounds = array<i64: 32, 96>}, {pipeline_mode = #tpu.pipeline_mode<synchronous>, transform_indices = @transform_2, window_bounds = array<i64: 1, 96>}, {pipeline_mode = #tpu.pipeline_mode<synchronous>, transform_indices = @transform_3, window_bounds = array<i64: 2, 32>}, {pipeline_mode = #tpu.pipeline_mode<synchronous>, transform_indices = @transform_4, window_bounds = array<i64: 4, 2, 32>}]} {
    %c0 = arith.constant 0 : index
    %c0_0 = arith.constant 0 : index
    %0 = vector.load %arg2[%c0, %c0_0] : memref<32x96xbf16, #tpu.memory_space<vmem>>, vector<32x96xbf16>
    %c0_1 = arith.constant 0 : index
    %c0_2 = arith.constant 0 : index
    %1 = vector.load %arg3[%c0_1, %c0_2] : memref<1x96xf32, #tpu.memory_space<vmem>>, vector<1x96xf32>
    %c0_3 = arith.constant 0 : index
    %c0_4 = arith.constant 0 : index
    %2 = vector.load %arg4[%c0_3, %c0_4] : memref<2x32xf32, #tpu.memory_space<vmem>>, vector<2x32xf32>
    %c0_i32 = arith.constant 0 : i32
    %c4_i32 = arith.constant 4 : i32
    %3 = arith.addi %c0_i32, %c4_i32 : i32
    %c1_i32 = arith.constant 1 : i32
    %4 = scf.for %arg6 = %c0_i32 to %3 step %c1_i32 iter_args(%arg7 = %2) -> (vector<2x32xf32>)  : i32 {
      %5 = arith.index_cast %arg6 : i32 to index
      %c0_6 = arith.constant 0 : index
      %c0_7 = arith.constant 0 : index
      %6 = vector.load %arg1[%5, %c0_6, %c0_7] : memref<4x2x96xf32, #tpu.memory_space<vmem>>, vector<1x2x96xf32>
      %7 = vector.shape_cast %6 : vector<1x2x96xf32> to vector<2x96xf32>
      %8 = arith.truncf %arg7 : vector<2x32xf32> to vector<2x32xbf16>
      %cst = arith.constant dense<0.000000e+00> : vector<2x96xf32>
      %9 = tpu.matmul %8, %0, %cst {dimension_numbers = #tpu.dot_dimension_numbers<[1], [0], [0], [1], [0, 0, 1, 1], [], []>} : vector<2x32xbf16>, vector<32x96xbf16>, vector<2x96xf32> -> vector<2x96xf32>
      %10 = vector.broadcast %1 : vector<1x96xf32> to vector<2x96xf32>
      %11 = arith.addf %9, %10 : vector<2x96xf32>
      %12 = vector.extract_strided_slice %7 {offsets = [0, 0], sizes = [2, 32], strides = [1, 1]} : vector<2x96xf32> to vector<2x32xf32>
      %13 = vector.extract_strided_slice %11 {offsets = [0, 0], sizes = [2, 32], strides = [1, 1]} : vector<2x96xf32> to vector<2x32xf32>
      %14 = arith.addf %12, %13 : vector<2x32xf32>
      %15 = arith.negf %14 : vector<2x32xf32>
      %16 = math.exp %15 : vector<2x32xf32>
      %cst_8 = arith.constant 1.000000e+00 : f32
      %17 = vector.broadcast %cst_8 : f32 to vector<2x32xf32>
      %18 = arith.addf %17, %16 : vector<2x32xf32>
      %19 = arith.divf %17, %18 : vector<2x32xf32>
      %20 = vector.extract_strided_slice %7 {offsets = [0, 32], sizes = [2, 32], strides = [1, 1]} : vector<2x96xf32> to vector<2x32xf32>
      %21 = vector.extract_strided_slice %11 {offsets = [0, 32], sizes = [2, 32], strides = [1, 1]} : vector<2x96xf32> to vector<2x32xf32>
      %22 = arith.addf %20, %21 : vector<2x32xf32>
      %23 = arith.negf %22 : vector<2x32xf32>
      %24 = math.exp %23 : vector<2x32xf32>
      %cst_9 = arith.constant 1.000000e+00 : f32
      %25 = vector.broadcast %cst_9 : f32 to vector<2x32xf32>
      %26 = arith.addf %25, %24 : vector<2x32xf32>
      %27 = arith.divf %25, %26 : vector<2x32xf32>
      %28 = vector.extract_strided_slice %7 {offsets = [0, 64], sizes = [2, 32], strides = [1, 1]} : vector<2x96xf32> to vector<2x32xf32>
      %29 = vector.extract_strided_slice %11 {offsets = [0, 64], sizes = [2, 32], strides = [1, 1]} : vector<2x96xf32> to vector<2x32xf32>
      %30 = arith.mulf %19, %29 : vector<2x32xf32>
      %31 = arith.addf %28, %30 : vector<2x32xf32>
      %32 = math.tanh %31 : vector<2x32xf32>
      %cst_10 = arith.constant 1.000000e+00 : f32
      %33 = vector.broadcast %cst_10 : f32 to vector<2x32xf32>
      %34 = arith.subf %33, %27 : vector<2x32xf32>
      %35 = arith.mulf %34, %32 : vector<2x32xf32>
      %36 = arith.mulf %27, %arg7 : vector<2x32xf32>
      %37 = arith.addf %35, %36 : vector<2x32xf32>
      %38 = arith.index_cast %arg6 : i32 to index
      %c0_11 = arith.constant 0 : index
      %c0_12 = arith.constant 0 : index
      %39 = vector.load %arg5[%38, %c0_11, %c0_12] : memref<4x2x32xf32, #tpu.memory_space<vmem>>, vector<1x2x32xf32>
      %40 = vector.shape_cast %39 : vector<1x2x32xf32> to vector<2x32xf32>
      %41 = vector.shape_cast %37 : vector<2x32xf32> to vector<1x2x32xf32>
      tpu.vector_store %arg5[%38, %c0_11, %c0_12], %41 {strides = array<i32>} : memref<4x2x32xf32, #tpu.memory_space<vmem>>, vector<1x2x32xf32>,
      scf.yield %37 : vector<2x32xf32>
    }
    %c4_i32_5 = arith.constant 4 : i32
    return
  }
  func.func @transform_0(%arg0: i32) -> (i32, i32, i32) {
    %c0_i32 = arith.constant 0 : i32
    %c0_i32_0 = arith.constant 0 : i32
    %c0_i32_1 = arith.constant 0 : i32
    %c0_i32_2 = arith.constant 0 : i32
    return %c0_i32, %c0_i32_0, %c0_i32_1 : i32, i32, i32
  }
  func.func @transform_1(%arg0: i32) -> (i32, i32) {
    %c0_i32 = arith.constant 0 : i32
    %c0_i32_0 = arith.constant 0 : i32
    %c0_i32_1 = arith.constant 0 : i32
    return %c0_i32, %c0_i32_0 : i32, i32
  }
  func.func @transform_2(%arg0: i32) -> (i32, i32) {
    %c0_i32 = arith.constant 0 : i32
    %c0_i32_0 = arith.constant 0 : i32
    %c0_i32_1 = arith.constant 0 : i32
    return %c0_i32, %c0_i32_0 : i32, i32
  }
  func.func @transform_3(%arg0: i32) -> (i32, i32) {
    %c0_i32 = arith.constant 0 : i32
    %c0_i32_0 = arith.constant 0 : i32
    %c0_i32_1 = arith.constant 0 : i32
    return %c0_i32, %c0_i32_0 : i32, i32
  }
  func.func @transform_4(%arg0: i32) -> (i32, i32, i32) {
    %c0_i32 = arith.constant 0 : i32
    %c0_i32_0 = arith.constant 0 : i32
    %c0_i32_1 = arith.constant 0 : i32
    %c0_i32_2 = arith.constant 0 : i32
    return %c0_i32, %c0_i32_0, %c0_i32_1 : i32, i32, i32
  }
}

module attributes {stable_mosaic.version = 11 : i64} {
  func.func @_head_kernel(%arg0: i32, %arg1: memref<8x32xbf16, #tpu.memory_space<vmem>>, %arg2: memref<32x256xbf16, #tpu.memory_space<vmem>>, %arg3: memref<1x256xf32, #tpu.memory_space<vmem>>, %arg4: memref<256x512xbf16, #tpu.memory_space<vmem>>, %arg5: memref<1x512xf32, #tpu.memory_space<vmem>>, %arg6: memref<512x16xbf16, #tpu.memory_space<vmem>>, %arg7: memref<1x16xf32, #tpu.memory_space<vmem>>, %arg8: memref<8x16xf32, #tpu.memory_space<vmem>>) attributes {dimension_semantics = [#tpu.dimension_semantics<parallel>], iteration_bounds = array<i64: 1>, scalar_prefetch = 0 : i64, scratch_operands = 0 : i64, tpu.core_type = #tpu.core_type<tc>, window_params = [{transform_indices = @transform_0, window_bounds = array<i64: 8, 32>}, {pipeline_mode = #tpu.pipeline_mode<synchronous>, transform_indices = @transform_1, window_bounds = array<i64: 32, 256>}, {pipeline_mode = #tpu.pipeline_mode<synchronous>, transform_indices = @transform_2, window_bounds = array<i64: 1, 256>}, {pipeline_mode = #tpu.pipeline_mode<synchronous>, transform_indices = @transform_3, window_bounds = array<i64: 256, 512>}, {pipeline_mode = #tpu.pipeline_mode<synchronous>, transform_indices = @transform_4, window_bounds = array<i64: 1, 512>}, {pipeline_mode = #tpu.pipeline_mode<synchronous>, transform_indices = @transform_5, window_bounds = array<i64: 512, 16>}, {pipeline_mode = #tpu.pipeline_mode<synchronous>, transform_indices = @transform_6, window_bounds = array<i64: 1, 16>}, {transform_indices = @transform_7, window_bounds = array<i64: 8, 16>}]} {
    %c0 = arith.constant 0 : index
    %c0_0 = arith.constant 0 : index
    %0 = vector.load %arg1[%c0, %c0_0] : memref<8x32xbf16, #tpu.memory_space<vmem>>, vector<8x32xbf16>
    %c0_1 = arith.constant 0 : index
    %c0_2 = arith.constant 0 : index
    %1 = vector.load %arg2[%c0_1, %c0_2] : memref<32x256xbf16, #tpu.memory_space<vmem>>, vector<32x256xbf16>
    %cst = arith.constant dense<0.000000e+00> : vector<8x256xf32>
    %2 = tpu.matmul %0, %1, %cst {dimension_numbers = #tpu.dot_dimension_numbers<[1], [0], [0], [1], [0, 0, 1, 1], [], []>} : vector<8x32xbf16>, vector<32x256xbf16>, vector<8x256xf32> -> vector<8x256xf32>
    %c0_3 = arith.constant 0 : index
    %c0_4 = arith.constant 0 : index
    %3 = vector.load %arg3[%c0_3, %c0_4] : memref<1x256xf32, #tpu.memory_space<vmem>>, vector<1x256xf32>
    %4 = vector.broadcast %3 : vector<1x256xf32> to vector<8x256xf32>
    %5 = arith.addf %2, %4 : vector<8x256xf32>
    %cst_5 = arith.constant 0.000000e+00 : f32
    %6 = vector.broadcast %cst_5 : f32 to vector<8x256xf32>
    %7 = arith.maximumf %5, %6 : vector<8x256xf32>
    %8 = arith.truncf %7 : vector<8x256xf32> to vector<8x256xbf16>
    %c0_6 = arith.constant 0 : index
    %c0_7 = arith.constant 0 : index
    %9 = vector.load %arg4[%c0_6, %c0_7] : memref<256x512xbf16, #tpu.memory_space<vmem>>, vector<256x512xbf16>
    %cst_8 = arith.constant dense<0.000000e+00> : vector<8x512xf32>
    %10 = tpu.matmul %8, %9, %cst_8 {dimension_numbers = #tpu.dot_dimension_numbers<[1], [0], [0], [1], [0, 0, 1, 1], [], []>} : vector<8x256xbf16>, vector<256x512xbf16>, vector<8x512xf32> -> vector<8x512xf32>
    %c0_9 = arith.constant 0 : index
    %c0_10 = arith.constant 0 : index
    %11 = vector.load %arg5[%c0_9, %c0_10] : memref<1x512xf32, #tpu.memory_space<vmem>>, vector<1x512xf32>
    %12 = vector.broadcast %11 : vector<1x512xf32> to vector<8x512xf32>
    %13 = arith.addf %10, %12 : vector<8x512xf32>
    %cst_11 = arith.constant 0.000000e+00 : f32
    %14 = vector.broadcast %cst_11 : f32 to vector<8x512xf32>
    %15 = arith.maximumf %13, %14 : vector<8x512xf32>
    %16 = arith.truncf %15 : vector<8x512xf32> to vector<8x512xbf16>
    %c0_12 = arith.constant 0 : index
    %c0_13 = arith.constant 0 : index
    %17 = vector.load %arg6[%c0_12, %c0_13] : memref<512x16xbf16, #tpu.memory_space<vmem>>, vector<512x16xbf16>
    %cst_14 = arith.constant dense<0.000000e+00> : vector<8x16xf32>
    %18 = tpu.matmul %16, %17, %cst_14 {dimension_numbers = #tpu.dot_dimension_numbers<[1], [0], [0], [1], [0, 0, 1, 1], [], []>} : vector<8x512xbf16>, vector<512x16xbf16>, vector<8x16xf32> -> vector<8x16xf32>
    %c0_15 = arith.constant 0 : index
    %c0_16 = arith.constant 0 : index
    %19 = vector.load %arg7[%c0_15, %c0_16] : memref<1x16xf32, #tpu.memory_space<vmem>>, vector<1x16xf32>
    %20 = vector.broadcast %19 : vector<1x16xf32> to vector<8x16xf32>
    %21 = arith.addf %18, %20 : vector<8x16xf32>
    %c0_17 = arith.constant 0 : index
    %c0_18 = arith.constant 0 : index
    %22 = vector.load %arg8[%c0_17, %c0_18] : memref<8x16xf32, #tpu.memory_space<vmem>>, vector<8x16xf32>
    tpu.vector_store %arg8[%c0_17, %c0_18], %21 {strides = array<i32>} : memref<8x16xf32, #tpu.memory_space<vmem>>, vector<8x16xf32>,
    return
  }
  func.func @transform_0(%arg0: i32) -> (i32, i32) {
    %c0_i32 = arith.constant 0 : i32
    %c0_i32_0 = arith.constant 0 : i32
    return %arg0, %c0_i32 : i32, i32
  }
  func.func @transform_1(%arg0: i32) -> (i32, i32) {
    %c0_i32 = arith.constant 0 : i32
    %c0_i32_0 = arith.constant 0 : i32
    %c0_i32_1 = arith.constant 0 : i32
    return %c0_i32, %c0_i32_0 : i32, i32
  }
  func.func @transform_2(%arg0: i32) -> (i32, i32) {
    %c0_i32 = arith.constant 0 : i32
    %c0_i32_0 = arith.constant 0 : i32
    %c0_i32_1 = arith.constant 0 : i32
    return %c0_i32, %c0_i32_0 : i32, i32
  }
  func.func @transform_3(%arg0: i32) -> (i32, i32) {
    %c0_i32 = arith.constant 0 : i32
    %c0_i32_0 = arith.constant 0 : i32
    %c0_i32_1 = arith.constant 0 : i32
    return %c0_i32, %c0_i32_0 : i32, i32
  }
  func.func @transform_4(%arg0: i32) -> (i32, i32) {
    %c0_i32 = arith.constant 0 : i32
    %c0_i32_0 = arith.constant 0 : i32
    %c0_i32_1 = arith.constant 0 : i32
    return %c0_i32, %c0_i32_0 : i32, i32
  }
  func.func @transform_5(%arg0: i32) -> (i32, i32) {
    %c0_i32 = arith.constant 0 : i32
    %c0_i32_0 = arith.constant 0 : i32
    %c0_i32_1 = arith.constant 0 : i32
    return %c0_i32, %c0_i32_0 : i32, i32
  }
  func.func @transform_6(%arg0: i32) -> (i32, i32) {
    %c0_i32 = arith.constant 0 : i32
    %c0_i32_0 = arith.constant 0 : i32
    %c0_i32_1 = arith.constant 0 : i32
    return %c0_i32, %c0_i32_0 : i32, i32
  }
  func.func @transform_7(%arg0: i32) -> (i32, i32) {
    %c0_i32 = arith.constant 0 : i32
    %c0_i32_0 = arith.constant 0 : i32
    return %arg0, %c0_i32 : i32, i32
  }
}

</mosaic_0001>

<bundles_post_ra>
// kernel: koopman_forward.6
= control target key start
LH: loop header
LB: loop body
LE: loop exit
PB: predicated region body
PF: predicated region fallthrough
CT: control target
= control target key end

     0   :  { %s1176_s12 = smov 0   ;;  %s1410_s0 = inlined_call_operand.vmem [shape: bf16[2048,192], index: 0, kind: input, shape index: {}]   ;;  %s1411_s1 = inlined_call_operand.vmem [shape: bf16[192,32], index: 1, kind: input, shape index: {}]   ;;  %s1412_s2 = inlined_call_operand.vmem [shape: f32[1,32], index: 2, kind: input, shape index: {}]   ;;  %s1413_s3 = inlined_call_operand.vmem [shape: bf16[2048,32], index: 3, kind: output, shape index: {}]  }
   0x1 LB: > { %s916_s13 = sadd.s32 4294967295, %s1153_s12   ;;  %p920_p0 = scmp.ge.s32.totalorder %s1153_s12, 1  ;;  %s1153_s12 = sphi %s1176_s12, %s13_s12  }
   0x2   : > { %p139_p1 = scmp.lt.s32.totalorder %s1153_s12, 9 }
   0x4   : > { %p140_p2 = pnand %p920_p0, %p139_p1 }
   0x5   : > { %v1087_v0 = vld [vmem:[%s1411_s1] sm:$0xff] (!%p140_p2)   ;;  %v1155_v1 = vmov (!%p140_p2), 0   ;;  %s921_s16 = sshll.u32 (!%p140_p2), %s916_s13, 5  ;;  %v1088_v2 = vld [vmem:[%s1411_s1 + $0x8] sm:$0xff] (!%p140_p2)   ;;  %v1089_v3 = vld [vmem:[%s1411_s1 + $0x10] sm:$0xff] (!%p140_p2)   ;;  %vm457_vm0 = vcmask (!%p140_p2), 523264  }
   0x6   : > { %143 = sbr.rel (%p140_p2) target bundleno = 331 (0x14b), region = 32  ;;  %506 = vmatprep.subr.bf16.mxu0 (!%p140_p2), %v1155_v1  ;;  %1054 = vmatprep.subr.bf16.mxu1 (!%p140_p2), %v1155_v1  ;;  %p165_p3 = scmp.lt.s32.totalorder (!%p140_p2), %s921_s16, 255  ;;  %v1090_v4 = vld [vmem:[%s1411_s1 + $0x18] sm:$0xff] (!%p140_p2)   ;;  %v1091_v6 = vld [vmem:[%s1411_s1 + $0x20] sm:$0xff] (!%p140_p2)   ;;  %v1092_v8 = vld [vmem:[%s1411_s1 + $0x28] sm:$0xff] (!%p140_p2)   ;;  %vm827_vm1 = vcmask (!%p140_p2), 257024  }
   0x7   : > { %507 = vmatpush1.bf16.msra.mxu0 (!%p140_p2), %v1087_v0  ;;  %1066 = vmatpush1.bf16.msra.mxu1 (!%p140_p2), %v1087_v0  ;;  %v1093_v9 = vld [vmem:[%s1411_s1 + $0x30] sm:$0xff] (!%p140_p2)   ;;  %v1094_v10 = vld [vmem:[%s1411_s1 + $0x38] sm:$0xff] (!%p140_p2)   ;;  %v1095_v11 = vld [vmem:[%s1411_s1 + $0x40] sm:$0xff] (!%p140_p2)  }
   0x8   : > { %508 = vmatprep.subr.bf16.mxu0 (!%p140_p2), %v1155_v1  ;;  %1055 = vmatprep.subr.bf16.mxu1 (!%p140_p2), %v1155_v1  ;;  %v1096_v12 = vld [vmem:[%s1411_s1 + $0x48] sm:$0xff] (!%p140_p2)   ;;  %v1097_v13 = vld [vmem:[%s1411_s1 + $0x50] sm:$0xff] (!%p140_p2)   ;;  %v1098_v14 = vld [vmem:[%s1411_s1 + $0x58] sm:$0xff] (!%p140_p2)  }
   0x9   : > { %v1303_v45 = vld [vmem:[%s1412_s2] ss:$0 sm:$0xff] (!%p140_p2) }
   0xb   : > { %509 = vmatpush1.bf16.msra.mxu0 (!%p140_p2), %v1088_v2  ;;  %1067 = vmatpush1.bf16.msra.mxu1 (!%p140_p2), %v1088_v2 }
   0xc   : > { %510 = vmatprep.subr.bf16.mxu0 (!%p140_p2), %v1155_v1  ;;  %1056 = vmatprep.subr.bf16.mxu1 (!%p140_p2), %v1155_v1 }
   0xd   : > { %s1415_s16 = smov (!%p165_p3, %s921_s16), 255 }
   0xe   : > { %s1021_s21 = sshll.u32 %s1415_s16, 3  ;;  %s925_s20 = sshll.u32 %s1415_s16, 2 }
   0xf   : > { %511 = vmatpush1.bf16.msra.mxu0 %v1089_v3  ;;  %1068 = vmatpush1.bf16.msra.mxu1 %v1089_v3  ;;  %s1208_s26 = scalar_lea.vmem %s1410_s0, %s1021_s21  ;;  %s1313_s16 = scalar_lea.vmem %s1413_s3, %s925_s20 }
  0x10   : > { %512 = vmatprep.subr.bf16.mxu0 %v1155_v1  ;;  %1057 = vmatprep.subr.bf16.mxu1 %v1155_v1  ;;  %v1101_v5 = vld [vmem:[%s1208_s26 + $0x4] ss:$8 sps:$4 sm:$0xff]   ;;  %v1099_v15 = vld [vmem:[%s1208_s26] ss:$8 sps:$4 sm:$0xff]   ;;  %v1105_v17 = vld [vmem:[%s1208_s26 + $0x14] ss:$8 sps:$4 sm:$0xff]  }
  0x11   : > { %v1104_v7 = vld [vmem:[%s1208_s26 + $0x84] ss:$8 sps:$4 sm:$0xff]   ;;  %971 = vmatprep.mubr.msk.bf16.mxu0 %vm457_vm0, %v1101_v5  ;;  %v1102_v16 = vld [vmem:[%s1208_s26 + $0x80] ss:$8 sps:$4 sm:$0xff]   ;;  %v1107_v18 = vld [vmem:[%s1208_s26 + $0x94] ss:$8 sps:$4 sm:$0xff]  }
  0x12   : > { %979 = vmatprep.mubr.msk.bf16.mxu1 %vm457_vm0, %v1104_v7  ;;  %v1109_v19 = vld [vmem:[%s1208_s26 + $0x10] ss:$8 sps:$4 sm:$0xff]   ;;  %v1111_v21 = vld [vmem:[%s1208_s26 + $0x24] ss:$8 sps:$4 sm:$0xff]   ;;  %v1115_v23 = vld [vmem:[%s1208_s26 + $0x20] ss:$8 sps:$4 sm:$0xff]  }
  0x13   : > { %513 = vmatpush1.bf16.msra.mxu0 %v1090_v4  ;;  %1069 = vmatpush1.bf16.msra.mxu1 %v1090_v4  ;;  %v1110_v20 = vld [vmem:[%s1208_s26 + $0x90] ss:$8 sps:$4 sm:$0xff]   ;;  %v1113_v22 = vld [vmem:[%s1208_s26 + $0xa4] ss:$8 sps:$4 sm:$0xff]   ;;  %v1116_v24 = vld [vmem:[%s1208_s26 + $0xa0] ss:$8 sps:$4 sm:$0xff]  }
  0x14   : > { %514 = vmatprep.subr.bf16.mxu0 %v1155_v1  ;;  %1058 = vmatprep.subr.bf16.mxu1 %v1155_v1  ;;  %v1117_v25 = vld [vmem:[%s1208_s26 + $0x34] ss:$8 sps:$4 sm:$0xff]   ;;  %v1121_v27 = vld [vmem:[%s1208_s26 + $0x30] ss:$8 sps:$4 sm:$0xff]   ;;  %v1123_v29 = vld [vmem:[%s1208_s26 + $0x44] ss:$8 sps:$4 sm:$0xff]  }
  0x15   : > { %v1119_v26 = vld [vmem:[%s1208_s26 + $0xb4] ss:$8 sps:$4 sm:$0xff]   ;;  %v1122_v28 = vld [vmem:[%s1208_s26 + $0xb0] ss:$8 sps:$4 sm:$0xff]   ;;  %v1125_v30 = vld [vmem:[%s1208_s26 + $0xc4] ss:$8 sps:$4 sm:$0xff]  }
  0x16   : > { %v1127_v31 = vld [vmem:[%s1208_s26 + $0x40] ss:$8 sps:$4 sm:$0xff]   ;;  %v1129_v33 = vld [vmem:[%s1208_s26 + $0x54] ss:$8 sps:$4 sm:$0xff]   ;;  %v1133_v35 = vld [vmem:[%s1208_s26 + $0x50] ss:$8 sps:$4 sm:$0xff]  }
  0x17   : > { %515 = vmatpush1.bf16.msra.mxu0 %v1091_v6  ;;  %1070 = vmatpush1.bf16.msra.mxu1 %v1091_v6  ;;  %v1128_v32 = vld [vmem:[%s1208_s26 + $0xc0] ss:$8 sps:$4 sm:$0xff]   ;;  %v1131_v34 = vld [vmem:[%s1208_s26 + $0xd4] ss:$8 sps:$4 sm:$0xff]   ;;  %v1134_v36 = vld [vmem:[%s1208_s26 + $0xd0] ss:$8 sps:$4 sm:$0xff]  }
  0x18   : > { %516 = vmatprep.subr.bf16.mxu0 %v1155_v1  ;;  %1059 = vmatprep.subr.bf16.mxu1 %v1155_v1  ;;  %v1135_v37 = vld [vmem:[%s1208_s26 + $0x64] ss:$8 sps:$4 sm:$0xff]   ;;  %v1139_v39 = vld [vmem:[%s1208_s26 + $0x60] ss:$8 sps:$4 sm:$0xff]   ;;  %v1141_v41 = vld [vmem:[%s1208_s26 + $0x74] ss:$8 sps:$4 sm:$0xff]  }
  0x19   : > { %v1137_v38 = vld [vmem:[%s1208_s26 + $0xe4] ss:$8 sps:$4 sm:$0xff]   ;;  %v1140_v40 = vld [vmem:[%s1208_s26 + $0xe0] ss:$8 sps:$4 sm:$0xff]   ;;  %v1143_v42 = vld [vmem:[%s1208_s26 + $0xf4] ss:$8 sps:$4 sm:$0xff]  }
  0x1a   : > { %v1145_v43 = vld [vmem:[%s1208_s26 + $0x70] ss:$8 sps:$4 sm:$0xff]  }
  0x1b   : > { %517 = vmatpush1.bf16.msra.mxu0 %v1092_v8  ;;  %1071 = vmatpush1.bf16.msra.mxu1 %v1092_v8  ;;  %v1146_v44 = vld [vmem:[%s1208_s26 + $0xf0] ss:$8 sps:$4 sm:$0xff]  }
  0x1c   : > { %518 = vmatprep.subr.bf16.mxu0 %v1155_v1  ;;  %1060 = vmatprep.subr.bf16.mxu1 %v1155_v1 }
  0x1f   : > { %519 = vmatpush1.bf16.msra.mxu0 %v1093_v9  ;;  %1072 = vmatpush1.bf16.msra.mxu1 %v1093_v9 }
  0x20   : > { %520 = vmatprep.subr.bf16.mxu0 %v1155_v1  ;;  %1061 = vmatprep.subr.bf16.mxu1 %v1155_v1 }
  0x23   : > { %521 = vmatpush1.bf16.msra.mxu0 %v1094_v10  ;;  %1073 = vmatpush1.bf16.msra.mxu1 %v1094_v10 }
  0x24   : > { %522 = vmatprep.subr.bf16.mxu0 %v1155_v1  ;;  %1062 = vmatprep.subr.bf16.mxu1 %v1155_v1 }
  0x27   : > { %523 = vmatpush1.bf16.msra.mxu0 %v1095_v11  ;;  %1074 = vmatpush1.bf16.msra.mxu1 %v1095_v11 }
  0x28   : > { %524 = vmatprep.subr.bf16.mxu0 %v1155_v1  ;;  %1063 = vmatprep.subr.bf16.mxu1 %v1155_v1 }
  0x2b   : > { %525 = vmatpush1.bf16.msra.mxu0 %v1096_v12  ;;  %1075 = vmatpush1.bf16.msra.mxu1 %v1096_v12 }
  0x2c   : > { %526 = vmatprep.subr.bf16.mxu0 %v1155_v1  ;;  %1064 = vmatprep.subr.bf16.mxu1 %v1155_v1 }
  0x2f   : > { %527 = vmatpush1.bf16.msra.mxu0 %v1097_v13  ;;  %1076 = vmatpush1.bf16.msra.mxu1 %v1097_v13 }
  0x30   : > { %528 = vmatprep.subr.bf16.mxu0 %v1155_v1  ;;  %1065 = vmatprep.subr.bf16.mxu1 %v1155_v1 }
  0x33   : > { %529 = vmatpush1.bf16.msra.mxu0 %v1098_v14  ;;  %1077 = vmatpush1.bf16.msra.mxu1 %v1098_v14 }
  0x36   : > { %539 = vmatmul.mubr.bf16.vlgmr.msra.gmra.mrb[0].mxu0 %v1099_v15  ;;  %603 = vmatmul.mubr.bf16.vlgmr.msra.gmra.mrb[0].mxu1 %v1102_v16 }
  0x37   : > { %972 = vmatprep.mubr.msk.bf16.mxu0 %vm457_vm0, %v1105_v17  ;;  %980 = vmatprep.mubr.msk.bf16.mxu1 %vm457_vm0, %v1107_v18 }
  0x3e   : > { %547 = vmatmul.mubr.bf16.gmra.mrb[4].mxu0 %v1109_v19  ;;  %611 = vmatmul.mubr.bf16.gmra.mrb[4].mxu1 %v1110_v20 }
  0x3f   : > { %973 = vmatprep.mubr.msk.bf16.mxu0 %vm457_vm0, %v1111_v21  ;;  %981 = vmatprep.mubr.msk.bf16.mxu1 %vm457_vm0, %v1113_v22 }
  0x46   : > { %555 = vmatmul.mubr.bf16.gmra.mrb[8].mxu0 %v1115_v23  ;;  %619 = vmatmul.mubr.bf16.gmra.mrb[8].mxu1 %v1116_v24 }
  0x47   : > { %974 = vmatprep.mubr.msk.bf16.mxu0 %vm457_vm0, %v1117_v25  ;;  %982 = vmatprep.mubr.msk.bf16.mxu1 %vm457_vm0, %v1119_v26 }
  0x4e   : > { %563 = vmatmul.mubr.bf16.gmra.mrb[12].mxu0 %v1121_v27  ;;  %627 = vmatmul.mubr.bf16.gmra.mrb[12].mxu1 %v1122_v28 }
  0x4f   : > { %975 = vmatprep.mubr.msk.bf16.mxu0 %vm457_vm0, %v1123_v29  ;;  %983 = vmatprep.mubr.msk.bf16.mxu1 %vm457_vm0, %v1125_v30 }
  0x56   : > { %571 = vmatmul.mubr.bf16.gmra.mrb[16].mxu0 %v1127_v31  ;;  %635 = vmatmul.mubr.bf16.gmra.mrb[16].mxu1 %v1128_v32 }
  0x57   : > { %976 = vmatprep.mubr.msk.bf16.mxu0 %vm457_vm0, %v1129_v33  ;;  %984 = vmatprep.mubr.msk.bf16.mxu1 %vm457_vm0, %v1131_v34 }
  0x5e   : > { %579 = vmatmul.mubr.bf16.gmra.mrb[20].mxu0 %v1133_v35  ;;  %643 = vmatmul.mubr.bf16.gmra.mrb[20].mxu1 %v1134_v36 }
  0x5f   : > { %977 = vmatprep.mubr.msk.bf16.mxu0 %vm457_vm0, %v1135_v37  ;;  %985 = vmatprep.mubr.msk.bf16.mxu1 %vm457_vm0, %v1137_v38 }
  0x66   : > { %587 = vmatmul.mubr.bf16.gmra.mrb[24].mxu0 %v1139_v39  ;;  %651 = vmatmul.mubr.bf16.gmra.mrb[24].mxu1 %v1140_v40 }
  0x67   : > { %978 = vmatprep.mubr.msk.bf16.mxu0 %vm457_vm0, %v1141_v41  ;;  %986 = vmatprep.mubr.msk.bf16.mxu1 %vm457_vm0, %v1143_v42 }
  0x6e   : > { %595 = vmatmul.mubr.bf16.gmra.mrb[28].mxu0 %v1145_v43  ;;  %659 = vmatmul.mubr.bf16.gmra.mrb[28].mxu1 %v1146_v44 }
 0x109   : > { %v540_v46 = vpop.f32.mrb[0].mxu0  ;;  %v604_v47 = vpop.f32.mrb[0].mxu1 }
 0x10a   : > { %v541_v48 = vadd.f32 %v1303_v45, %v540_v46  ;;  %v605_v49 = vadd.f32 %v1303_v45, %v604_v47  ;;  %v542_v50 = vpop.f32.mrb[1].mxu0  ;;  %v606_v51 = vpop.f32.mrb[1].mxu1 }
 0x10b   : > { %v543_v52 = vpop.f32.mrb[2].mxu0  ;;  %v607_v53 = vpop.f32.mrb[2].mxu1 }
 0x10c   : > { %v667_v54 = vmax.f32 %v541_v48, 0.0  ;;  %v683_v55 = vmax.f32 %v605_v49, 0.0  ;;  %v544_v56 = vadd.f32 %v1303_v45, %v543_v52  ;;  %v608_v57 = vadd.f32 %v1303_v45, %v607_v53  ;;  %v545_v58 = vpop.f32.mrb[3].mxu0  ;;  %v609_v59 = vpop.f32.mrb[3].mxu1 }
 0x10e   : > { %v1022_v60 = vpack.c.bf16 %v667_v54, %v667_v54  ;;  %v1038_v61 = vpack.c.bf16 %v683_v55, %v683_v55  ;;  %v668_v62 = vmax.f32 %v544_v56, 0.0  ;;  %v684_v63 = vmax.f32 %v608_v57, 0.0 }
 0x110   : > { %828 = vst.msk [vmem:[%s1313_s16] sm:$0xf] %vm827_vm1, %v1022_v60  ;;  %844 = vst.msk [vmem:[%s1313_s16 + $0x40] sm:$0xf] %vm827_vm1, %v1038_v61  ;;  %v1023_v0 = vpack.c.bf16 %v668_v62, %v668_v62  ;;  %v1039_v1 = vpack.c.bf16 %v684_v63, %v684_v63 }
 0x111   : > { %v548_v2 = vpop.f32.mrb[4].mxu0  ;;  %v612_v3 = vpop.f32.mrb[4].mxu1 }
 0x112   : > { %829 = vst.msk [vmem:[%s1313_s16 + $0x4] sm:$0xf] %vm827_vm1, %v1023_v0  ;;  %845 = vst.msk [vmem:[%s1313_s16 + $0x44] sm:$0xf] %vm827_vm1, %v1039_v1  ;;  %v549_v4 = vadd.f32 %v1303_v45, %v548_v2  ;;  %v613_v5 = vadd.f32 %v1303_v45, %v612_v3  ;;  %v550_v6 = vpop.f32.mrb[5].mxu0  ;;  %v614_v7 = vpop.f32.mrb[5].mxu1 }
 0x113   : > { %v551_v8 = vpop.f32.mrb[6].mxu0  ;;  %v615_v9 = vpop.f32.mrb[6].mxu1 }
 0x114   : > { %v669_v10 = vmax.f32 %v549_v4, 0.0  ;;  %v685_v11 = vmax.f32 %v613_v5, 0.0  ;;  %v552_v12 = vadd.f32 %v1303_v45, %v551_v8  ;;  %v616_v13 = vadd.f32 %v1303_v45, %v615_v9  ;;  %v553_v14 = vpop.f32.mrb[7].mxu0  ;;  %v617_v15 = vpop.f32.mrb[7].mxu1 }
 0x116   : > { %v1024_v16 = vpack.c.bf16 %v669_v10, %v669_v10  ;;  %v1040_v17 = vpack.c.bf16 %v685_v11, %v685_v11  ;;  %v670_v18 = vmax.f32 %v552_v12, 0.0  ;;  %v686_v19 = vmax.f32 %v616_v13, 0.0 }
 0x118   : > { %830 = vst.msk [vmem:[%s1313_s16 + $0x8] sm:$0xf] %vm827_vm1, %v1024_v16  ;;  %846 = vst.msk [vmem:[%s1313_s16 + $0x48] sm:$0xf] %vm827_vm1, %v1040_v17  ;;  %v1025_v20 = vpack.c.bf16 %v670_v18, %v670_v18  ;;  %v1041_v21 = vpack.c.bf16 %v686_v19, %v686_v19 }
 0x119   : > { %v556_v22 = vpop.f32.mrb[8].mxu0  ;;  %v620_v23 = vpop.f32.mrb[8].mxu1 }
 0x11a   : > { %831 = vst.msk [vmem:[%s1313_s16 + $0xc] sm:$0xf] %vm827_vm1, %v1025_v20  ;;  %847 = vst.msk [vmem:[%s1313_s16 + $0x4c] sm:$0xf] %vm827_vm1, %v1041_v21  ;;  %v557_v24 = vadd.f32 %v1303_v45, %v556_v22  ;;  %v621_v25 = vadd.f32 %v1303_v45, %v620_v23  ;;  %v558_v26 = vpop.f32.mrb[9].mxu0  ;;  %v622_v27 = vpop.f32.mrb[9].mxu1 }
 0x11b   : > { %v559_v28 = vpop.f32.mrb[10].mxu0  ;;  %v623_v29 = vpop.f32.mrb[10].mxu1 }
 0x11c   : > { %v671_v30 = vmax.f32 %v557_v24, 0.0  ;;  %v687_v31 = vmax.f32 %v621_v25, 0.0  ;;  %v560_v32 = vadd.f32 %v1303_v45, %v559_v28  ;;  %v624_v33 = vadd.f32 %v1303_v45, %v623_v29  ;;  %v561_v34 = vpop.f32.mrb[11].mxu0  ;;  %v625_v35 = vpop.f32.mrb[11].mxu1 }
 0x11e   : > { %v1026_v36 = vpack.c.bf16 %v671_v30, %v671_v30  ;;  %v1042_v37 = vpack.c.bf16 %v687_v31, %v687_v31  ;;  %v672_v38 = vmax.f32 %v560_v32, 0.0  ;;  %v688_v39 = vmax.f32 %v624_v33, 0.0 }
 0x120   : > { %832 = vst.msk [vmem:[%s1313_s16 + $0x10] sm:$0xf] %vm827_vm1, %v1026_v36  ;;  %848 = vst.msk [vmem:[%s1313_s16 + $0x50] sm:$0xf] %vm827_vm1, %v1042_v37  ;;  %v1027_v40 = vpack.c.bf16 %v672_v38, %v672_v38  ;;  %v1043_v41 = vpack.c.bf16 %v688_v39, %v688_v39 }
 0x121   : > { %v564_v42 = vpop.f32.mrb[12].mxu0  ;;  %v628_v43 = vpop.f32.mrb[12].mxu1 }
 0x122   : > { %833 = vst.msk [vmem:[%s1313_s16 + $0x14] sm:$0xf] %vm827_vm1, %v1027_v40  ;;  %849 = vst.msk [vmem:[%s1313_s16 + $0x54] sm:$0xf] %vm827_vm1, %v1043_v41  ;;  %v565_v44 = vadd.f32 %v1303_v45, %v564_v42  ;;  %v629_v46 = vadd.f32 %v1303_v45, %v628_v43  ;;  %v566_v47 = vpop.f32.mrb[13].mxu0  ;;  %v630_v48 = vpop.f32.mrb[13].mxu1 }
 0x123   : > { %v567_v49 = vpop.f32.mrb[14].mxu0  ;;  %v631_v50 = vpop.f32.mrb[14].mxu1 }
 0x124   : > { %v673_v51 = vmax.f32 %v565_v44, 0.0  ;;  %v689_v52 = vmax.f32 %v629_v46, 0.0  ;;  %v568_v53 = vadd.f32 %v1303_v45, %v567_v49  ;;  %v632_v54 = vadd.f32 %v1303_v45, %v631_v50  ;;  %v569_v55 = vpop.f32.mrb[15].mxu0  ;;  %v633_v56 = vpop.f32.mrb[15].mxu1 }
 0x126   : > { %v1028_v57 = vpack.c.bf16 %v673_v51, %v673_v51  ;;  %v1044_v58 = vpack.c.bf16 %v689_v52, %v689_v52  ;;  %v674_v59 = vmax.f32 %v568_v53, 0.0  ;;  %v690_v60 = vmax.f32 %v632_v54, 0.0 }
 0x128   : > { %834 = vst.msk [vmem:[%s1313_s16 + $0x18] sm:$0xf] %vm827_vm1, %v1028_v57  ;;  %850 = vst.msk [vmem:[%s1313_s16 + $0x58] sm:$0xf] %vm827_vm1, %v1044_v58  ;;  %v1029_v61 = vpack.c.bf16 %v674_v59, %v674_v59  ;;  %v1045_v62 = vpack.c.bf16 %v690_v60, %v690_v60 }
 0x129   : > { %v572_v63 = vpop.f32.mrb[16].mxu0  ;;  %v636_v0 = vpop.f32.mrb[16].mxu1 }
 0x12a   : > { %835 = vst.msk [vmem:[%s1313_s16 + $0x1c] sm:$0xf] %vm827_vm1, %v1029_v61  ;;  %851 = vst.msk [vmem:[%s1313_s16 + $0x5c] sm:$0xf] %vm827_vm1, %v1045_v62  ;;  %v573_v1 = vadd.f32 %v1303_v45, %v572_v63  ;;  %v637_v2 = vadd.f32 %v1303_v45, %v636_v0  ;;  %v574_v3 = vpop.f32.mrb[17].mxu0  ;;  %v638_v4 = vpop.f32.mrb[17].mxu1 }
 0x12b   : > { %v575_v5 = vpop.f32.mrb[18].mxu0  ;;  %v639_v6 = vpop.f32.mrb[18].mxu1 }
 0x12c   : > { %v675_v7 = vmax.f32 %v573_v1, 0.0  ;;  %v691_v8 = vmax.f32 %v637_v2, 0.0  ;;  %v576_v9 = vadd.f32 %v1303_v45, %v575_v5  ;;  %v640_v10 = vadd.f32 %v1303_v45, %v639_v6  ;;  %v577_v11 = vpop.f32.mrb[19].mxu0  ;;  %v641_v12 = vpop.f32.mrb[19].mxu1 }
 0x12e   : > { %v1030_v13 = vpack.c.bf16 %v675_v7, %v675_v7  ;;  %v1046_v14 = vpack.c.bf16 %v691_v8, %v691_v8  ;;  %v676_v15 = vmax.f32 %v576_v9, 0.0  ;;  %v692_v16 = vmax.f32 %v640_v10, 0.0 }
 0x130   : > { %836 = vst.msk [vmem:[%s1313_s16 + $0x20] sm:$0xf] %vm827_vm1, %v1030_v13  ;;  %852 = vst.msk [vmem:[%s1313_s16 + $0x60] sm:$0xf] %vm827_vm1, %v1046_v14  ;;  %v1031_v17 = vpack.c.bf16 %v676_v15, %v676_v15  ;;  %v1047_v18 = vpack.c.bf16 %v692_v16, %v692_v16 }
 0x131   : > { %v580_v19 = vpop.f32.mrb[20].mxu0  ;;  %v644_v20 = vpop.f32.mrb[20].mxu1 }
 0x132   : > { %837 = vst.msk [vmem:[%s1313_s16 + $0x24] sm:$0xf] %vm827_vm1, %v1031_v17  ;;  %853 = vst.msk [vmem:[%s1313_s16 + $0x64] sm:$0xf] %vm827_vm1, %v1047_v18  ;;  %v581_v21 = vadd.f32 %v1303_v45, %v580_v19  ;;  %v645_v22 = vadd.f32 %v1303_v45, %v644_v20  ;;  %v582_v23 = vpop.f32.mrb[21].mxu0  ;;  %v646_v24 = vpop.f32.mrb[21].mxu1 }
 0x133   : > { %v583_v25 = vpop.f32.mrb[22].mxu0  ;;  %v647_v26 = vpop.f32.mrb[22].mxu1 }
 0x134   : > { %v677_v27 = vmax.f32 %v581_v21, 0.0  ;;  %v693_v28 = vmax.f32 %v645_v22, 0.0  ;;  %v584_v29 = vadd.f32 %v1303_v45, %v583_v25  ;;  %v648_v30 = vadd.f32 %v1303_v45, %v647_v26  ;;  %v585_v31 = vpop.f32.mrb[23].mxu0  ;;  %v649_v32 = vpop.f32.mrb[23].mxu1 }
 0x136   : > { %v1032_v33 = vpack.c.bf16 %v677_v27, %v677_v27  ;;  %v1048_v34 = vpack.c.bf16 %v693_v28, %v693_v28  ;;  %v678_v35 = vmax.f32 %v584_v29, 0.0  ;;  %v694_v36 = vmax.f32 %v648_v30, 0.0 }
 0x138   : > { %838 = vst.msk [vmem:[%s1313_s16 + $0x28] sm:$0xf] %vm827_vm1, %v1032_v33  ;;  %854 = vst.msk [vmem:[%s1313_s16 + $0x68] sm:$0xf] %vm827_vm1, %v1048_v34  ;;  %v1033_v37 = vpack.c.bf16 %v678_v35, %v678_v35  ;;  %v1049_v38 = vpack.c.bf16 %v694_v36, %v694_v36 }
 0x139   : > { %v588_v39 = vpop.f32.mrb[24].mxu0  ;;  %v652_v40 = vpop.f32.mrb[24].mxu1 }
 0x13a   : > { %839 = vst.msk [vmem:[%s1313_s16 + $0x2c] sm:$0xf] %vm827_vm1, %v1033_v37  ;;  %855 = vst.msk [vmem:[%s1313_s16 + $0x6c] sm:$0xf] %vm827_vm1, %v1049_v38  ;;  %v589_v41 = vadd.f32 %v1303_v45, %v588_v39  ;;  %v653_v42 = vadd.f32 %v1303_v45, %v652_v40  ;;  %v590_v43 = vpop.f32.mrb[25].mxu0  ;;  %v654_v44 = vpop.f32.mrb[25].mxu1 }
 0x13b   : > { %v591_v46 = vpop.f32.mrb[26].mxu0  ;;  %v655_v47 = vpop.f32.mrb[26].mxu1 }
 0x13c   : > { %v679_v48 = vmax.f32 %v589_v41, 0.0  ;;  %v695_v49 = vmax.f32 %v653_v42, 0.0  ;;  %v592_v50 = vadd.f32 %v1303_v45, %v591_v46  ;;  %v656_v51 = vadd.f32 %v1303_v45, %v655_v47  ;;  %v593_v52 = vpop.f32.mrb[27].mxu0  ;;  %v657_v53 = vpop.f32.mrb[27].mxu1 }
 0x13e   : > { %v1034_v54 = vpack.c.bf16 %v679_v48, %v679_v48  ;;  %v1050_v55 = vpack.c.bf16 %v695_v49, %v695_v49  ;;  %v680_v56 = vmax.f32 %v592_v50, 0.0  ;;  %v696_v57 = vmax.f32 %v656_v51, 0.0 }
 0x140   : > { %840 = vst.msk [vmem:[%s1313_s16 + $0x30] sm:$0xf] %vm827_vm1, %v1034_v54  ;;  %856 = vst.msk [vmem:[%s1313_s16 + $0x70] sm:$0xf] %vm827_vm1, %v1050_v55  ;;  %v1035_v58 = vpack.c.bf16 %v680_v56, %v680_v56  ;;  %v1051_v59 = vpack.c.bf16 %v696_v57, %v696_v57 }
 0x141   : > { %v596_v60 = vpop.f32.mrb[28].mxu0  ;;  %v660_v61 = vpop.f32.mrb[28].mxu1 }
 0x142   : > { %841 = vst.msk [vmem:[%s1313_s16 + $0x34] sm:$0xf] %vm827_vm1, %v1035_v58  ;;  %857 = vst.msk [vmem:[%s1313_s16 + $0x74] sm:$0xf] %vm827_vm1, %v1051_v59  ;;  %v597_v62 = vadd.f32 %v1303_v45, %v596_v60  ;;  %v661_v63 = vadd.f32 %v1303_v45, %v660_v61  ;;  %v598_v0 = vpop.f32.mrb[29].mxu0  ;;  %v662_v1 = vpop.f32.mrb[29].mxu1 }
 0x143   : > { %v599_v2 = vpop.f32.mrb[30].mxu0  ;;  %v663_v3 = vpop.f32.mrb[30].mxu1 }
 0x144   : > { %v681_v4 = vmax.f32 %v597_v62, 0.0  ;;  %v697_v5 = vmax.f32 %v661_v63, 0.0  ;;  %v600_v6 = vadd.f32 %v1303_v45, %v599_v2  ;;  %v664_v7 = vadd.f32 %v1303_v45, %v663_v3  ;;  %v601_v8 = vpop.f32.mrb[31].mxu0  ;;  %v665_v9 = vpop.f32.mrb[31].mxu1 }
 0x146   : > { %v1036_v10 = vpack.c.bf16 %v681_v4, %v681_v4  ;;  %v1052_v11 = vpack.c.bf16 %v697_v5, %v697_v5  ;;  %v682_v12 = vmax.f32 %v600_v6, 0.0  ;;  %v698_v13 = vmax.f32 %v664_v7, 0.0 }
 0x148   : > { %842 = vst.msk [vmem:[%s1313_s16 + $0x38] sm:$0xf] %vm827_vm1, %v1036_v10  ;;  %858 = vst.msk [vmem:[%s1313_s16 + $0x78] sm:$0xf] %vm827_vm1, %v1052_v11  ;;  %v1037_v14 = vpack.c.bf16 %v682_v12, %v682_v12  ;;  %v1053_v15 = vpack.c.bf16 %v698_v13, %v698_v13 }
 0x14a   : > { %843 = vst.msk [vmem:[%s1313_s16 + $0x3c] sm:$0xf] %vm827_vm1, %v1037_v14  ;;  %859 = vst.msk [vmem:[%s1313_s16 + $0x7c] sm:$0xf] %vm827_vm1, %v1053_v15 }
 0x14b PF: > { %s13_s12 = sadd.s32 1, %s1153_s12  }
 0x14c   : > { %p10_p4 = scmp.ge.s32.totalorder %s13_s12, 10  }
 0x14e   :  { %12 = sbr.rel (!%p10_p4) target bundleno = 1 (0x1), region = 62 }

// kernel: koopman_forward.7
= control target key start
LH: loop header
LB: loop body
LE: loop exit
PB: predicated region body
PF: predicated region fallthrough
CT: control target
= control target key end

     0   :  { %s1958_s12 = smov 0   ;;  %s2246_s0 = inlined_call_operand.vmem [shape: bf16[512,512], index: 0, kind: input, shape index: {}]   ;;  %s2247_s1 = inlined_call_operand.vmem [shape: bf16[512,64], index: 1, kind: input, shape index: {}]   ;;  %s2248_s2 = inlined_call_operand.vmem [shape: f32[1,64], index: 2, kind: input, shape index: {}]   ;;  %s2249_s3 = inlined_call_operand.vmem [shape: bf16[512,64], index: 3, kind: output, shape index: {}]  }
   0x1 LB: > { %s1396_s13 = sadd.s32 4294967295, %s1936_s12   ;;  %p1400_p0 = scmp.ge.s32.totalorder %s1936_s12, 1  ;;  %s1936_s12 = sphi %s1958_s12, %s13_s12  }
   0x2   : > { %p139_p1 = scmp.lt.s32.totalorder %s1936_s12, 3 }
   0x4   : > { %p140_p2 = pnand %p1400_p0, %p139_p1 }
   0x5   : > { %v1802_v0 = vld [vmem:[%s2247_s1 + $0x40] sm:$0xff] (!%p140_p2)   ;;  %v1806_v4 = vld [vmem:[%s2247_s1 + $0x48] sm:$0xff] (!%p140_p2)   ;;  %v1810_v8 = vld [vmem:[%s2247_s1 + $0x50] sm:$0xff] (!%p140_p2)   ;;  %s1401_s21 = sshll.u32 (!%p140_p2), %s1396_s13, 5  ;;  %vm1307_vm0 = vcmask (!%p140_p2), 519168  }
   0x6   : > { %143 = sbr.rel (%p140_p2) target bundleno = 385 (0x181), region = 32  ;;  %v1803_v1 = vld [vmem:[%s2247_s1 + $0xc0] sm:$0xff] (!%p140_p2)   ;;  %1570 = vmatprep.subr.bf16.mxu0 (!%p140_p2), %v1802_v0  ;;  %v1807_v5 = vld [vmem:[%s2247_s1 + $0xc8] sm:$0xff] (!%p140_p2)   ;;  %v1811_v9 = vld [vmem:[%s2247_s1 + $0xd0] sm:$0xff] (!%p140_p2)   ;;  %p165_p3 = scmp.lt.s32.totalorder (!%p140_p2), %s1401_s21, 63 }
   0x7   : > { %v1804_v2 = vld [vmem:[%s2247_s1] sm:$0xff] (!%p140_p2)   ;;  %1682 = vmatprep.subr.bf16.mxu1 (!%p140_p2), %v1803_v1  ;;  %v1808_v6 = vld [vmem:[%s2247_s1 + $0x8] sm:$0xff] (!%p140_p2)   ;;  %v1812_v10 = vld [vmem:[%s2247_s1 + $0x10] sm:$0xff] (!%p140_p2)  }
   0x8   : > { %v1805_v3 = vld [vmem:[%s2247_s1 + $0x80] sm:$0xff] (!%p140_p2)   ;;  %1571 = vmatpush3.bf16.msra.mxu0 (!%p140_p2), %v1804_v2  ;;  %v1809_v7 = vld [vmem:[%s2247_s1 + $0x88] sm:$0xff] (!%p140_p2)   ;;  %v1813_v11 = vld [vmem:[%s2247_s1 + $0x90] sm:$0xff] (!%p140_p2)  }
   0x9   : > { %1683 = vmatpush3.bf16.msra.mxu1 (!%p140_p2), %v1805_v3  ;;  %1572 = vmatprep.subr.bf16.mxu0 (!%p140_p2), %v1806_v4  ;;  %v1814_v12 = vld [vmem:[%s2247_s1 + $0x58] sm:$0xff] (!%p140_p2)   ;;  %v1818_v16 = vld [vmem:[%s2247_s1 + $0x60] sm:$0xff] (!%p140_p2)   ;;  %v1822_v20 = vld [vmem:[%s2247_s1 + $0x68] sm:$0xff] (!%p140_p2)  }
   0xa   : > { %1684 = vmatprep.subr.bf16.mxu1 (!%p140_p2), %v1807_v5  ;;  %v1815_v13 = vld [vmem:[%s2247_s1 + $0xd8] sm:$0xff] (!%p140_p2)   ;;  %v1819_v17 = vld [vmem:[%s2247_s1 + $0xe0] sm:$0xff] (!%p140_p2)   ;;  %v1823_v21 = vld [vmem:[%s2247_s1 + $0xe8] sm:$0xff] (!%p140_p2)  }
   0xb   : > { %v1816_v14 = vld [vmem:[%s2247_s1 + $0x18] sm:$0xff] (!%p140_p2)   ;;  %v1820_v18 = vld [vmem:[%s2247_s1 + $0x20] sm:$0xff] (!%p140_p2)   ;;  %v1824_v22 = vld [vmem:[%s2247_s1 + $0x28] sm:$0xff] (!%p140_p2)  }
   0xc   : > { %1573 = vmatpush3.bf16.msra.mxu0 (!%p140_p2), %v1808_v6  ;;  %v1817_v15 = vld [vmem:[%s2247_s1 + $0x98] sm:$0xff] (!%p140_p2)   ;;  %v1821_v19 = vld [vmem:[%s2247_s1 + $0xa0] sm:$0xff] (!%p140_p2)   ;;  %v1825_v23 = vld [vmem:[%s2247_s1 + $0xa8] sm:$0xff] (!%p140_p2)  }
   0xd   : > { %1685 = vmatpush3.bf16.msra.mxu1 %v1809_v7  ;;  %1574 = vmatprep.subr.bf16.mxu0 %v1810_v8  ;;  %s2251_s21 = smov (!%p165_p3, %s1401_s21), 63  ;;  %v1826_v24 = vld [vmem:[%s2247_s1 + $0x70] sm:$0xff]   ;;  %v1830_v28 = vld [vmem:[%s2247_s1 + $0x78] sm:$0xff]  }
   0xe   : > { %1686 = vmatprep.subr.bf16.mxu1 %v1811_v9  ;;  %v1827_v25 = vld [vmem:[%s2247_s1 + $0xf0] sm:$0xff]   ;;  %s1537_s18 = sshll.u32 %s2251_s21, 4  ;;  %v1831_v29 = vld [vmem:[%s2247_s1 + $0xf8] sm:$0xff]   ;;  %s1405_s7 = sshll.u32 %s2251_s21, 2 }
   0xf   : > { %v1828_v26 = vld [vmem:[%s2247_s1 + $0x30] sm:$0xff]   ;;  %s2064_s28 = scalar_lea.vmem %s2246_s0, %s1537_s18  ;;  %v1832_v30 = vld [vmem:[%s2247_s1 + $0x38] sm:$0xff]   ;;  %s2147_s10 = scalar_lea.vmem %s2249_s3, %s1405_s7 }
  0x10   : > { %1575 = vmatpush3.bf16.msra.mxu0 %v1812_v10  ;;  %v1829_v27 = vld [vmem:[%s2247_s1 + $0xb0] sm:$0xff]   ;;  %v1833_v31 = vld [vmem:[%s2247_s1 + $0xb8] sm:$0xff]  }
  0x11   : > { %1687 = vmatpush3.bf16.msra.mxu1 %v1813_v11  ;;  %1576 = vmatprep.subr.bf16.mxu0 %v1814_v12  ;;  %v1834_v32 = vld [vmem:[%s2064_s28] ss:$16 sps:$4 sm:$0xff]   ;;  %v1836_v33 = vld [vmem:[%s2064_s28 + $0x4] ss:$16 sps:$4 sm:$0xff]   ;;  %v1837_v34 = vld [vmem:[%s2064_s28 + $0x8] ss:$16 sps:$4 sm:$0xff]  }
  0x12   : > { %1688 = vmatprep.subr.bf16.mxu1 %v1815_v13  ;;  %v1839_v35 = vld [vmem:[%s2064_s28 + $0xc] ss:$16 sps:$4 sm:$0xff]   ;;  %857 = vmatprep.mubr.bf16.mxu0 %v1836_v33  ;;  %v1840_v36 = vld [vmem:[%s2064_s28 + $0x24] ss:$16 sps:$4 sm:$0xff]   ;;  %v1844_v38 = vld [vmem:[%s2064_s28 + $0x20] ss:$16 sps:$4 sm:$0xff]  }
  0x13   : > { %1018 = vmatprep.mubr.bf16.mxu1 %v1839_v35  ;;  %v1842_v37 = vld [vmem:[%s2064_s28 + $0x2c] ss:$16 sps:$4 sm:$0xff]   ;;  %v1845_v39 = vld [vmem:[%s2064_s28 + $0x28] ss:$16 sps:$4 sm:$0xff]   ;;  %v1846_v40 = vld [vmem:[%s2064_s28 + $0x44] ss:$16 sps:$4 sm:$0xff]  }
  0x14   : > { %1577 = vmatpush3.bf16.msra.mxu0 %v1816_v14  ;;  %v1848_v41 = vld [vmem:[%s2064_s28 + $0x4c] ss:$16 sps:$4 sm:$0xff]   ;;  %v1850_v42 = vld [vmem:[%s2064_s28 + $0x40] ss:$16 sps:$4 sm:$0xff]   ;;  %v1851_v43 = vld [vmem:[%s2064_s28 + $0x48] ss:$16 sps:$4 sm:$0xff]  }
  0x15   : > { %1689 = vmatpush3.bf16.msra.mxu1 %v1817_v15  ;;  %1578 = vmatprep.subr.bf16.mxu0 %v1818_v16  ;;  %v1852_v44 = vld [vmem:[%s2064_s28 + $0x64] ss:$16 sps:$4 sm:$0xff]   ;;  %v1854_v45 = vld [vmem:[%s2064_s28 + $0x6c] ss:$16 sps:$4 sm:$0xff]   ;;  %v1856_v46 = vld [vmem:[%s2064_s28 + $0x60] ss:$16 sps:$4 sm:$0xff]  }
  0x16   : > { %1690 = vmatprep.subr.bf16.mxu1 %v1819_v17  ;;  %v1857_v47 = vld [vmem:[%s2064_s28 + $0x68] ss:$16 sps:$4 sm:$0xff]   ;;  %v1858_v48 = vld [vmem:[%s2064_s28 + $0x84] ss:$16 sps:$4 sm:$0xff]   ;;  %v1860_v49 = vld [vmem:[%s2064_s28 + $0x8c] ss:$16 sps:$4 sm:$0xff]  }
  0x17   : > { %v1862_v50 = vld [vmem:[%s2064_s28 + $0x80] ss:$16 sps:$4 sm:$0xff]   ;;  %v1863_v51 = vld [vmem:[%s2064_s28 + $0x88] ss:$16 sps:$4 sm:$0xff]   ;;  %v1864_v52 = vld [vmem:[%s2064_s28 + $0xa4] ss:$16 sps:$4 sm:$0xff]  }
  0x18   : > { %1579 = vmatpush3.bf16.msra.mxu0 %v1820_v18  ;;  %v1866_v53 = vld [vmem:[%s2064_s28 + $0xac] ss:$16 sps:$4 sm:$0xff]   ;;  %v1868_v54 = vld [vmem:[%s2064_s28 + $0xa0] ss:$16 sps:$4 sm:$0xff]   ;;  %v1869_v55 = vld [vmem:[%s2064_s28 + $0xa8] ss:$16 sps:$4 sm:$0xff]  }
  0x19   : > { %1691 = vmatpush3.bf16.msra.mxu1 %v1821_v19  ;;  %1580 = vmatprep.subr.bf16.mxu0 %v1822_v20  ;;  %v1870_v56 = vld [vmem:[%s2064_s28 + $0xc4] ss:$16 sps:$4 sm:$0xff]   ;;  %v1872_v57 = vld [vmem:[%s2064_s28 + $0xcc] ss:$16 sps:$4 sm:$0xff]   ;;  %v1874_v58 = vld [vmem:[%s2064_s28 + $0xc0] ss:$16 sps:$4 sm:$0xff]  }
  0x1a   : > { %1692 = vmatprep.subr.bf16.mxu1 %v1823_v21  ;;  %v1875_v59 = vld [vmem:[%s2064_s28 + $0xc8] ss:$16 sps:$4 sm:$0xff]   ;;  %v1876_v60 = vld [vmem:[%s2064_s28 + $0xe4] ss:$16 sps:$4 sm:$0xff]   ;;  %v1878_v61 = vld [vmem:[%s2064_s28 + $0xec] ss:$16 sps:$4 sm:$0xff]  }
  0x1b   : > { %v1880_v62 = vld [vmem:[%s2064_s28 + $0xe0] ss:$16 sps:$4 sm:$0xff]   ;;  %v1881_v63 = vld [vmem:[%s2064_s28 + $0xe8] ss:$16 sps:$4 sm:$0xff]   ;;  %v1882_v0 = vld [vmem:[%s2064_s28 + $0x104] ss:$16 sps:$4 sm:$0xff]  }
  0x1c   : > { %1581 = vmatpush3.bf16.msra.mxu0 %v1824_v22  ;;  %v1884_v1 = vld [vmem:[%s2064_s28 + $0x10c] ss:$16 sps:$4 sm:$0xff]   ;;  %v1886_v2 = vld [vmem:[%s2064_s28 + $0x100] ss:$16 sps:$4 sm:$0xff]   ;;  %v1887_v3 = vld [vmem:[%s2064_s28 + $0x108] ss:$16 sps:$4 sm:$0xff]  }
  0x1d   : > { %1693 = vmatpush3.bf16.msra.mxu1 %v1825_v23  ;;  %1582 = vmatprep.subr.bf16.mxu0 %v1826_v24  ;;  %v1888_v4 = vld [vmem:[%s2064_s28 + $0x124] ss:$16 sps:$4 sm:$0xff]   ;;  %v1890_v5 = vld [vmem:[%s2064_s28 + $0x12c] ss:$16 sps:$4 sm:$0xff]   ;;  %v1892_v6 = vld [vmem:[%s2064_s28 + $0x120] ss:$16 sps:$4 sm:$0xff]  }
  0x1e   : > { %1694 = vmatprep.subr.bf16.mxu1 %v1827_v25  ;;  %v1893_v7 = vld [vmem:[%s2064_s28 + $0x128] ss:$16 sps:$4 sm:$0xff]   ;;  %v1894_v8 = vld [vmem:[%s2064_s28 + $0x144] ss:$16 sps:$4 sm:$0xff]   ;;  %v1896_v9 = vld [vmem:[%s2064_s28 + $0x14c] ss:$16 sps:$4 sm:$0xff]  }
  0x1f   : > { %v1898_v10 = vld [vmem:[%s2064_s28 + $0x140] ss:$16 sps:$4 sm:$0xff]   ;;  %v1899_v11 = vld [vmem:[%s2064_s28 + $0x148] ss:$16 sps:$4 sm:$0xff]   ;;  %v1900_v12 = vld [vmem:[%s2064_s28 + $0x164] ss:$16 sps:$4 sm:$0xff]  }
  0x20   : > { %1583 = vmatpush3.bf16.msra.mxu0 %v1828_v26  ;;  %v1902_v13 = vld [vmem:[%s2064_s28 + $0x16c] ss:$16 sps:$4 sm:$0xff]   ;;  %v1904_v14 = vld [vmem:[%s2064_s28 + $0x160] ss:$16 sps:$4 sm:$0xff]   ;;  %v1905_v15 = vld [vmem:[%s2064_s28 + $0x168] ss:$16 sps:$4 sm:$0xff]  }
  0x21   : > { %1695 = vmatpush3.bf16.msra.mxu1 %v1829_v27  ;;  %1584 = vmatprep.subr.bf16.mxu0 %v1830_v28  ;;  %v1906_v16 = vld [vmem:[%s2064_s28 + $0x184] ss:$16 sps:$4 sm:$0xff]   ;;  %v1908_v17 = vld [vmem:[%s2064_s28 + $0x18c] ss:$16 sps:$4 sm:$0xff]   ;;  %v1910_v18 = vld [vmem:[%s2064_s28 + $0x180] ss:$16 sps:$4 sm:$0xff]  }
  0x22   : > { %1696 = vmatprep.subr.bf16.mxu1 %v1831_v29  ;;  %v1911_v19 = vld [vmem:[%s2064_s28 + $0x188] ss:$16 sps:$4 sm:$0xff]   ;;  %v1912_v20 = vld [vmem:[%s2064_s28 + $0x1a4] ss:$16 sps:$4 sm:$0xff]   ;;  %v1914_v21 = vld [vmem:[%s2064_s28 + $0x1ac] ss:$16 sps:$4 sm:$0xff]  }
  0x23   : > { %v1916_v22 = vld [vmem:[%s2064_s28 + $0x1a0] ss:$16 sps:$4 sm:$0xff]   ;;  %v1917_v23 = vld [vmem:[%s2064_s28 + $0x1a8] ss:$16 sps:$4 sm:$0xff]   ;;  %v1918_v24 = vld [vmem:[%s2064_s28 + $0x1c4] ss:$16 sps:$4 sm:$0xff]  }
  0x24   : > { %1585 = vmatpush3.bf16.msra.mxu0 %v1832_v30  ;;  %v1920_v25 = vld [vmem:[%s2064_s28 + $0x1cc] ss:$16 sps:$4 sm:$0xff]   ;;  %v1922_v26 = vld [vmem:[%s2064_s28 + $0x1c0] ss:$16 sps:$4 sm:$0xff]   ;;  %v1923_v27 = vld [vmem:[%s2064_s28 + $0x1c8] ss:$16 sps:$4 sm:$0xff]  }
  0x25   : > { %1697 = vmatpush3.bf16.msra.mxu1 %v1833_v31  ;;  %v1924_v28 = vld [vmem:[%s2064_s28 + $0x1e4] ss:$16 sps:$4 sm:$0xff]   ;;  %v1926_v29 = vld [vmem:[%s2064_s28 + $0x1ec] ss:$16 sps:$4 sm:$0xff]   ;;  %v1928_v30 = vld [vmem:[%s2064_s28 + $0x1e0] ss:$16 sps:$4 sm:$0xff]  }
  0x26   : > { %v1929_v31 = vld [vmem:[%s2064_s28 + $0x1e8] ss:$16 sps:$4 sm:$0xff]  }
  0x27   : > { %858 = vmatmul.mubr.bf16.vlgmr.msra.gmra.mrb[0].mxu0 %v1834_v32 }
  0x28   : > { %1019 = vmatmul.mubr.bf16.vlgmr.msra.gmra.mrb[0].mxu1 %v1837_v34  ;;  %865 = vmatprep.mubr.bf16.mxu0 %v1840_v36  ;;  %v2139_v34 = vld [vmem:[%s2248_s2] ss:$0 sm:$0xff] }
  0x29   : > { %1026 = vmatprep.mubr.bf16.mxu1 %v1842_v37 }
  0x2f   : > { %866 = vmatmul.mubr.bf16.gmra.mrb[4].mxu0 %v1844_v38 }
  0x30   : > { %1027 = vmatmul.mubr.bf16.gmra.mrb[4].mxu1 %v1845_v39  ;;  %873 = vmatprep.mubr.bf16.mxu0 %v1846_v40 }
  0x31   : > { %1034 = vmatprep.mubr.bf16.mxu1 %v1848_v41 }
  0x37   : > { %874 = vmatmul.mubr.bf16.gmra.mrb[8].mxu0 %v1850_v42 }
  0x38   : > { %1035 = vmatmul.mubr.bf16.gmra.mrb[8].mxu1 %v1851_v43  ;;  %881 = vmatprep.mubr.bf16.mxu0 %v1852_v44 }
  0x39   : > { %1042 = vmatprep.mubr.bf16.mxu1 %v1854_v45 }
  0x3f   : > { %882 = vmatmul.mubr.bf16.gmra.mrb[12].mxu0 %v1856_v46 }
  0x40   : > { %1043 = vmatmul.mubr.bf16.gmra.mrb[12].mxu1 %v1857_v47  ;;  %889 = vmatprep.mubr.bf16.mxu0 %v1858_v48 }
  0x41   : > { %1050 = vmatprep.mubr.bf16.mxu1 %v1860_v49 }
  0x47   : > { %890 = vmatmul.mubr.bf16.gmra.mrb[16].mxu0 %v1862_v50 }
  0x48   : > { %1051 = vmatmul.mubr.bf16.gmra.mrb[16].mxu1 %v1863_v51  ;;  %897 = vmatprep.mubr.bf16.mxu0 %v1864_v52 }
  0x49   : > { %1058 = vmatprep.mubr.bf16.mxu1 %v1866_v53 }
  0x4f   : > { %898 = vmatmul.mubr.bf16.gmra.mrb[20].mxu0 %v1868_v54 }
  0x50   : > { %1059 = vmatmul.mubr.bf16.gmra.mrb[20].mxu1 %v1869_v55  ;;  %905 = vmatprep.mubr.bf16.mxu0 %v1870_v56 }
  0x51   : > { %1066 = vmatprep.mubr.bf16.mxu1 %v1872_v57 }
  0x57   : > { %906 = vmatmul.mubr.bf16.gmra.mrb[24].mxu0 %v1874_v58 }
  0x58   : > { %1067 = vmatmul.mubr.bf16.gmra.mrb[24].mxu1 %v1875_v59  ;;  %913 = vmatprep.mubr.bf16.mxu0 %v1876_v60 }
  0x59   : > { %1074 = vmatprep.mubr.bf16.mxu1 %v1878_v61 }
  0x5f   : > { %914 = vmatmul.mubr.bf16.gmra.mrb[28].mxu0 %v1880_v62 }
  0x60   : > { %1075 = vmatmul.mubr.bf16.gmra.mrb[28].mxu1 %v1881_v63  ;;  %921 = vmatprep.mubr.bf16.mxu0 %v1882_v0 }
  0x61   : > { %1082 = vmatprep.mubr.bf16.mxu1 %v1884_v1 }
  0x67   : > { %922 = vmatmul.mubr.bf16.gmra.mrb[32].mxu0 %v1886_v2 }
  0x68   : > { %1083 = vmatmul.mubr.bf16.gmra.mrb[32].mxu1 %v1887_v3  ;;  %929 = vmatprep.mubr.bf16.mxu0 %v1888_v4 }
  0x69   : > { %1090 = vmatprep.mubr.bf16.mxu1 %v1890_v5 }
  0x6f   : > { %930 = vmatmul.mubr.bf16.gmra.mrb[36].mxu0 %v1892_v6 }
  0x70   : > { %1091 = vmatmul.mubr.bf16.gmra.mrb[36].mxu1 %v1893_v7  ;;  %937 = vmatprep.mubr.bf16.mxu0 %v1894_v8 }
  0x71   : > { %1098 = vmatprep.mubr.bf16.mxu1 %v1896_v9 }
  0x77   : > { %938 = vmatmul.mubr.bf16.gmra.mrb[40].mxu0 %v1898_v10 }
  0x78   : > { %1099 = vmatmul.mubr.bf16.gmra.mrb[40].mxu1 %v1899_v11  ;;  %945 = vmatprep.mubr.bf16.mxu0 %v1900_v12 }
  0x79   : > { %1106 = vmatprep.mubr.bf16.mxu1 %v1902_v13 }
  0x7f   : > { %946 = vmatmul.mubr.bf16.gmra.mrb[44].mxu0 %v1904_v14 }
  0x80   : > { %1107 = vmatmul.mubr.bf16.gmra.mrb[44].mxu1 %v1905_v15  ;;  %953 = vmatprep.mubr.bf16.mxu0 %v1906_v16 }
  0x81   : > { %1114 = vmatprep.mubr.bf16.mxu1 %v1908_v17 }
  0x87   : > { %954 = vmatmul.mubr.bf16.gmra.mrb[48].mxu0 %v1910_v18 }
  0x88   : > { %1115 = vmatmul.mubr.bf16.gmra.mrb[48].mxu1 %v1911_v19  ;;  %961 = vmatprep.mubr.bf16.mxu0 %v1912_v20 }
  0x89   : > { %1122 = vmatprep.mubr.bf16.mxu1 %v1914_v21 }
  0x8f   : > { %962 = vmatmul.mubr.bf16.gmra.mrb[52].mxu0 %v1916_v22 }
  0x90   : > { %1123 = vmatmul.mubr.bf16.gmra.mrb[52].mxu1 %v1917_v23  ;;  %969 = vmatprep.mubr.bf16.mxu0 %v1918_v24 }
  0x91   : > { %1130 = vmatprep.mubr.bf16.mxu1 %v1920_v25 }
  0x97   : > { %970 = vmatmul.mubr.bf16.gmra.mrb[56].mxu0 %v1922_v26 }
  0x98   : > { %1131 = vmatmul.mubr.bf16.gmra.mrb[56].mxu1 %v1923_v27  ;;  %977 = vmatprep.mubr.bf16.mxu0 %v1924_v28 }
  0x99   : > { %1138 = vmatprep.mubr.bf16.mxu1 %v1926_v29 }
  0x9f   : > { %978 = vmatmul.mubr.bf16.gmra.mrb[60].mxu0 %v1928_v30 }
  0xa0   : > { %1139 = vmatmul.mubr.bf16.gmra.mrb[60].mxu1 %v1929_v31 }
  0xfa   : > { %v1586_v32 = vpop.f32.mrb[0].mxu0 }
  0xfb   : > { %v1698_v33 = vpop.f32.mrb[0].mxu1  ;;  %v1587_v35 = vpop.f32.mrb[1].mxu0 }
  0xfc   : > { %v1588_v36 = vadd.f32 %v1587_v35, %v1586_v32  ;;  %v1699_v37 = vpop.f32.mrb[1].mxu1  ;;  %v1589_v38 = vpop.f32.mrb[2].mxu0 }
  0xfd   : > { %v1700_v39 = vadd.f32 %v1699_v37, %v1698_v33  ;;  %v1701_v40 = vpop.f32.mrb[2].mxu1  ;;  %v1590_v41 = vpop.f32.mrb[3].mxu0 }
  0xfe   : > { %v860_v42 = vadd.f32 %v1588_v36, %v2139_v34  ;;  %v1591_v43 = vadd.f32 %v1590_v41, %v1589_v38  ;;  %v1702_v44 = vpop.f32.mrb[3].mxu1 }
  0xff   : > { %v1703_v45 = vadd.f32 %v1702_v44, %v1701_v40 }
 0x100   : > { %v1021_v46 = vadd.f32 %v1700_v39, %v860_v42  ;;  %v863_v47 = vadd.f32 %v1591_v43, %v2139_v34 }
 0x102   : > { %v1147_v48 = vmax.f32 %v1021_v46, 0.0  ;;  %v1024_v49 = vadd.f32 %v1703_v45, %v863_v47  ;;  %v1592_v50 = vpop.f32.mrb[4].mxu0 }
 0x103   : > { %v1704_v51 = vpop.f32.mrb[4].mxu1  ;;  %v1593_v52 = vpop.f32.mrb[5].mxu0 }
 0x104   : > { %v1538_v53 = vpack.c.bf16 %v1147_v48, %v1147_v48  ;;  %v1148_v54 = vmax.f32 %v1024_v49, 0.0  ;;  %v1594_v55 = vadd.f32 %v1593_v52, %v1592_v50  ;;  %v1705_v56 = vpop.f32.mrb[5].mxu1  ;;  %v1595_v57 = vpop.f32.mrb[6].mxu0 }
 0x105   : > { %v1706_v58 = vadd.f32 %v1705_v56, %v1704_v51  ;;  %v1707_v59 = vpop.f32.mrb[6].mxu1  ;;  %v1596_v60 = vpop.f32.mrb[7].mxu0 }
 0x106   : > { %1308 = vst.msk [vmem:[%s2147_s10] sm:$0xf] %vm1307_vm0, %v1538_v53  ;;  %v1539_v61 = vpack.c.bf16 %v1148_v54, %v1148_v54  ;;  %v868_v62 = vadd.f32 %v1594_v55, %v2139_v34  ;;  %v1597_v63 = vadd.f32 %v1596_v60, %v1595_v57  ;;  %v1708_v0 = vpop.f32.mrb[7].mxu1 }
 0x107   : > { %v1709_v1 = vadd.f32 %v1708_v0, %v1707_v59 }
 0x108   : > { %1309 = vst.msk [vmem:[%s2147_s10 + $0x4] sm:$0xf] %vm1307_vm0, %v1539_v61  ;;  %v1029_v2 = vadd.f32 %v1706_v58, %v868_v62  ;;  %v871_v3 = vadd.f32 %v1597_v63, %v2139_v34 }
 0x10a   : > { %v1149_v4 = vmax.f32 %v1029_v2, 0.0  ;;  %v1032_v5 = vadd.f32 %v1709_v1, %v871_v3  ;;  %v1598_v6 = vpop.f32.mrb[8].mxu0 }
 0x10b   : > { %v1710_v7 = vpop.f32.mrb[8].mxu1  ;;  %v1599_v8 = vpop.f32.mrb[9].mxu0 }
 0x10c   : > { %v1540_v9 = vpack.c.bf16 %v1149_v4, %v1149_v4  ;;  %v1150_v10 = vmax.f32 %v1032_v5, 0.0  ;;  %v1600_v11 = vadd.f32 %v1599_v8, %v1598_v6  ;;  %v1711_v12 = vpop.f32.mrb[9].mxu1  ;;  %v1601_v13 = vpop.f32.mrb[10].mxu0 }
 0x10d   : > { %v1712_v14 = vadd.f32 %v1711_v12, %v1710_v7  ;;  %v1713_v15 = vpop.f32.mrb[10].mxu1  ;;  %v1602_v16 = vpop.f32.mrb[11].mxu0 }
 0x10e   : > { %1310 = vst.msk [vmem:[%s2147_s10 + $0x8] sm:$0xf] %vm1307_vm0, %v1540_v9  ;;  %v1541_v17 = vpack.c.bf16 %v1150_v10, %v1150_v10  ;;  %v876_v18 = vadd.f32 %v1600_v11, %v2139_v34  ;;  %v1603_v19 = vadd.f32 %v1602_v16, %v1601_v13  ;;  %v1714_v20 = vpop.f32.mrb[11].mxu1 }
 0x10f   : > { %v1715_v21 = vadd.f32 %v1714_v20, %v1713_v15 }
 0x110   : > { %1311 = vst.msk [vmem:[%s2147_s10 + $0xc] sm:$0xf] %vm1307_vm0, %v1541_v17  ;;  %v1037_v22 = vadd.f32 %v1712_v14, %v876_v18  ;;  %v879_v23 = vadd.f32 %v1603_v19, %v2139_v34 }
 0x112   : > { %v1151_v24 = vmax.f32 %v1037_v22, 0.0  ;;  %v1040_v25 = vadd.f32 %v1715_v21, %v879_v23  ;;  %v1604_v26 = vpop.f32.mrb[12].mxu0 }
 0x113   : > { %v1716_v27 = vpop.f32.mrb[12].mxu1  ;;  %v1605_v28 = vpop.f32.mrb[13].mxu0 }
 0x114   : > { %v1542_v29 = vpack.c.bf16 %v1151_v24, %v1151_v24  ;;  %v1152_v30 = vmax.f32 %v1040_v25, 0.0  ;;  %v1606_v31 = vadd.f32 %v1605_v28, %v1604_v26  ;;  %v1717_v32 = vpop.f32.mrb[13].mxu1  ;;  %v1607_v33 = vpop.f32.mrb[14].mxu0 }
 0x115   : > { %v1718_v35 = vadd.f32 %v1717_v32, %v1716_v27  ;;  %v1719_v36 = vpop.f32.mrb[14].mxu1  ;;  %v1608_v37 = vpop.f32.mrb[15].mxu0 }
 0x116   : > { %1312 = vst.msk [vmem:[%s2147_s10 + $0x10] sm:$0xf] %vm1307_vm0, %v1542_v29  ;;  %v1543_v38 = vpack.c.bf16 %v1152_v30, %v1152_v30  ;;  %v884_v39 = vadd.f32 %v1606_v31, %v2139_v34  ;;  %v1609_v40 = vadd.f32 %v1608_v37, %v1607_v33  ;;  %v1720_v41 = vpop.f32.mrb[15].mxu1 }
 0x117   : > { %v1721_v42 = vadd.f32 %v1720_v41, %v1719_v36 }
 0x118   : > { %1313 = vst.msk [vmem:[%s2147_s10 + $0x14] sm:$0xf] %vm1307_vm0, %v1543_v38  ;;  %v1045_v43 = vadd.f32 %v1718_v35, %v884_v39  ;;  %v887_v44 = vadd.f32 %v1609_v40, %v2139_v34 }
 0x11a   : > { %v1153_v45 = vmax.f32 %v1045_v43, 0.0  ;;  %v1048_v46 = vadd.f32 %v1721_v42, %v887_v44  ;;  %v1610_v47 = vpop.f32.mrb[16].mxu0 }
 0x11b   : > { %v1722_v48 = vpop.f32.mrb[16].mxu1  ;;  %v1611_v49 = vpop.f32.mrb[17].mxu0 }
 0x11c   : > { %v1544_v50 = vpack.c.bf16 %v1153_v45, %v1153_v45  ;;  %v1154_v51 = vmax.f32 %v1048_v46, 0.0  ;;  %v1612_v52 = vadd.f32 %v1611_v49, %v1610_v47  ;;  %v1723_v53 = vpop.f32.mrb[17].mxu1  ;;  %v1613_v54 = vpop.f32.mrb[18].mxu0 }
 0x11d   : > { %v1724_v55 = vadd.f32 %v1723_v53, %v1722_v48  ;;  %v1725_v56 = vpop.f32.mrb[18].mxu1  ;;  %v1614_v57 = vpop.f32.mrb[19].mxu0 }
 0x11e   : > { %1314 = vst.msk [vmem:[%s2147_s10 + $0x18] sm:$0xf] %vm1307_vm0, %v1544_v50  ;;  %v1545_v58 = vpack.c.bf16 %v1154_v51, %v1154_v51  ;;  %v892_v59 = vadd.f32 %v1612_v52, %v2139_v34  ;;  %v1615_v60 = vadd.f32 %v1614_v57, %v1613_v54  ;;  %v1726_v61 = vpop.f32.mrb[19].mxu1 }
 0x11f   : > { %v1727_v62 = vadd.f32 %v1726_v61, %v1725_v56 }
 0x120   : > { %1315 = vst.msk [vmem:[%s2147_s10 + $0x1c] sm:$0xf] %vm1307_vm0, %v1545_v58  ;;  %v1053_v63 = vadd.f32 %v1724_v55, %v892_v59  ;;  %v895_v0 = vadd.f32 %v1615_v60, %v2139_v34 }
 0x122   : > { %v1155_v1 = vmax.f32 %v1053_v63, 0.0  ;;  %v1056_v2 = vadd.f32 %v1727_v62, %v895_v0  ;;  %v1616_v3 = vpop.f32.mrb[20].mxu0 }
 0x123   : > { %v1728_v4 = vpop.f32.mrb[20].mxu1  ;;  %v1617_v5 = vpop.f32.mrb[21].mxu0 }
 0x124   : > { %v1546_v6 = vpack.c.bf16 %v1155_v1, %v1155_v1  ;;  %v1156_v7 = vmax.f32 %v1056_v2, 0.0  ;;  %v1618_v8 = vadd.f32 %v1617_v5, %v1616_v3  ;;  %v1729_v9 = vpop.f32.mrb[21].mxu1  ;;  %v1619_v10 = vpop.f32.mrb[22].mxu0 }
 0x125   : > { %v1730_v11 = vadd.f32 %v1729_v9, %v1728_v4  ;;  %v1731_v12 = vpop.f32.mrb[22].mxu1  ;;  %v1620_v13 = vpop.f32.mrb[23].mxu0 }
 0x126   : > { %1316 = vst.msk [vmem:[%s2147_s10 + $0x20] sm:$0xf] %vm1307_vm0, %v1546_v6  ;;  %v1547_v14 = vpack.c.bf16 %v1156_v7, %v1156_v7  ;;  %v900_v15 = vadd.f32 %v1618_v8, %v2139_v34  ;;  %v1621_v16 = vadd.f32 %v1620_v13, %v1619_v10  ;;  %v1732_v17 = vpop.f32.mrb[23].mxu1 }
 0x127   : > { %v1733_v18 = vadd.f32 %v1732_v17, %v1731_v12 }
 0x128   : > { %1317 = vst.msk [vmem:[%s2147_s10 + $0x24] sm:$0xf] %vm1307_vm0, %v1547_v14  ;;  %v1061_v19 = vadd.f32 %v1730_v11, %v900_v15  ;;  %v903_v20 = vadd.f32 %v1621_v16, %v2139_v34 }
 0x12a   : > { %v1157_v21 = vmax.f32 %v1061_v19, 0.0  ;;  %v1064_v22 = vadd.f32 %v1733_v18, %v903_v20  ;;  %v1622_v23 = vpop.f32.mrb[24].mxu0 }
 0x12b   : > { %v1734_v24 = vpop.f32.mrb[24].mxu1  ;;  %v1623_v25 = vpop.f32.mrb[25].mxu0 }
 0x12c   : > { %v1548_v26 = vpack.c.bf16 %v1157_v21, %v1157_v21  ;;  %v1158_v27 = vmax.f32 %v1064_v22, 0.0  ;;  %v1624_v28 = vadd.f32 %v1623_v25, %v1622_v23  ;;  %v1735_v29 = vpop.f32.mrb[25].mxu1  ;;  %v1625_v30 = vpop.f32.mrb[26].mxu0 }
 0x12d   : > { %v1736_v31 = vadd.f32 %v1735_v29, %v1734_v24  ;;  %v1737_v32 = vpop.f32.mrb[26].mxu1  ;;  %v1626_v33 = vpop.f32.mrb[27].mxu0 }
 0x12e   : > { %1318 = vst.msk [vmem:[%s2147_s10 + $0x28] sm:$0xf] %vm1307_vm0, %v1548_v26  ;;  %v1549_v35 = vpack.c.bf16 %v1158_v27, %v1158_v27  ;;  %v908_v36 = vadd.f32 %v1624_v28, %v2139_v34  ;;  %v1627_v37 = vadd.f32 %v1626_v33, %v1625_v30  ;;  %v1738_v38 = vpop.f32.mrb[27].mxu1 }
 0x12f   : > { %v1739_v39 = vadd.f32 %v1738_v38, %v1737_v32 }
 0x130   : > { %1319 = vst.msk [vmem:[%s2147_s10 + $0x2c] sm:$0xf] %vm1307_vm0, %v1549_v35  ;;  %v1069_v40 = vadd.f32 %v1736_v31, %v908_v36  ;;  %v911_v41 = vadd.f32 %v1627_v37, %v2139_v34 }
 0x132   : > { %v1159_v42 = vmax.f32 %v1069_v40, 0.0  ;;  %v1072_v43 = vadd.f32 %v1739_v39, %v911_v41  ;;  %v1628_v44 = vpop.f32.mrb[28].mxu0 }
 0x133   : > { %v1740_v45 = vpop.f32.mrb[28].mxu1  ;;  %v1629_v46 = vpop.f32.mrb[29].mxu0 }
 0x134   : > { %v1550_v47 = vpack.c.bf16 %v1159_v42, %v1159_v42  ;;  %v1160_v48 = vmax.f32 %v1072_v43, 0.0  ;;  %v1630_v49 = vadd.f32 %v1629_v46, %v1628_v44  ;;  %v1741_v50 = vpop.f32.mrb[29].mxu1  ;;  %v1631_v51 = vpop.f32.mrb[30].mxu0 }
 0x135   : > { %v1742_v52 = vadd.f32 %v1741_v50, %v1740_v45  ;;  %v1743_v53 = vpop.f32.mrb[30].mxu1  ;;  %v1632_v54 = vpop.f32.mrb[31].mxu0 }
 0x136   : > { %1320 = vst.msk [vmem:[%s2147_s10 + $0x30] sm:$0xf] %vm1307_vm0, %v1550_v47  ;;  %v1551_v55 = vpack.c.bf16 %v1160_v48, %v1160_v48  ;;  %v916_v56 = vadd.f32 %v1630_v49, %v2139_v34  ;;  %v1633_v57 = vadd.f32 %v1632_v54, %v1631_v51  ;;  %v1744_v58 = vpop.f32.mrb[31].mxu1 }
 0x137   : > { %v1745_v59 = vadd.f32 %v1744_v58, %v1743_v53 }
 0x138   : > { %1321 = vst.msk [vmem:[%s2147_s10 + $0x34] sm:$0xf] %vm1307_vm0, %v1551_v55  ;;  %v1077_v60 = vadd.f32 %v1742_v52, %v916_v56  ;;  %v919_v61 = vadd.f32 %v1633_v57, %v2139_v34 }
 0x13a   : > { %v1161_v62 = vmax.f32 %v1077_v60, 0.0  ;;  %v1080_v63 = vadd.f32 %v1745_v59, %v919_v61  ;;  %v1634_v0 = vpop.f32.mrb[32].mxu0 }
 0x13b   : > { %v1746_v1 = vpop.f32.mrb[32].mxu1  ;;  %v1635_v2 = vpop.f32.mrb[33].mxu0 }
 0x13c   : > { %v1552_v3 = vpack.c.bf16 %v1161_v62, %v1161_v62  ;;  %v1162_v4 = vmax.f32 %v1080_v63, 0.0  ;;  %v1636_v5 = vadd.f32 %v1635_v2, %v1634_v0  ;;  %v1747_v6 = vpop.f32.mrb[33].mxu1  ;;  %v1637_v7 = vpop.f32.mrb[34].mxu0 }
 0x13d   : > { %v1748_v8 = vadd.f32 %v1747_v6, %v1746_v1  ;;  %v1749_v9 = vpop.f32.mrb[34].mxu1  ;;  %v1638_v10 = vpop.f32.mrb[35].mxu0 }
 0x13e   : > { %1322 = vst.msk [vmem:[%s2147_s10 + $0x38] sm:$0xf] %vm1307_vm0, %v1552_v3  ;;  %v1553_v11 = vpack.c.bf16 %v1162_v4, %v1162_v4  ;;  %v924_v12 = vadd.f32 %v1636_v5, %v2139_v34  ;;  %v1639_v13 = vadd.f32 %v1638_v10, %v1637_v7  ;;  %v1750_v14 = vpop.f32.mrb[35].mxu1 }
 0x13f   : > { %v1751_v15 = vadd.f32 %v1750_v14, %v1749_v9 }
 0x140   : > { %1323 = vst.msk [vmem:[%s2147_s10 + $0x3c] sm:$0xf] %vm1307_vm0, %v1553_v11  ;;  %v1085_v16 = vadd.f32 %v1748_v8, %v924_v12  ;;  %v927_v17 = vadd.f32 %v1639_v13, %v2139_v34 }
 0x142   : > { %v1163_v18 = vmax.f32 %v1085_v16, 0.0  ;;  %v1088_v19 = vadd.f32 %v1751_v15, %v927_v17  ;;  %v1640_v20 = vpop.f32.mrb[36].mxu0 }
 0x143   : > { %v1752_v21 = vpop.f32.mrb[36].mxu1  ;;  %v1641_v22 = vpop.f32.mrb[37].mxu0 }
 0x144   : > { %v1554_v23 = vpack.c.bf16 %v1163_v18, %v1163_v18  ;;  %v1164_v24 = vmax.f32 %v1088_v19, 0.0  ;;  %v1642_v25 = vadd.f32 %v1641_v22, %v1640_v20  ;;  %v1753_v26 = vpop.f32.mrb[37].mxu1  ;;  %v1643_v27 = vpop.f32.mrb[38].mxu0 }
 0x145   : > { %v1754_v28 = vadd.f32 %v1753_v26, %v1752_v21  ;;  %v1755_v29 = vpop.f32.mrb[38].mxu1  ;;  %v1644_v30 = vpop.f32.mrb[39].mxu0 }
 0x146   : > { %1324 = vst.msk [vmem:[%s2147_s10 + $0x40] sm:$0xf] %vm1307_vm0, %v1554_v23  ;;  %v1555_v31 = vpack.c.bf16 %v1164_v24, %v1164_v24  ;;  %v932_v32 = vadd.f32 %v1642_v25, %v2139_v34  ;;  %v1645_v33 = vadd.f32 %v1644_v30, %v1643_v27  ;;  %v1756_v35 = vpop.f32.mrb[39].mxu1 }
 0x147   : > { %v1757_v36 = vadd.f32 %v1756_v35, %v1755_v29 }
 0x148   : > { %1325 = vst.msk [vmem:[%s2147_s10 + $0x44] sm:$0xf] %vm1307_vm0, %v1555_v31  ;;  %v1093_v37 = vadd.f32 %v1754_v28, %v932_v32  ;;  %v935_v38 = vadd.f32 %v1645_v33, %v2139_v34 }
 0x14a   : > { %v1165_v39 = vmax.f32 %v1093_v37, 0.0  ;;  %v1096_v40 = vadd.f32 %v1757_v36, %v935_v38  ;;  %v1646_v41 = vpop.f32.mrb[40].mxu0 }
 0x14b   : > { %v1758_v42 = vpop.f32.mrb[40].mxu1  ;;  %v1647_v43 = vpop.f32.mrb[41].mxu0 }
 0x14c   : > { %v1556_v44 = vpack.c.bf16 %v1165_v39, %v1165_v39  ;;  %v1166_v45 = vmax.f32 %v1096_v40, 0.0  ;;  %v1648_v46 = vadd.f32 %v1647_v43, %v1646_v41  ;;  %v1759_v47 = vpop.f32.mrb[41].mxu1  ;;  %v1649_v48 = vpop.f32.mrb[42].mxu0 }
 0x14d   : > { %v1760_v49 = vadd.f32 %v1759_v47, %v1758_v42  ;;  %v1761_v50 = vpop.f32.mrb[42].mxu1  ;;  %v1650_v51 = vpop.f32.mrb[43].mxu0 }
 0x14e   : > { %1326 = vst.msk [vmem:[%s2147_s10 + $0x48] sm:$0xf] %vm1307_vm0, %v1556_v44  ;;  %v1557_v52 = vpack.c.bf16 %v1166_v45, %v1166_v45  ;;  %v940_v53 = vadd.f32 %v1648_v46, %v2139_v34  ;;  %v1651_v54 = vadd.f32 %v1650_v51, %v1649_v48  ;;  %v1762_v55 = vpop.f32.mrb[43].mxu1 }
 0x14f   : > { %v1763_v56 = vadd.f32 %v1762_v55, %v1761_v50 }
 0x150   : > { %1327 = vst.msk [vmem:[%s2147_s10 + $0x4c] sm:$0xf] %vm1307_vm0, %v1557_v52  ;;  %v1101_v57 = vadd.f32 %v1760_v49, %v940_v53  ;;  %v943_v58 = vadd.f32 %v1651_v54, %v2139_v34 }
 0x152   : > { %v1167_v59 = vmax.f32 %v1101_v57, 0.0  ;;  %v1104_v60 = vadd.f32 %v1763_v56, %v943_v58  ;;  %v1652_v61 = vpop.f32.mrb[44].mxu0 }
 0x153   : > { %v1764_v62 = vpop.f32.mrb[44].mxu1  ;;  %v1653_v63 = vpop.f32.mrb[45].mxu0 }
 0x154   : > { %v1558_v0 = vpack.c.bf16 %v1167_v59, %v1167_v59  ;;  %v1168_v1 = vmax.f32 %v1104_v60, 0.0  ;;  %v1654_v2 = vadd.f32 %v1653_v63, %v1652_v61  ;;  %v1765_v3 = vpop.f32.mrb[45].mxu1  ;;  %v1655_v4 = vpop.f32.mrb[46].mxu0 }
 0x155   : > { %v1766_v5 = vadd.f32 %v1765_v3, %v1764_v62  ;;  %v1767_v6 = vpop.f32.mrb[46].mxu1  ;;  %v1656_v7 = vpop.f32.mrb[47].mxu0 }
 0x156   : > { %1328 = vst.msk [vmem:[%s2147_s10 + $0x50] sm:$0xf] %vm1307_vm0, %v1558_v0  ;;  %v1559_v8 = vpack.c.bf16 %v1168_v1, %v1168_v1  ;;  %v948_v9 = vadd.f32 %v1654_v2, %v2139_v34  ;;  %v1657_v10 = vadd.f32 %v1656_v7, %v1655_v4  ;;  %v1768_v11 = vpop.f32.mrb[47].mxu1 }
 0x157   : > { %v1769_v12 = vadd.f32 %v1768_v11, %v1767_v6 }
 0x158   : > { %1329 = vst.msk [vmem:[%s2147_s10 + $0x54] sm:$0xf] %vm1307_vm0, %v1559_v8  ;;  %v1109_v13 = vadd.f32 %v1766_v5, %v948_v9  ;;  %v951_v14 = vadd.f32 %v1657_v10, %v2139_v34 }
 0x15a   : > { %v1169_v15 = vmax.f32 %v1109_v13, 0.0  ;;  %v1112_v16 = vadd.f32 %v1769_v12, %v951_v14  ;;  %v1658_v17 = vpop.f32.mrb[48].mxu0 }
 0x15b   : > { %v1770_v18 = vpop.f32.mrb[48].mxu1  ;;  %v1659_v19 = vpop.f32.mrb[49].mxu0 }
 0x15c   : > { %v1560_v20 = vpack.c.bf16 %v1169_v15, %v1169_v15  ;;  %v1170_v21 = vmax.f32 %v1112_v16, 0.0  ;;  %v1660_v22 = vadd.f32 %v1659_v19, %v1658_v17  ;;  %v1771_v23 = vpop.f32.mrb[49].mxu1  ;;  %v1661_v24 = vpop.f32.mrb[50].mxu0 }
 0x15d   : > { %v1772_v25 = vadd.f32 %v1771_v23, %v1770_v18  ;;  %v1773_v26 = vpop.f32.mrb[50].mxu1  ;;  %v1662_v27 = vpop.f32.mrb[51].mxu0 }
 0x15e   : > { %1330 = vst.msk [vmem:[%s2147_s10 + $0x58] sm:$0xf] %vm1307_vm0, %v1560_v20  ;;  %v1561_v28 = vpack.c.bf16 %v1170_v21, %v1170_v21  ;;  %v956_v29 = vadd.f32 %v1660_v22, %v2139_v34  ;;  %v1663_v30 = vadd.f32 %v1662_v27, %v1661_v24  ;;  %v1774_v31 = vpop.f32.mrb[51].mxu1 }
 0x15f   : > { %v1775_v32 = vadd.f32 %v1774_v31, %v1773_v26 }
 0x160   : > { %1331 = vst.msk [vmem:[%s2147_s10 + $0x5c] sm:$0xf] %vm1307_vm0, %v1561_v28  ;;  %v1117_v33 = vadd.f32 %v1772_v25, %v956_v29  ;;  %v959_v35 = vadd.f32 %v1663_v30, %v2139_v34 }
 0x162   : > { %v1171_v36 = vmax.f32 %v1117_v33, 0.0  ;;  %v1120_v37 = vadd.f32 %v1775_v32, %v959_v35  ;;  %v1664_v38 = vpop.f32.mrb[52].mxu0 }
 0x163   : > { %v1776_v39 = vpop.f32.mrb[52].mxu1  ;;  %v1665_v40 = vpop.f32.mrb[53].mxu0 }
 0x164   : > { %v1562_v41 = vpack.c.bf16 %v1171_v36, %v1171_v36  ;;  %v1172_v42 = vmax.f32 %v1120_v37, 0.0  ;;  %v1666_v43 = vadd.f32 %v1665_v40, %v1664_v38  ;;  %v1777_v44 = vpop.f32.mrb[53].mxu1  ;;  %v1667_v45 = vpop.f32.mrb[54].mxu0 }
 0x165   : > { %v1778_v46 = vadd.f32 %v1777_v44, %v1776_v39  ;;  %v1779_v47 = vpop.f32.mrb[54].mxu1  ;;  %v1668_v48 = vpop.f32.mrb[55].mxu0 }
 0x166   : > { %1332 = vst.msk [vmem:[%s2147_s10 + $0x60] sm:$0xf] %vm1307_vm0, %v1562_v41  ;;  %v1563_v49 = vpack.c.bf16 %v1172_v42, %v1172_v42  ;;  %v964_v50 = vadd.f32 %v1666_v43, %v2139_v34  ;;  %v1669_v51 = vadd.f32 %v1668_v48, %v1667_v45  ;;  %v1780_v52 = vpop.f32.mrb[55].mxu1 }
 0x167   : > { %v1781_v53 = vadd.f32 %v1780_v52, %v1779_v47 }
 0x168   : > { %1333 = vst.msk [vmem:[%s2147_s10 + $0x64] sm:$0xf] %vm1307_vm0, %v1563_v49  ;;  %v1125_v54 = vadd.f32 %v1778_v46, %v964_v50  ;;  %v967_v55 = vadd.f32 %v1669_v51, %v2139_v34 }
 0x16a   : > { %v1173_v56 = vmax.f32 %v1125_v54, 0.0  ;;  %v1128_v57 = vadd.f32 %v1781_v53, %v967_v55  ;;  %v1670_v58 = vpop.f32.mrb[56].mxu0 }
 0x16b   : > { %v1782_v59 = vpop.f32.mrb[56].mxu1  ;;  %v1671_v60 = vpop.f32.mrb[57].mxu0 }
 0x16c   : > { %v1564_v61 = vpack.c.bf16 %v1173_v56, %v1173_v56  ;;  %v1174_v62 = vmax.f32 %v1128_v57, 0.0  ;;  %v1672_v63 = vadd.f32 %v1671_v60, %v1670_v58  ;;  %v1783_v0 = vpop.f32.mrb[57].mxu1  ;;  %v1673_v1 = vpop.f32.mrb[58].mxu0 }
 0x16d   : > { %v1784_v2 = vadd.f32 %v1783_v0, %v1782_v59  ;;  %v1785_v3 = vpop.f32.mrb[58].mxu1  ;;  %v1674_v4 = vpop.f32.mrb[59].mxu0 }
 0x16e   : > { %1334 = vst.msk [vmem:[%s2147_s10 + $0x68] sm:$0xf] %vm1307_vm0, %v1564_v61  ;;  %v1565_v5 = vpack.c.bf16 %v1174_v62, %v1174_v62  ;;  %v972_v6 = vadd.f32 %v1672_v63, %v2139_v34  ;;  %v1675_v7 = vadd.f32 %v1674_v4, %v1673_v1  ;;  %v1786_v8 = vpop.f32.mrb[59].mxu1 }
 0x16f   : > { %v1787_v9 = vadd.f32 %v1786_v8, %v1785_v3 }
 0x170   : > { %1335 = vst.msk [vmem:[%s2147_s10 + $0x6c] sm:$0xf] %vm1307_vm0, %v1565_v5  ;;  %v1133_v10 = vadd.f32 %v1784_v2, %v972_v6  ;;  %v975_v11 = vadd.f32 %v1675_v7, %v2139_v34 }
 0x172   : > { %v1175_v12 = vmax.f32 %v1133_v10, 0.0  ;;  %v1136_v13 = vadd.f32 %v1787_v9, %v975_v11  ;;  %v1676_v14 = vpop.f32.mrb[60].mxu0 }
 0x173   : > { %v1788_v15 = vpop.f32.mrb[60].mxu1  ;;  %v1677_v16 = vpop.f32.mrb[61].mxu0 }
 0x174   : > { %v1566_v17 = vpack.c.bf16 %v1175_v12, %v1175_v12  ;;  %v1176_v18 = vmax.f32 %v1136_v13, 0.0  ;;  %v1678_v19 = vadd.f32 %v1677_v16, %v1676_v14  ;;  %v1789_v20 = vpop.f32.mrb[61].mxu1  ;;  %v1679_v21 = vpop.f32.mrb[62].mxu0 }
 0x175   : > { %v1790_v22 = vadd.f32 %v1789_v20, %v1788_v15  ;;  %v1791_v23 = vpop.f32.mrb[62].mxu1  ;;  %v1680_v24 = vpop.f32.mrb[63].mxu0 }
 0x176   : > { %1336 = vst.msk [vmem:[%s2147_s10 + $0x70] sm:$0xf] %vm1307_vm0, %v1566_v17  ;;  %v1567_v25 = vpack.c.bf16 %v1176_v18, %v1176_v18  ;;  %v980_v26 = vadd.f32 %v1678_v19, %v2139_v34  ;;  %v1681_v27 = vadd.f32 %v1680_v24, %v1679_v21  ;;  %v1792_v28 = vpop.f32.mrb[63].mxu1 }
 0x177   : > { %v1793_v29 = vadd.f32 %v1792_v28, %v1791_v23 }
 0x178   : > { %1337 = vst.msk [vmem:[%s2147_s10 + $0x74] sm:$0xf] %vm1307_vm0, %v1567_v25  ;;  %v1141_v30 = vadd.f32 %v1790_v22, %v980_v26  ;;  %v983_v31 = vadd.f32 %v1681_v27, %v2139_v34 }
 0x17a   : > { %v1177_v32 = vmax.f32 %v1141_v30, 0.0  ;;  %v1144_v33 = vadd.f32 %v1793_v29, %v983_v31 }
 0x17c   : > { %v1568_v35 = vpack.c.bf16 %v1177_v32, %v1177_v32  ;;  %v1178_v36 = vmax.f32 %v1144_v33, 0.0 }
 0x17e   : > { %1338 = vst.msk [vmem:[%s2147_s10 + $0x78] sm:$0xf] %vm1307_vm0, %v1568_v35  ;;  %v1569_v37 = vpack.c.bf16 %v1178_v36, %v1178_v36 }
 0x180   : > { %1339 = vst.msk [vmem:[%s2147_s10 + $0x7c] sm:$0xf] %vm1307_vm0, %v1569_v37 }
 0x181 PF: > { %s13_s12 = sadd.s32 1, %s1936_s12  }
 0x182   : > { %p10_p4 = scmp.ge.s32.totalorder %s13_s12, 4  }
 0x184   :  { %12 = sbr.rel (!%p10_p4) target bundleno = 1 (0x1), region = 62 }

// kernel: koopman_forward.8
= control target key start
LH: loop header
LB: loop body
LE: loop exit
PB: predicated region body
PF: predicated region fallthrough
CT: control target
= control target key end

     0   :  { %s2443_s12 = smov 0   ;;  %s2884_s0 = inlined_call_operand.vmem [shape: bf16[512,576], index: 0, kind: input, shape index: {}]   ;;  %s2885_s1 = inlined_call_operand.vmem [shape: bf16[576,64], index: 1, kind: input, shape index: {}]   ;;  %s2886_s2 = inlined_call_operand.vmem [shape: f32[1,64], index: 2, kind: input, shape index: {}]   ;;  %s2887_s3 = inlined_call_operand.vmem [shape: bf16[512,64], index: 3, kind: output, shape index: {}]  }
   0x1 LB: > { %s1750_s13 = sadd.s32 4294967295, %s2421_s12   ;;  %p1754_p0 = scmp.ge.s32.totalorder %s2421_s12, 1  ;;  %s2421_s12 = sphi %s2443_s12, %s13_s12  }
   0x2   : > { %p139_p1 = scmp.lt.s32.totalorder %s2421_s12, 3 }
   0x4   : > { %p140_p2 = pnand %p1754_p0, %p139_p1 }
   0x5   : > { %v2267_v0 = vld [vmem:[%s2885_s1 + $0x40] sm:$0xff] (!%p140_p2)   ;;  %s1755_s16 = sshll.u32 (!%p140_p2), %s1750_s13, 5  ;;  %v2269_v2 = vld [vmem:[%s2885_s1 + $0x48] sm:$0xff] (!%p140_p2)   ;;  %v2271_v4 = vld [vmem:[%s2885_s1 + $0x50] sm:$0xff] (!%p140_p2)   ;;  %vm969_vm0 = vcmask (!%p140_p2), 523264   ;;  %vm1661_vm1 = vcmask (!%p140_p2), 519168  }
   0x6   : > { %143 = sbr.rel (%p140_p2) target bundleno = 416 (0x1a0), region = 32  ;;  %v2268_v1 = vld [vmem:[%s2885_s1] sm:$0xff] (!%p140_p2)   ;;  %1958 = vmatprep.subr.bf16.mxu0 (!%p140_p2), %v2267_v0  ;;  %2242 = vmatprep.subr.bf16.mxu1 (!%p140_p2), %v2267_v0  ;;  %p165_p3 = scmp.lt.s32.totalorder (!%p140_p2), %s1755_s16, 63  ;;  %v2270_v3 = vld [vmem:[%s2885_s1 + $0x8] sm:$0xff] (!%p140_p2)   ;;  %v2272_v5 = vld [vmem:[%s2885_s1 + $0x10] sm:$0xff] (!%p140_p2)  }
   0x7   : > { %1959 = vmatpush3.bf16.msra.mxu0 (!%p140_p2), %v2268_v1  ;;  %2250 = vmatpush3.bf16.msra.mxu1 (!%p140_p2), %v2268_v1  ;;  %v2273_v6 = vld [vmem:[%s2885_s1 + $0x58] sm:$0xff] (!%p140_p2)   ;;  %v2275_v8 = vld [vmem:[%s2885_s1 + $0x60] sm:$0xff] (!%p140_p2)   ;;  %v2277_v10 = vld [vmem:[%s2885_s1 + $0x68] sm:$0xff] (!%p140_p2)  }
   0x8   : > { %1960 = vmatprep.subr.bf16.mxu0 (!%p140_p2), %v2269_v2  ;;  %2243 = vmatprep.subr.bf16.mxu1 (!%p140_p2), %v2269_v2  ;;  %v2274_v7 = vld [vmem:[%s2885_s1 + $0x18] sm:$0xff] (!%p140_p2)   ;;  %v2276_v9 = vld [vmem:[%s2885_s1 + $0x20] sm:$0xff] (!%p140_p2)   ;;  %v2278_v13 = vld [vmem:[%s2885_s1 + $0x28] sm:$0xff] (!%p140_p2)  }
   0x9   : > { %v2279_v14 = vld [vmem:[%s2885_s1 + $0x70] sm:$0xff] (!%p140_p2)   ;;  %v2281_v16 = vld [vmem:[%s2885_s1 + $0x78] sm:$0xff] (!%p140_p2)   ;;  %v2289_v18 = vld [vmem:[%s2885_s1 + $0xc0] sm:$0xff] (!%p140_p2)  }
   0xa   : > { %v2280_v15 = vld [vmem:[%s2885_s1 + $0x30] sm:$0xff] (!%p140_p2)   ;;  %v2282_v17 = vld [vmem:[%s2885_s1 + $0x38] sm:$0xff] (!%p140_p2)   ;;  %v2292_v19 = vld [vmem:[%s2885_s1 + $0x100] sm:$0xff] (!%p140_p2)  }
   0xb   : > { %1961 = vmatpush3.bf16.msra.mxu0 (!%p140_p2), %v2270_v3  ;;  %2251 = vmatpush3.bf16.msra.mxu1 (!%p140_p2), %v2270_v3  ;;  %v2290_v22 = vld [vmem:[%s2885_s1 + $0x80] sm:$0xff] (!%p140_p2)   ;;  %v2291_v23 = vld [vmem:[%s2885_s1 + $0xc8] sm:$0xff] (!%p140_p2)   ;;  %v2300_v28 = vld [vmem:[%s2885_s1 + $0xd0] sm:$0xff] (!%p140_p2)  }
   0xc   : > { %1962 = vmatprep.subr.bf16.mxu0 (!%p140_p2), %v2271_v4  ;;  %2244 = vmatprep.subr.bf16.mxu1 (!%p140_p2), %v2271_v4  ;;  %v2293_v26 = vld [vmem:[%s2885_s1 + $0x88] sm:$0xff] (!%p140_p2)   ;;  %v2301_v30 = vld [vmem:[%s2885_s1 + $0x90] sm:$0xff] (!%p140_p2)   ;;  %v2302_v31 = vld [vmem:[%s2885_s1 + $0xd8] sm:$0xff] (!%p140_p2)  }
   0xd   : > { %s2889_s16 = smov (!%p165_p3, %s1755_s16), 63  ;;  %v2303_v34 = vld [vmem:[%s2885_s1 + $0x98] sm:$0xff]   ;;  %v2323_v35 = vld [vmem:[%s2885_s1 + $0x108] sm:$0xff]   ;;  %v2310_v37 = vld [vmem:[%s2885_s1 + $0xe0] sm:$0xff]  }
   0xe   : > { %s2258_s29 = smul.u32 20, %s2889_s16  ;;  %v2311_v39 = vld [vmem:[%s2885_s1 + $0xa0] sm:$0xff]   ;;  %v2312_v40 = vld [vmem:[%s2885_s1 + $0xe8] sm:$0xff]   ;;  %v2320_v46 = vld [vmem:[%s2885_s1 + $0xf0] sm:$0xff]   ;;  %s1758_s19 = sshll.u32 %s2889_s16, 2 }
   0xf   : > { %1963 = vmatpush3.bf16.msra.mxu0 %v2272_v5  ;;  %2252 = vmatpush3.bf16.msra.mxu1 %v2272_v5  ;;  %v2313_v43 = vld [vmem:[%s2885_s1 + $0xa8] sm:$0xff]   ;;  %v2343_v47 = vld [vmem:[%s2885_s1 + $0x110] sm:$0xff]   ;;  %v2322_v49 = vld [vmem:[%s2885_s1 + $0xf8] sm:$0xff]   ;;  %s2756_s21 = scalar_lea.vmem %s2887_s3, %s1758_s19 }
  0x10   : > { %1964 = vmatprep.subr.bf16.mxu0 %v2273_v6  ;;  %2245 = vmatprep.subr.bf16.mxu1 %v2273_v6  ;;  %s2484_s9 = scalar_lea.vmem %s2884_s0, %s2258_s29  ;;  %v2321_v48 = vld [vmem:[%s2885_s1 + $0xb0] sm:$0xff]   ;;  %v2324_v52 = vld [vmem:[%s2885_s1 + $0xb8] sm:$0xff]  }
  0x11   : > { %v2285_v11 = vld [vmem:[%s2484_s9 + $0x4] ss:$20 sps:$4 sm:$0xff]   ;;  %v2283_v20 = vld [vmem:[%s2484_s9] ss:$20 sps:$4 sm:$0xff]   ;;  %v2298_v27 = vld [vmem:[%s2484_s9 + $0x28] ss:$20 sps:$4 sm:$0xff]  }
  0x12   : > { %v2288_v12 = vld [vmem:[%s2484_s9 + $0x1e4] ss:$20 sps:$4 sm:$0xff]   ;;  %1050 = vmatprep.mubr.bf16.mxu0 %v2285_v11  ;;  %v2286_v21 = vld [vmem:[%s2484_s9 + $0x1e0] ss:$20 sps:$4 sm:$0xff]   ;;  %v2299_v29 = vld [vmem:[%s2484_s9 + $0x208] ss:$20 sps:$4 sm:$0xff]  }
  0x13   : > { %1965 = vmatpush3.bf16.msra.mxu0 %v2274_v7  ;;  %2253 = vmatpush3.bf16.msra.mxu1 %v2274_v7  ;;  %v2294_v24 = vld [vmem:[%s2484_s9 + $0x2c] ss:$20 sps:$4 sm:$0xff]   ;;  %v2304_v32 = vld [vmem:[%s2484_s9 + $0x54] ss:$20 sps:$4 sm:$0xff]   ;;  %v2308_v36 = vld [vmem:[%s2484_s9 + $0x50] ss:$20 sps:$4 sm:$0xff]  }
  0x14   : > { %1966 = vmatprep.subr.bf16.mxu0 %v2275_v8  ;;  %2246 = vmatprep.subr.bf16.mxu1 %v2275_v8  ;;  %v2296_v25 = vld [vmem:[%s2484_s9 + $0x20c] ss:$20 sps:$4 sm:$0xff]   ;;  %v2306_v33 = vld [vmem:[%s2484_s9 + $0x234] ss:$20 sps:$4 sm:$0xff]   ;;  %v2309_v38 = vld [vmem:[%s2484_s9 + $0x230] ss:$20 sps:$4 sm:$0xff]  }
  0x15   : > { %1146 = vmatprep.mubr.bf16.mxu1 %v2288_v12  ;;  %v2314_v41 = vld [vmem:[%s2484_s9 + $0x7c] ss:$20 sps:$4 sm:$0xff]   ;;  %v2318_v44 = vld [vmem:[%s2484_s9 + $0x78] ss:$20 sps:$4 sm:$0xff]   ;;  %v2330_v54 = vld [vmem:[%s2484_s9 + $0xa0] ss:$20 sps:$4 sm:$0xff]  }
  0x16   : > { %v2316_v42 = vld [vmem:[%s2484_s9 + $0x25c] ss:$20 sps:$4 sm:$0xff]   ;;  %v2319_v45 = vld [vmem:[%s2484_s9 + $0x258] ss:$20 sps:$4 sm:$0xff]   ;;  %v2333_v57 = vld [vmem:[%s2484_s9 + $0x34] ss:$20 sps:$4 sm:$0xff]  }
  0x17   : > { %1967 = vmatpush3.bf16.msra.mxu0 %v2276_v9  ;;  %2254 = vmatpush3.bf16.msra.mxu1 %v2276_v9  ;;  %v2325_v50 = vld [vmem:[%s2484_s9 + $0xa4] ss:$20 sps:$4 sm:$0xff]   ;;  %v2329_v51 = vld [vmem:[%s2484_s9 + $0xc] ss:$20 sps:$4 sm:$0xff]   ;;  %v2327_v53 = vld [vmem:[%s2484_s9 + $0x8] ss:$20 sps:$4 sm:$0xff]  }
  0x18   : > { %1968 = vmatprep.subr.bf16.mxu0 %v2277_v10  ;;  %2247 = vmatprep.subr.bf16.mxu1 %v2277_v10  ;;  %v2331_v55 = vld [vmem:[%s2484_s9 + $0xcc] ss:$20 sps:$4 sm:$0xff]   ;;  %v2362_v56 = vld [vmem:[%s2885_s1 + $0x118] sm:$0xff]   ;;  %v2336_v59 = vld [vmem:[%s2484_s9 + $0x30] ss:$20 sps:$4 sm:$0xff]  }
  0x19   : > { %v2335_v58 = vld [vmem:[%s2484_s9 + $0xc8] ss:$20 sps:$4 sm:$0xff]   ;;  %v2341_v62 = vld [vmem:[%s2484_s9 + $0xf0] ss:$20 sps:$4 sm:$0xff]   ;;  %v2342_v63 = vld [vmem:[%s2484_s9 + $0x58] ss:$20 sps:$4 sm:$0xff]  }
  0x1a   : > { %v2337_v60 = vld [vmem:[%s2484_s9 + $0xf4] ss:$20 sps:$4 sm:$0xff]   ;;  %v2339_v61 = vld [vmem:[%s2484_s9 + $0x5c] ss:$20 sps:$4 sm:$0xff]   ;;  %v2346_v1 = vld [vmem:[%s2484_s9 + $0x84] ss:$20 sps:$4 sm:$0xff]  }
  0x1b   : > { %1969 = vmatpush3.bf16.msra.mxu0 %v2278_v13  ;;  %2255 = vmatpush3.bf16.msra.mxu1 %v2278_v13  ;;  %v2344_v0 = vld [vmem:[%s2484_s9 + $0x11c] ss:$20 sps:$4 sm:$0xff]   ;;  %v2348_v2 = vld [vmem:[%s2484_s9 + $0x118] ss:$20 sps:$4 sm:$0xff]   ;;  %v2349_v3 = vld [vmem:[%s2484_s9 + $0x80] ss:$20 sps:$4 sm:$0xff]  }
  0x1c   : > { %1970 = vmatprep.subr.bf16.mxu0 %v2279_v14  ;;  %2248 = vmatprep.subr.bf16.mxu1 %v2279_v14  ;;  %v2350_v4 = vld [vmem:[%s2484_s9 + $0x144] ss:$20 sps:$4 sm:$0xff]   ;;  %v2352_v5 = vld [vmem:[%s2484_s9 + $0xac] ss:$20 sps:$4 sm:$0xff]   ;;  %v2355_v7 = vld [vmem:[%s2484_s9 + $0xa8] ss:$20 sps:$4 sm:$0xff]  }
  0x1d   : > { %v2354_v6 = vld [vmem:[%s2484_s9 + $0x140] ss:$20 sps:$4 sm:$0xff]   ;;  %v2360_v10 = vld [vmem:[%s2484_s9 + $0x168] ss:$20 sps:$4 sm:$0xff]   ;;  %v2361_v11 = vld [vmem:[%s2484_s9 + $0xd0] ss:$20 sps:$4 sm:$0xff]  }
  0x1e   : > { %v2356_v8 = vld [vmem:[%s2484_s9 + $0x16c] ss:$20 sps:$4 sm:$0xff]   ;;  %v2358_v9 = vld [vmem:[%s2484_s9 + $0xd4] ss:$20 sps:$4 sm:$0xff]   ;;  %v2365_v13 = vld [vmem:[%s2484_s9 + $0xfc] ss:$20 sps:$4 sm:$0xff]  }
  0x1f   : > { %1971 = vmatpush3.bf16.msra.mxu0 %v2280_v15  ;;  %2256 = vmatpush3.bf16.msra.mxu1 %v2280_v15  ;;  %v2363_v12 = vld [vmem:[%s2484_s9 + $0x194] ss:$20 sps:$4 sm:$0xff]   ;;  %v2367_v14 = vld [vmem:[%s2484_s9 + $0x190] ss:$20 sps:$4 sm:$0xff]   ;;  %v2368_v15 = vld [vmem:[%s2484_s9 + $0xf8] ss:$20 sps:$4 sm:$0xff]  }
  0x20   : > { %1972 = vmatprep.subr.bf16.mxu0 %v2281_v16  ;;  %2249 = vmatprep.subr.bf16.mxu1 %v2281_v16  ;;  %v2369_v16 = vld [vmem:[%s2484_s9 + $0x1bc] ss:$20 sps:$4 sm:$0xff]  }
  0x23   : > { %1973 = vmatpush3.bf16.msra.mxu0 %v2282_v17  ;;  %2257 = vmatpush3.bf16.msra.mxu1 %v2282_v17  ;;  %v2371_v17 = vld [vmem:[%s2484_s9 + $0x124] ss:$20 sps:$4 sm:$0xff]  }
  0x24   : > { %2070 = vmatprep.subr.bf16.mxu1 %v2289_v18  ;;  %2202 = vmatprep.subr.bf16.mxu0 %v2292_v19  ;;  %v2373_v18 = vld [vmem:[%s2484_s9 + $0x1b8] ss:$20 sps:$4 sm:$0xff]  }
  0x26   : > { %1051 = vmatmul.mubr.bf16.vlgmr.msra.gmra.mrb[0].mxu0 %v2283_v20  ;;  %1147 = vmatmul.mubr.bf16.vlgmr.msra.gmra.mrb[0].mxu1 %v2286_v21  ;;  %v2375_v20 = vld [vmem:[%s2484_s9 + $0x14c] ss:$20 sps:$4 sm:$0xff]   ;;  %v2377_v21 = vld [vmem:[%s2484_s9 + $0x10] ss:$20 sps:$4 sm:$0xff]  }
  0x27   : > { %2071 = vmatpush3.bf16.msra.mxu1 %v2290_v22  ;;  %2203 = vmatpush3.bf16.msra.mxu0 %v2292_v19  ;;  %v2374_v19 = vld [vmem:[%s2484_s9 + $0x120] ss:$20 sps:$4 sm:$0xff]   ;;  %v2378_v22 = vld [vmem:[%s2484_s9 + $0x148] ss:$20 sps:$4 sm:$0xff]  }
  0x28   : > { %2072 = vmatprep.subr.bf16.mxu1 %v2291_v23  ;;  %1058 = vmatprep.mubr.bf16.mxu0 %v2294_v24  ;;  %v2379_v23 = vld [vmem:[%s2484_s9 + $0x38] ss:$20 sps:$4 sm:$0xff]   ;;  %v2380_v24 = vld [vmem:[%s2484_s9 + $0x174] ss:$20 sps:$4 sm:$0xff]  }
  0x29   : > { %1154 = vmatprep.mubr.bf16.mxu1 %v2296_v25  ;;  %2204 = vmatprep.subr.bf16.mxu0 %v2323_v35  ;;  %v2382_v25 = vld [vmem:[%s2484_s9 + $0x60] ss:$20 sps:$4 sm:$0xff]  }
  0x2b   : > { %2073 = vmatpush3.bf16.msra.mxu1 %v2293_v26  ;;  %2205 = vmatpush3.bf16.msra.mxu0 %v2323_v35  ;;  %v2383_v26 = vld [vmem:[%s2484_s9 + $0x170] ss:$20 sps:$4 sm:$0xff]   ;;  %v2394_v35 = vld [vmem:[%s2484_s9 + $0x128] ss:$20 sps:$4 sm:$0xff]  }
  0x2c   : > { %2074 = vmatprep.subr.bf16.mxu1 %v2300_v28  ;;  %2206 = vmatprep.subr.bf16.mxu0 %v2343_v47  ;;  %v2385_v28 = vld [vmem:[%s2484_s9 + $0x19c] ss:$20 sps:$4 sm:$0xff]  }
  0x2e   : > { %1059 = vmatmul.mubr.bf16.gmra.mrb[4].mxu0 %v2298_v27  ;;  %1155 = vmatmul.mubr.bf16.gmra.mrb[4].mxu1 %v2299_v29  ;;  %v2384_v27 = vld [vmem:[%s2484_s9 + $0x88] ss:$20 sps:$4 sm:$0xff]   ;;  %v2387_v29 = vld [vmem:[%s2484_s9 + $0xb0] ss:$20 sps:$4 sm:$0xff]  }
  0x2f   : > { %2075 = vmatpush3.bf16.msra.mxu1 %v2301_v30  ;;  %1066 = vmatprep.mubr.bf16.mxu0 %v2304_v32  ;;  %v2388_v30 = vld [vmem:[%s2484_s9 + $0x198] ss:$20 sps:$4 sm:$0xff]  }
  0x30   : > { %2076 = vmatprep.subr.bf16.mxu1 %v2302_v31  ;;  %1162 = vmatprep.mubr.bf16.mxu1 %v2306_v33  ;;  %v2389_v31 = vld [vmem:[%s2484_s9 + $0xd8] ss:$20 sps:$4 sm:$0xff]   ;;  %v2392_v33 = vld [vmem:[%s2484_s9 + $0x100] ss:$20 sps:$4 sm:$0xff]  }
  0x31   : > { %2207 = vmatpush3.bf16.msra.mxu0 %v2343_v47  ;;  %v2390_v32 = vld [vmem:[%s2484_s9 + $0x1c4] ss:$20 sps:$4 sm:$0xff]  }
  0x32   : > { %2208 = vmatprep.subr.bf16.mxu0 %v2362_v56  ;;  %v2409_v47 = vld [vmem:[%s2484_s9 + $0x218] ss:$20 sps:$4 sm:$0xff]  }
  0x33   : > { %2077 = vmatpush3.bf16.msra.mxu1 %v2303_v34  ;;  %v2393_v34 = vld [vmem:[%s2484_s9 + $0x1c0] ss:$20 sps:$4 sm:$0xff]  }
  0x34   : > { %2078 = vmatprep.subr.bf16.mxu1 %v2310_v37  ;;  %v2397_v37 = vld [vmem:[%s2484_s9 + $0x150] ss:$20 sps:$4 sm:$0xff]  }
  0x35   : > { %2209 = vmatpush3.bf16.msra.mxu0 %v2362_v56 }
  0x36   : > { %1067 = vmatmul.mubr.bf16.gmra.mrb[8].mxu0 %v2308_v36  ;;  %1163 = vmatmul.mubr.bf16.gmra.mrb[8].mxu1 %v2309_v38  ;;  %v2395_v36 = vld [vmem:[%s2484_s9 + $0x1ec] ss:$20 sps:$4 sm:$0xff]   ;;  %v2398_v38 = vld [vmem:[%s2484_s9 + $0x1e8] ss:$20 sps:$4 sm:$0xff]  }
  0x37   : > { %2079 = vmatpush3.bf16.msra.mxu1 %v2311_v39  ;;  %1074 = vmatprep.mubr.bf16.mxu0 %v2314_v41  ;;  %v2399_v39 = vld [vmem:[%s2484_s9 + $0x178] ss:$20 sps:$4 sm:$0xff]   ;;  %v2402_v41 = vld [vmem:[%s2484_s9 + $0x1a0] ss:$20 sps:$4 sm:$0xff]  }
  0x38   : > { %2080 = vmatprep.subr.bf16.mxu1 %v2312_v40  ;;  %1170 = vmatprep.mubr.bf16.mxu1 %v2316_v42  ;;  %v2400_v40 = vld [vmem:[%s2484_s9 + $0x214] ss:$20 sps:$4 sm:$0xff]   ;;  %v2403_v42 = vld [vmem:[%s2484_s9 + $0x210] ss:$20 sps:$4 sm:$0xff]  }
  0x3b   : > { %2081 = vmatpush3.bf16.msra.mxu1 %v2313_v43  ;;  %v2404_v43 = vld [vmem:[%s2484_s9 + $0x1c8] ss:$20 sps:$4 sm:$0xff]  }
  0x3c   : > { %2082 = vmatprep.subr.bf16.mxu1 %v2320_v46  ;;  %v2408_v46 = vld [vmem:[%s2484_s9 + $0x238] ss:$20 sps:$4 sm:$0xff]  }
  0x3e   : > { %1075 = vmatmul.mubr.bf16.gmra.mrb[12].mxu0 %v2318_v44  ;;  %1171 = vmatmul.mubr.bf16.gmra.mrb[12].mxu1 %v2319_v45  ;;  %v2405_v44 = vld [vmem:[%s2484_s9 + $0x23c] ss:$20 sps:$4 sm:$0xff]  }
  0x3f   : > { %2083 = vmatpush3.bf16.msra.mxu1 %v2321_v48  ;;  %1082 = vmatprep.mubr.bf16.mxu0 %v2325_v50  ;;  %v2407_v45 = vld [vmem:[%s2484_s9 + $0x1f0] ss:$20 sps:$4 sm:$0xff]   ;;  %v2413_v50 = vld [vmem:[%s2484_s9 + $0x260] ss:$20 sps:$4 sm:$0xff]  }
  0x40   : > { %2084 = vmatprep.subr.bf16.mxu1 %v2322_v49  ;;  %1211 = vmatprep.mubr.bf16.mxu1 %v2329_v51  ;;  %v2410_v48 = vld [vmem:[%s2484_s9 + $0x264] ss:$20 sps:$4 sm:$0xff]   ;;  %v2412_v49 = vld [vmem:[%s2484_s9 + $0x240] ss:$20 sps:$4 sm:$0xff]   ;;  %v2414_v51 = vld [vmem:[%s2484_s9 + $0x268] ss:$20 sps:$4 sm:$0xff]  }
  0x43   : > { %2085 = vmatpush3.bf16.msra.mxu1 %v2324_v52 }
  0x46   : > { %1083 = vmatmul.mubr.bf16.gmra.mrb[16].mxu0 %v2330_v54  ;;  %1212 = vmatmul.mubr.bf16.vlgmr.msra.gmra.mrb[16].mxu1 %v2327_v53 }
  0x47   : > { %1090 = vmatprep.mubr.bf16.mxu0 %v2331_v55  ;;  %1219 = vmatprep.mubr.bf16.mxu1 %v2333_v57 }
  0x4e   : > { %1091 = vmatmul.mubr.bf16.gmra.mrb[20].mxu0 %v2335_v58  ;;  %1220 = vmatmul.mubr.bf16.gmra.mrb[20].mxu1 %v2336_v59 }
  0x4f   : > { %1098 = vmatprep.mubr.bf16.mxu0 %v2337_v60  ;;  %1227 = vmatprep.mubr.bf16.mxu1 %v2339_v61 }
  0x56   : > { %1099 = vmatmul.mubr.bf16.gmra.mrb[24].mxu0 %v2341_v62  ;;  %1228 = vmatmul.mubr.bf16.gmra.mrb[24].mxu1 %v2342_v63 }
  0x57   : > { %1106 = vmatprep.mubr.bf16.mxu0 %v2344_v0  ;;  %1235 = vmatprep.mubr.bf16.mxu1 %v2346_v1 }
  0x5e   : > { %1107 = vmatmul.mubr.bf16.gmra.mrb[28].mxu0 %v2348_v2  ;;  %1236 = vmatmul.mubr.bf16.gmra.mrb[28].mxu1 %v2349_v3 }
  0x5f   : > { %1114 = vmatprep.mubr.bf16.mxu0 %v2350_v4  ;;  %1243 = vmatprep.mubr.bf16.mxu1 %v2352_v5 }
  0x66   : > { %1115 = vmatmul.mubr.bf16.gmra.mrb[32].mxu0 %v2354_v6  ;;  %1244 = vmatmul.mubr.bf16.gmra.mrb[32].mxu1 %v2355_v7 }
  0x67   : > { %1122 = vmatprep.mubr.bf16.mxu0 %v2356_v8  ;;  %1251 = vmatprep.mubr.bf16.mxu1 %v2358_v9 }
  0x6e   : > { %1123 = vmatmul.mubr.bf16.gmra.mrb[36].mxu0 %v2360_v10  ;;  %1252 = vmatmul.mubr.bf16.gmra.mrb[36].mxu1 %v2361_v11 }
  0x6f   : > { %1130 = vmatprep.mubr.bf16.mxu0 %v2363_v12  ;;  %1259 = vmatprep.mubr.bf16.mxu1 %v2365_v13 }
  0x76   : > { %1131 = vmatmul.mubr.bf16.gmra.mrb[40].mxu0 %v2367_v14  ;;  %1260 = vmatmul.mubr.bf16.gmra.mrb[40].mxu1 %v2368_v15 }
  0x77   : > { %1138 = vmatprep.mubr.bf16.mxu0 %v2369_v16  ;;  %1267 = vmatprep.mubr.bf16.mxu1 %v2371_v17 }
  0x7e   : > { %1139 = vmatmul.mubr.bf16.gmra.mrb[44].mxu0 %v2373_v18  ;;  %1268 = vmatmul.mubr.bf16.gmra.mrb[44].mxu1 %v2374_v19 }
  0x7f   : > { %1275 = vmatprep.mubr.bf16.mxu1 %v2375_v20  ;;  %2210 = vmatprep.mubr.msk.bf16.mxu0 %vm969_vm0, %v2377_v21 }
  0x86   : > { %1276 = vmatmul.mubr.bf16.gmra.mrb[48].mxu1 %v2378_v22  ;;  %2211 = vmatmul.mubr.msk.bf16.vlgmr.msra.gmra.mrb[48].mxu0 %vm969_vm0, %v2379_v23 }
  0x87   : > { %1283 = vmatprep.mubr.bf16.mxu1 %v2380_v24  ;;  %2214 = vmatprep.mubr.msk.bf16.mxu0 %vm969_vm0, %v2382_v25 }
  0x8e   : > { %1284 = vmatmul.mubr.bf16.gmra.mrb[52].mxu1 %v2383_v26  ;;  %2215 = vmatmul.mubr.msk.bf16.gmra.mrb[52].mxu0 %vm969_vm0, %v2384_v27 }
  0x8f   : > { %1291 = vmatprep.mubr.bf16.mxu1 %v2385_v28  ;;  %2218 = vmatprep.mubr.msk.bf16.mxu0 %vm969_vm0, %v2387_v29 }
  0x96   : > { %1292 = vmatmul.mubr.bf16.gmra.mrb[56].mxu1 %v2388_v30  ;;  %2219 = vmatmul.mubr.msk.bf16.gmra.mrb[56].mxu0 %vm969_vm0, %v2389_v31 }
  0x97   : > { %1299 = vmatprep.mubr.bf16.mxu1 %v2390_v32  ;;  %2222 = vmatprep.mubr.msk.bf16.mxu0 %vm969_vm0, %v2392_v33 }
  0x9e   : > { %1300 = vmatmul.mubr.bf16.gmra.mrb[60].mxu1 %v2393_v34  ;;  %2223 = vmatmul.mubr.msk.bf16.gmra.mrb[60].mxu0 %vm969_vm0, %v2394_v35 }
  0x9f   : > { %1307 = vmatprep.mubr.bf16.mxu1 %v2395_v36  ;;  %2226 = vmatprep.mubr.msk.bf16.mxu0 %vm969_vm0, %v2397_v37 }
  0xa6   : > { %1308 = vmatmul.mubr.bf16.gmra.mrb[64].mxu1 %v2398_v38  ;;  %2227 = vmatmul.mubr.msk.bf16.gmra.mrb[64].mxu0 %vm969_vm0, %v2399_v39  ;;  %v2682_v38 = vld [vmem:[%s2886_s2] ss:$0 sm:$0xff] }
  0xa7   : > { %1315 = vmatprep.mubr.bf16.mxu1 %v2400_v40  ;;  %2230 = vmatprep.mubr.msk.bf16.mxu0 %vm969_vm0, %v2402_v41 }
  0xae   : > { %1316 = vmatmul.mubr.bf16.gmra.mrb[68].mxu1 %v2403_v42  ;;  %2231 = vmatmul.mubr.msk.bf16.gmra.mrb[68].mxu0 %vm969_vm0, %v2404_v43 }
  0xaf   : > { %1323 = vmatprep.mubr.bf16.mxu1 %v2405_v44  ;;  %2234 = vmatprep.mubr.msk.bf16.mxu0 %vm969_vm0, %v2407_v45 }
  0xb6   : > { %1324 = vmatmul.mubr.bf16.gmra.mrb[72].mxu1 %v2408_v46  ;;  %2235 = vmatmul.mubr.msk.bf16.gmra.mrb[72].mxu0 %vm969_vm0, %v2409_v47 }
  0xb7   : > { %1331 = vmatprep.mubr.bf16.mxu1 %v2410_v48  ;;  %2238 = vmatprep.mubr.msk.bf16.mxu0 %vm969_vm0, %v2412_v49 }
  0xbe   : > { %1332 = vmatmul.mubr.bf16.gmra.mrb[76].mxu1 %v2413_v50  ;;  %2239 = vmatmul.mubr.msk.bf16.gmra.mrb[76].mxu0 %vm969_vm0, %v2414_v51 }
  0xf9   : > { %v2046_v52 = vpop.f32.mrb[0].mxu1  ;;  %v1974_v53 = vpop.f32.mrb[0].mxu0 }
  0xfa   : > { %v2047_v54 = vpop.f32.mrb[1].mxu1  ;;  %v1975_v55 = vpop.f32.mrb[1].mxu0 }
  0xfb   : > { %v2663_v56 = vadd.f32 %v2047_v54, %v2046_v52  ;;  %v2049_v57 = vpop.f32.mrb[2].mxu1  ;;  %v1976_v58 = vadd.f32 %v1975_v55, %v1974_v53  ;;  %v1977_v59 = vpop.f32.mrb[2].mxu0 }
  0xfc   : > { %v2050_v60 = vpop.f32.mrb[3].mxu1  ;;  %v1978_v61 = vpop.f32.mrb[3].mxu0 }
  0xfd   : > { %v2665_v62 = vadd.f32 %v2050_v60, %v2049_v57  ;;  %v1979_v63 = vadd.f32 %v1978_v61, %v1977_v59  ;;  %v1053_v41 = vadd.f32 %v1976_v58, %v2682_v38 }
  0xff   : > { %v1056_v48 = vadd.f32 %v1979_v63, %v2682_v38 }
 0x101   : > { %v2052_v0 = vpop.f32.mrb[4].mxu1  ;;  %v1980_v1 = vpop.f32.mrb[4].mxu0 }
 0x102   : > { %v2053_v2 = vpop.f32.mrb[5].mxu1  ;;  %v1981_v3 = vpop.f32.mrb[5].mxu0 }
 0x103   : > { %v2667_v4 = vadd.f32 %v2053_v2, %v2052_v0  ;;  %v2055_v5 = vpop.f32.mrb[6].mxu1  ;;  %v1982_v6 = vadd.f32 %v1981_v3, %v1980_v1  ;;  %v1983_v7 = vpop.f32.mrb[6].mxu0 }
 0x104   : > { %v2056_v8 = vpop.f32.mrb[7].mxu1  ;;  %v1984_v9 = vpop.f32.mrb[7].mxu0 }
 0x105   : > { %v2669_v10 = vadd.f32 %v2056_v8, %v2055_v5  ;;  %v1985_v11 = vadd.f32 %v1984_v9, %v1983_v7  ;;  %v1061_v58 = vadd.f32 %v1982_v6, %v2682_v38 }
 0x107   : > { %v1064_v63 = vadd.f32 %v1985_v11, %v2682_v38 }
 0x109   : > { %v2058_v12 = vpop.f32.mrb[8].mxu1  ;;  %v1986_v13 = vpop.f32.mrb[8].mxu0 }
 0x10a   : > { %v2059_v14 = vpop.f32.mrb[9].mxu1  ;;  %v1987_v15 = vpop.f32.mrb[9].mxu0 }
 0x10b   : > { %v2671_v16 = vadd.f32 %v2059_v14, %v2058_v12  ;;  %v2061_v17 = vpop.f32.mrb[10].mxu1  ;;  %v1988_v18 = vadd.f32 %v1987_v15, %v1986_v13  ;;  %v1989_v19 = vpop.f32.mrb[10].mxu0 }
 0x10c   : > { %v2062_v20 = vpop.f32.mrb[11].mxu1  ;;  %v1990_v21 = vpop.f32.mrb[11].mxu0 }
 0x10d   : > { %v2673_v22 = vadd.f32 %v2062_v20, %v2061_v17  ;;  %v1991_v23 = vadd.f32 %v1990_v21, %v1989_v19  ;;  %v1069_v6 = vadd.f32 %v1988_v18, %v2682_v38 }
 0x10f   : > { %v1072_v11 = vadd.f32 %v1991_v23, %v2682_v38 }
 0x111   : > { %v2064_v24 = vpop.f32.mrb[12].mxu1  ;;  %v1992_v25 = vpop.f32.mrb[12].mxu0 }
 0x112   : > { %v2065_v26 = vpop.f32.mrb[13].mxu1  ;;  %v1993_v27 = vpop.f32.mrb[13].mxu0 }
 0x113   : > { %v2675_v28 = vadd.f32 %v2065_v26, %v2064_v24  ;;  %v2067_v29 = vpop.f32.mrb[14].mxu1  ;;  %v1994_v30 = vadd.f32 %v1993_v27, %v1992_v25  ;;  %v1995_v31 = vpop.f32.mrb[14].mxu0 }
 0x114   : > { %v2068_v32 = vpop.f32.mrb[15].mxu1  ;;  %v1996_v33 = vpop.f32.mrb[15].mxu0 }
 0x115   : > { %v2677_v34 = vadd.f32 %v2068_v32, %v2067_v29  ;;  %v1997_v35 = vadd.f32 %v1996_v33, %v1995_v31  ;;  %v1077_v18 = vadd.f32 %v1994_v30, %v2682_v38 }
 0x117   : > { %v1080_v23 = vadd.f32 %v1997_v35, %v2682_v38 }
 0x119   : > { %v2086_v36 = vpop.f32.mrb[16].mxu1  ;;  %v1998_v37 = vpop.f32.mrb[16].mxu0 }
 0x11a   : > { %v2087_v39 = vpop.f32.mrb[17].mxu1  ;;  %v1999_v40 = vpop.f32.mrb[17].mxu0 }
 0x11b   : > { %v2088_v42 = vadd.f32 %v2087_v39, %v2086_v36  ;;  %v2089_v43 = vpop.f32.mrb[18].mxu1  ;;  %v2000_v44 = vadd.f32 %v1999_v40, %v1998_v37  ;;  %v2001_v45 = vpop.f32.mrb[18].mxu0 }
 0x11c   : > { %v2090_v46 = vpop.f32.mrb[19].mxu1  ;;  %v2002_v47 = vpop.f32.mrb[19].mxu0 }
 0x11d   : > { %v2091_v49 = vadd.f32 %v2090_v46, %v2089_v43  ;;  %v2003_v50 = vadd.f32 %v2002_v47, %v2001_v45  ;;  %v2686_v51 = vadd.f32 %v2088_v42, %v1053_v41  ;;  %v1085_v30 = vadd.f32 %v2000_v44, %v2682_v38 }
 0x11f   : > { %v2688_v52 = vadd.f32 %v2091_v49, %v1056_v48  ;;  %v1088_v35 = vadd.f32 %v2003_v50, %v2682_v38 }
 0x121   : > { %v2092_v53 = vpop.f32.mrb[20].mxu1  ;;  %v2004_v54 = vpop.f32.mrb[20].mxu0 }
 0x122   : > { %v2093_v55 = vpop.f32.mrb[21].mxu1  ;;  %v2005_v57 = vpop.f32.mrb[21].mxu0 }
 0x123   : > { %v2094_v59 = vadd.f32 %v2093_v55, %v2092_v53  ;;  %v2095_v60 = vpop.f32.mrb[22].mxu1  ;;  %v2006_v61 = vadd.f32 %v2005_v57, %v2004_v54  ;;  %v2007_v0 = vpop.f32.mrb[22].mxu0 }
 0x124   : > { %v2096_v1 = vpop.f32.mrb[23].mxu1  ;;  %v2008_v2 = vpop.f32.mrb[23].mxu0 }
 0x125   : > { %v2097_v3 = vadd.f32 %v2096_v1, %v2095_v60  ;;  %v2009_v5 = vadd.f32 %v2008_v2, %v2007_v0  ;;  %v2692_v7 = vadd.f32 %v2094_v59, %v1061_v58  ;;  %v1093_v44 = vadd.f32 %v2006_v61, %v2682_v38 }
 0x127   : > { %v2694_v8 = vadd.f32 %v2097_v3, %v1064_v63  ;;  %v1096_v50 = vadd.f32 %v2009_v5, %v2682_v38 }
 0x129   : > { %v2098_v9 = vpop.f32.mrb[24].mxu1  ;;  %v2010_v12 = vpop.f32.mrb[24].mxu0 }
 0x12a   : > { %v2099_v13 = vpop.f32.mrb[25].mxu1  ;;  %v2011_v14 = vpop.f32.mrb[25].mxu0 }
 0x12b   : > { %v2100_v15 = vadd.f32 %v2099_v13, %v2098_v9  ;;  %v2101_v17 = vpop.f32.mrb[26].mxu1  ;;  %v2012_v19 = vadd.f32 %v2011_v14, %v2010_v12  ;;  %v2013_v20 = vpop.f32.mrb[26].mxu0 }
 0x12c   : > { %v2102_v21 = vpop.f32.mrb[27].mxu1  ;;  %v2014_v24 = vpop.f32.mrb[27].mxu0 }
 0x12d   : > { %v2103_v25 = vadd.f32 %v2102_v21, %v2101_v17  ;;  %v2015_v26 = vadd.f32 %v2014_v24, %v2013_v20  ;;  %v2698_v27 = vadd.f32 %v2100_v15, %v1069_v6 }
 0x12f   : > { %v2700_v29 = vadd.f32 %v2103_v25, %v1072_v11 }
 0x131   : > { %v2104_v31 = vpop.f32.mrb[28].mxu1  ;;  %v2016_v32 = vpop.f32.mrb[28].mxu0 }
 0x132   : > { %v2105_v33 = vpop.f32.mrb[29].mxu1  ;;  %v2017_v36 = vpop.f32.mrb[29].mxu0 }
 0x133   : > { %v2106_v37 = vadd.f32 %v2105_v33, %v2104_v31  ;;  %v2107_v39 = vpop.f32.mrb[30].mxu1  ;;  %v2018_v40 = vadd.f32 %v2017_v36, %v2016_v32  ;;  %v2019_v41 = vpop.f32.mrb[30].mxu0 }
 0x134   : > { %v2108_v42 = vpop.f32.mrb[31].mxu1  ;;  %v2020_v43 = vpop.f32.mrb[31].mxu0 }
 0x135   : > { %v2109_v45 = vadd.f32 %v2108_v42, %v2107_v39  ;;  %v2021_v46 = vadd.f32 %v2020_v43, %v2019_v41  ;;  %v2704_v47 = vadd.f32 %v2106_v37, %v1077_v18  ;;  %v1101_v39 = vadd.f32 %v2012_v19, %v2682_v38 }
 0x137   : > { %v2706_v48 = vadd.f32 %v2109_v45, %v1080_v23 }
 0x139   : > { %v2110_v49 = vpop.f32.mrb[32].mxu1  ;;  %v2022_v53 = vpop.f32.mrb[32].mxu0 }
 0x13a   : > { %v2111_v54 = vpop.f32.mrb[33].mxu1  ;;  %v2023_v55 = vpop.f32.mrb[33].mxu0 }
 0x13b   : > { %v2112_v57 = vadd.f32 %v2111_v54, %v2110_v49  ;;  %v2113_v58 = vpop.f32.mrb[34].mxu1  ;;  %v2709_v59 = vadd.f32 %v2023_v55, %v2022_v53  ;;  %v2025_v60 = vpop.f32.mrb[34].mxu0  ;;  %v1104_v49 = vadd.f32 %v2015_v26, %v2682_v38 }
 0x13c   : > { %v2114_v0 = vpop.f32.mrb[35].mxu1  ;;  %v2026_v1 = vpop.f32.mrb[35].mxu0 }
 0x13d   : > { %v2115_v2 = vadd.f32 %v2114_v0, %v2113_v58  ;;  %v2027_v63 = vadd.f32 %v2026_v1, %v2025_v60  ;;  %v2712_v3 = vadd.f32 %v2112_v57, %v1085_v30  ;;  %v1109_v0 = vadd.f32 %v2018_v40, %v2682_v38 }
 0x13f   : > { %v2714_v9 = vadd.f32 %v2115_v2, %v1088_v35 }
 0x141   : > { %v2116_v12 = vpop.f32.mrb[36].mxu1  ;;  %v2028_v13 = vpop.f32.mrb[36].mxu0 }
 0x142   : > { %v2117_v14 = vpop.f32.mrb[37].mxu1  ;;  %v2029_v6 = vpop.f32.mrb[37].mxu0 }
 0x143   : > { %v2118_v15 = vadd.f32 %v2117_v14, %v2116_v12  ;;  %v2119_v17 = vpop.f32.mrb[38].mxu1  ;;  %v2717_v20 = vadd.f32 %v2029_v6, %v2028_v13  ;;  %v2031_v21 = vpop.f32.mrb[38].mxu0  ;;  %v1112_v14 = vadd.f32 %v2021_v46, %v2682_v38 }
 0x144   : > { %v2120_v24 = vpop.f32.mrb[39].mxu1  ;;  %v2032_v11 = vpop.f32.mrb[39].mxu0 }
 0x145   : > { %v2121_v25 = vadd.f32 %v2120_v24, %v2119_v17  ;;  %v2720_v31 = vadd.f32 %v2032_v11, %v2031_v21  ;;  %v2722_v32 = vadd.f32 %v2118_v15, %v1093_v44 }
 0x147   : > { %v2724_v33 = vadd.f32 %v2121_v25, %v1096_v50  ;;  %v1117_v25 = vadd.f32 %v2709_v59, %v2682_v38 }
 0x149   : > { %v2122_v36 = vpop.f32.mrb[40].mxu1  ;;  %v2034_v18 = vpop.f32.mrb[40].mxu0 }
 0x14a   : > { %v2123_v37 = vpop.f32.mrb[41].mxu1  ;;  %v2035_v61 = vpop.f32.mrb[41].mxu0 }
 0x14b   : > { %v2124_v41 = vadd.f32 %v2123_v37, %v2122_v36  ;;  %v2125_v42 = vpop.f32.mrb[42].mxu1  ;;  %v2727_v43 = vadd.f32 %v2035_v61, %v2034_v18  ;;  %v2037_v23 = vpop.f32.mrb[42].mxu0  ;;  %v1120_v61 = vadd.f32 %v2027_v63, %v2682_v38 }
 0x14c   : > { %v2126_v45 = vpop.f32.mrb[43].mxu1  ;;  %v2038_v5 = vpop.f32.mrb[43].mxu0 }
 0x14d   : > { %v2127_v53 = vadd.f32 %v2126_v45, %v2125_v42  ;;  %v2730_v54 = vadd.f32 %v2038_v5, %v2037_v23  ;;  %v2732_v55 = vadd.f32 %v2124_v41, %v1101_v39 }
 0x14f   : > { %v2734_v30 = vadd.f32 %v2127_v53, %v1104_v49 }
 0x151   : > { %v2128_v57 = vpop.f32.mrb[44].mxu1  ;;  %v2040_v58 = vpop.f32.mrb[44].mxu0 }
 0x152   : > { %v2129_v60 = vpop.f32.mrb[45].mxu1  ;;  %v2041_v19 = vpop.f32.mrb[45].mxu0 }
 0x153   : > { %v2130_v1 = vadd.f32 %v2129_v60, %v2128_v57  ;;  %v2131_v35 = vpop.f32.mrb[46].mxu1  ;;  %v2737_v2 = vadd.f32 %v2041_v19, %v2040_v58  ;;  %v2043_v12 = vpop.f32.mrb[46].mxu0 }
 0x154   : > { %v2132_v26 = vpop.f32.mrb[47].mxu1  ;;  %v2044_v13 = vpop.f32.mrb[47].mxu0 }
 0x155   : > { %v2133_v6 = vadd.f32 %v2132_v26, %v2131_v35  ;;  %v2740_v44 = vadd.f32 %v2044_v13, %v2043_v12  ;;  %v2742_v15 = vadd.f32 %v2130_v1, %v1109_v0  ;;  %v1125_v35 = vadd.f32 %v2717_v20, %v2682_v38 }
 0x157   : > { %v2744_v17 = vadd.f32 %v2133_v6, %v1112_v14  ;;  %v1128_v6 = vadd.f32 %v2720_v31, %v2682_v38 }
 0x159   : > { %v2134_v21 = vpop.f32.mrb[48].mxu1  ;;  %v2212_v24 = vpop.f32.mrb[48].mxu0 }
 0x15a   : > { %v1383_v40 = vadd.f32 %v2212_v24, %v2692_v7  ;;  %v2135_v11 = vpop.f32.mrb[49].mxu1  ;;  %v1374_v50 = vpop.f32.mrb[49].mxu0 }
 0x15b   : > { %v2136_v36 = vadd.f32 %v2135_v11, %v2134_v21  ;;  %v1375_v46 = vadd.f32 %v1374_v50, %v2686_v51  ;;  %v2137_v18 = vpop.f32.mrb[50].mxu1  ;;  %v2213_v37 = vpop.f32.mrb[50].mxu0 }
 0x15c   : > { %v1503_v39 = vmax.f32 %v1383_v40, 0.0  ;;  %v1386_v41 = vadd.f32 %v2213_v37, %v2694_v8  ;;  %v2138_v42 = vpop.f32.mrb[51].mxu1  ;;  %v1377_v23 = vpop.f32.mrb[51].mxu0 }
 0x15d   : > { %v1501_v7 = vmax.f32 %v1375_v46, 0.0  ;;  %v2139_v51 = vadd.f32 %v2138_v42, %v2137_v18  ;;  %v1378_v59 = vadd.f32 %v1377_v23, %v2688_v52  ;;  %v2759_v45 = vadd.f32 %v2136_v36, %v1117_v25 }
 0x15e   : > { %v1928_v63 = vpack.c.bf16 %v1503_v39, %v1503_v39  ;;  %v1504_v5 = vmax.f32 %v1386_v41, 0.0  ;;  %v1133_v23 = vadd.f32 %v2727_v43, %v2682_v38 }
 0x15f   : > { %v1926_v8 = vpack.c.bf16 %v1501_v7, %v1501_v7  ;;  %v1502_v49 = vmax.f32 %v1378_v59, 0.0  ;;  %v2761_v53 = vadd.f32 %v2139_v51, %v1120_v61 }
 0x160   : > { %1664 = vst.msk [vmem:[%s2756_s21 + $0x8] sm:$0xf] %vm1661_vm1, %v1928_v63  ;;  %v1929_v57 = vpack.c.bf16 %v1504_v5, %v1504_v5  ;;  %v1136_v5 = vadd.f32 %v2730_v54, %v2682_v38 }
 0x161   : > { %1662 = vst.msk [vmem:[%s2756_s21] sm:$0xf] %vm1661_vm1, %v1926_v8  ;;  %v1927_v58 = vpack.c.bf16 %v1502_v49, %v1502_v49  ;;  %v2140_v60 = vpop.f32.mrb[52].mxu1  ;;  %v2216_v19 = vpop.f32.mrb[52].mxu0 }
 0x162   : > { %1665 = vst.msk [vmem:[%s2756_s21 + $0xc] sm:$0xf] %vm1661_vm1, %v1929_v57  ;;  %v1399_v52 = vadd.f32 %v2216_v19, %v2704_v47  ;;  %v2141_v0 = vpop.f32.mrb[53].mxu1  ;;  %v1390_v1 = vpop.f32.mrb[53].mxu0 }
 0x163   : > { %1663 = vst.msk [vmem:[%s2756_s21 + $0x4] sm:$0xf] %vm1661_vm1, %v1927_v58  ;;  %v2142_v12 = vadd.f32 %v2141_v0, %v2140_v60  ;;  %v1391_v26 = vadd.f32 %v1390_v1, %v2698_v27  ;;  %v2143_v13 = vpop.f32.mrb[54].mxu1  ;;  %v2217_v14 = vpop.f32.mrb[54].mxu0 }
 0x164   : > { %v1507_v21 = vmax.f32 %v1399_v52, 0.0  ;;  %v1402_v47 = vadd.f32 %v2217_v14, %v2706_v48  ;;  %v2144_v24 = vpop.f32.mrb[55].mxu1  ;;  %v1393_v40 = vpop.f32.mrb[55].mxu0 }
 0x165   : > { %v1505_v11 = vmax.f32 %v1391_v26, 0.0  ;;  %v2145_v20 = vadd.f32 %v2144_v24, %v2143_v13  ;;  %v1394_v50 = vadd.f32 %v1393_v40, %v2700_v29  ;;  %v2779_v25 = vadd.f32 %v2142_v12, %v1125_v35 }
 0x166   : > { %v1932_v27 = vpack.c.bf16 %v1507_v21, %v1507_v21  ;;  %v1508_v36 = vmax.f32 %v1402_v47, 0.0 }
 0x167   : > { %v1930_v46 = vpack.c.bf16 %v1505_v11, %v1505_v11  ;;  %v1506_v18 = vmax.f32 %v1394_v50, 0.0  ;;  %v2781_v37 = vadd.f32 %v2145_v20, %v1128_v6  ;;  %v1141_v6 = vadd.f32 %v2737_v2, %v2682_v38 }
 0x168   : > { %1668 = vst.msk [vmem:[%s2756_s21 + $0x18] sm:$0xf] %vm1661_vm1, %v1932_v27  ;;  %v1933_v31 = vpack.c.bf16 %v1508_v36, %v1508_v36  ;;  %v1144_v11 = vadd.f32 %v2740_v44, %v2682_v38 }
 0x169   : > { %1666 = vst.msk [vmem:[%s2756_s21 + $0x10] sm:$0xf] %vm1661_vm1, %v1930_v46  ;;  %v1931_v48 = vpack.c.bf16 %v1506_v18, %v1506_v18  ;;  %v2146_v61 = vpop.f32.mrb[56].mxu1  ;;  %v2220_v39 = vpop.f32.mrb[56].mxu0 }
 0x16a   : > { %1669 = vst.msk [vmem:[%s2756_s21 + $0x1c] sm:$0xf] %vm1661_vm1, %v1933_v31  ;;  %v1415_v29 = vadd.f32 %v2220_v39, %v2722_v32  ;;  %v2147_v41 = vpop.f32.mrb[57].mxu1  ;;  %v1406_v42 = vpop.f32.mrb[57].mxu0 }
 0x16b   : > { %1667 = vst.msk [vmem:[%s2756_s21 + $0x14] sm:$0xf] %vm1661_vm1, %v1931_v48  ;;  %v2148_v7 = vadd.f32 %v2147_v41, %v2146_v61  ;;  %v1407_v51 = vadd.f32 %v1406_v42, %v2712_v3  ;;  %v2149_v59 = vpop.f32.mrb[58].mxu1  ;;  %v2221_v63 = vpop.f32.mrb[58].mxu0 }
 0x16c   : > { %v1511_v8 = vmax.f32 %v1415_v29, 0.0  ;;  %v1418_v32 = vadd.f32 %v2221_v63, %v2724_v33  ;;  %v2150_v49 = vpop.f32.mrb[59].mxu1  ;;  %v1409_v57 = vpop.f32.mrb[59].mxu0 }
 0x16d   : > { %v1509_v58 = vmax.f32 %v1407_v51, 0.0  ;;  %v2151_v43 = vadd.f32 %v2150_v49, %v2149_v59  ;;  %v1410_v60 = vadd.f32 %v1409_v57, %v2714_v9  ;;  %v2799_v19 = vadd.f32 %v2148_v7, %v1133_v23 }
 0x16e   : > { %v1936_v3 = vpack.c.bf16 %v1511_v8, %v1511_v8  ;;  %v1512_v52 = vmax.f32 %v1418_v32, 0.0  ;;  %v1149_v7 = vadd.f32 %v2663_v56, %v2682_v38  ;;  %v1152_v8 = vadd.f32 %v2665_v62, %v2682_v38 }
 0x16f   : > { %v1934_v0 = vpack.c.bf16 %v1509_v58, %v1509_v58  ;;  %v1510_v1 = vmax.f32 %v1410_v60, 0.0  ;;  %v2801_v35 = vadd.f32 %v2151_v43, %v1136_v5 }
 0x170   : > { %1672 = vst.msk [vmem:[%s2756_s21 + $0x28] sm:$0xf] %vm1661_vm1, %v1936_v3  ;;  %v1937_v54 = vpack.c.bf16 %v1512_v52, %v1512_v52 }
 0x171   : > { %1670 = vst.msk [vmem:[%s2756_s21 + $0x20] sm:$0xf] %vm1661_vm1, %v1934_v0  ;;  %v1935_v33 = vpack.c.bf16 %v1510_v1, %v1510_v1  ;;  %v2152_v12 = vpop.f32.mrb[60].mxu1  ;;  %v2224_v26 = vpop.f32.mrb[60].mxu0 }
 0x172   : > { %1673 = vst.msk [vmem:[%s2756_s21 + $0x2c] sm:$0xf] %vm1661_vm1, %v1937_v54  ;;  %v1431_v9 = vadd.f32 %v2224_v26, %v2742_v15  ;;  %v2153_v13 = vpop.f32.mrb[61].mxu1  ;;  %v1422_v14 = vpop.f32.mrb[61].mxu0 }
 0x173   : > { %1671 = vst.msk [vmem:[%s2756_s21 + $0x24] sm:$0xf] %vm1661_vm1, %v1935_v33  ;;  %v2154_v21 = vadd.f32 %v2153_v13, %v2152_v12  ;;  %v1423_v47 = vadd.f32 %v1422_v14, %v2732_v55  ;;  %v2155_v24 = vpop.f32.mrb[62].mxu1  ;;  %v2225_v40 = vpop.f32.mrb[62].mxu0 }
 0x174   : > { %v1515_v20 = vmax.f32 %v1431_v9, 0.0  ;;  %v1434_v15 = vadd.f32 %v2225_v40, %v2744_v17  ;;  %v2156_v50 = vpop.f32.mrb[63].mxu1  ;;  %v1425_v27 = vpop.f32.mrb[63].mxu0  ;;  %v1157_v9 = vadd.f32 %v2667_v4, %v2682_v38 }
 0x175   : > { %v1513_v36 = vmax.f32 %v1423_v47, 0.0  ;;  %v2157_v2 = vadd.f32 %v2156_v50, %v2155_v24  ;;  %v1426_v46 = vadd.f32 %v1425_v27, %v2734_v30  ;;  %v1302_v18 = vadd.f32 %v2154_v21, %v1141_v6 }
 0x176   : > { %v1940_v31 = vpack.c.bf16 %v1515_v20, %v1515_v20  ;;  %v1516_v55 = vmax.f32 %v1434_v15, 0.0  ;;  %v1160_v47 = vadd.f32 %v2669_v10, %v2682_v38 }
 0x177   : > { %v1938_v48 = vpack.c.bf16 %v1513_v36, %v1513_v36  ;;  %v1514_v61 = vmax.f32 %v1426_v46, 0.0  ;;  %v1305_v39 = vadd.f32 %v2157_v2, %v1144_v11 }
 0x178   : > { %1676 = vst.msk [vmem:[%s2756_s21 + $0x38] sm:$0xf] %vm1661_vm1, %v1940_v31  ;;  %v1941_v44 = vpack.c.bf16 %v1516_v55, %v1516_v55 }
 0x179   : > { %1674 = vst.msk [vmem:[%s2756_s21 + $0x30] sm:$0xf] %vm1661_vm1, %v1938_v48  ;;  %v1939_v17 = vpack.c.bf16 %v1514_v61, %v1514_v61  ;;  %v2158_v29 = vpop.f32.mrb[64].mxu1  ;;  %v2228_v41 = vpop.f32.mrb[64].mxu0 }
 0x17a   : > { %1677 = vst.msk [vmem:[%s2756_s21 + $0x3c] sm:$0xf] %vm1661_vm1, %v1941_v44  ;;  %v1447_v42 = vadd.f32 %v2228_v41, %v2779_v25  ;;  %v2159_v30 = vpop.f32.mrb[65].mxu1  ;;  %v1438_v23 = vpop.f32.mrb[65].mxu0  ;;  %v1165_v44 = vadd.f32 %v2671_v16, %v2682_v38 }
 0x17b   : > { %1675 = vst.msk [vmem:[%s2756_s21 + $0x34] sm:$0xf] %vm1661_vm1, %v1939_v17  ;;  %v2160_v51 = vadd.f32 %v2159_v30, %v2158_v29  ;;  %v1439_v59 = vadd.f32 %v1438_v23, %v2759_v45  ;;  %v2161_v63 = vpop.f32.mrb[66].mxu1  ;;  %v2229_v5 = vpop.f32.mrb[66].mxu0  ;;  %v1168_v30 = vadd.f32 %v2673_v22, %v2682_v38 }
 0x17c   : > { %v1519_v32 = vmax.f32 %v1447_v42, 0.0  ;;  %v1450_v25 = vadd.f32 %v2229_v5, %v2781_v37  ;;  %v2162_v49 = vpop.f32.mrb[67].mxu1  ;;  %v1441_v57 = vpop.f32.mrb[67].mxu0 }
 0x17d   : > { %v1517_v58 = vmax.f32 %v1439_v59, 0.0  ;;  %v2163_v56 = vadd.f32 %v2162_v49, %v2161_v63  ;;  %v1442_v43 = vadd.f32 %v1441_v57, %v2761_v53  ;;  %v1310_v60 = vadd.f32 %v2160_v51, %v1149_v7 }
 0x17e   : > { %v1944_v3 = vpack.c.bf16 %v1519_v32, %v1519_v32  ;;  %v1520_v45 = vmax.f32 %v1450_v25, 0.0 }
 0x17f   : > { %v1942_v52 = vpack.c.bf16 %v1517_v58, %v1517_v58  ;;  %v1518_v0 = vmax.f32 %v1442_v43, 0.0  ;;  %v1313_v1 = vadd.f32 %v2163_v56, %v1152_v8 }
 0x180   : > { %1680 = vst.msk [vmem:[%s2756_s21 + $0x48] sm:$0xf] %vm1661_vm1, %v1944_v3  ;;  %v1945_v62 = vpack.c.bf16 %v1520_v45, %v1520_v45 }
 0x181   : > { %1678 = vst.msk [vmem:[%s2756_s21 + $0x40] sm:$0xf] %vm1661_vm1, %v1942_v52  ;;  %v1943_v37 = vpack.c.bf16 %v1518_v0, %v1518_v0  ;;  %v2164_v54 = vpop.f32.mrb[68].mxu1  ;;  %v2232_v33 = vpop.f32.mrb[68].mxu0  ;;  %v1173_v52 = vadd.f32 %v2675_v28, %v2682_v38 }
 0x182   : > { %1681 = vst.msk [vmem:[%s2756_s21 + $0x4c] sm:$0xf] %vm1661_vm1, %v1945_v62  ;;  %v1463_v12 = vadd.f32 %v2232_v33, %v1302_v18  ;;  %v2165_v26 = vpop.f32.mrb[69].mxu1  ;;  %v1454_v53 = vpop.f32.mrb[69].mxu0 }
 0x183   : > { %1679 = vst.msk [vmem:[%s2756_s21 + $0x44] sm:$0xf] %vm1661_vm1, %v1943_v37  ;;  %v2166_v13 = vadd.f32 %v2165_v26, %v2164_v54  ;;  %v1455_v14 = vadd.f32 %v1454_v53, %v2799_v19  ;;  %v2167_v6 = vpop.f32.mrb[70].mxu1  ;;  %v2233_v21 = vpop.f32.mrb[70].mxu0  ;;  %v1176_v54 = vadd.f32 %v2677_v34, %v2682_v38 }
 0x184   : > { %v1523_v24 = vmax.f32 %v1463_v12, 0.0  ;;  %v1466_v40 = vadd.f32 %v2233_v21, %v1305_v39  ;;  %v2168_v11 = vpop.f32.mrb[71].mxu1  ;;  %v1457_v20 = vpop.f32.mrb[71].mxu0 }
 0x185   : > { %v1521_v15 = vmax.f32 %v1455_v14, 0.0  ;;  %v2169_v50 = vadd.f32 %v2168_v11, %v2167_v6  ;;  %v1458_v4 = vadd.f32 %v1457_v20, %v2801_v35  ;;  %v1318_v27 = vadd.f32 %v2166_v13, %v1157_v9 }
 0x186   : > { %v1948_v36 = vpack.c.bf16 %v1523_v24, %v1523_v24  ;;  %v1524_v19 = vmax.f32 %v1466_v40, 0.0 }
 0x187   : > { %v1946_v2 = vpack.c.bf16 %v1521_v15, %v1521_v15  ;;  %v1522_v46 = vmax.f32 %v1458_v4, 0.0  ;;  %v1321_v18 = vadd.f32 %v2169_v50, %v1160_v47 }
 0x188   : > { %1684 = vst.msk [vmem:[%s2756_s21 + $0x58] sm:$0xf] %vm1661_vm1, %v1948_v36  ;;  %v1949_v10 = vpack.c.bf16 %v1524_v19, %v1524_v19 }
 0x189   : > { %1682 = vst.msk [vmem:[%s2756_s21 + $0x50] sm:$0xf] %vm1661_vm1, %v1946_v2  ;;  %v1947_v31 = vpack.c.bf16 %v1522_v46, %v1522_v46  ;;  %v2170_v55 = vpop.f32.mrb[72].mxu1  ;;  %v2236_v48 = vpop.f32.mrb[72].mxu0 }
 0x18a   : > { %1685 = vst.msk [vmem:[%s2756_s21 + $0x5c] sm:$0xf] %vm1661_vm1, %v1949_v10  ;;  %v1479_v61 = vadd.f32 %v2236_v48, %v1318_v27  ;;  %v2171_v39 = vpop.f32.mrb[73].mxu1  ;;  %v1470_v35 = vpop.f32.mrb[73].mxu0 }
 0x18b   : > { %1683 = vst.msk [vmem:[%s2756_s21 + $0x54] sm:$0xf] %vm1661_vm1, %v1947_v31  ;;  %v2172_v17 = vadd.f32 %v2171_v39, %v2170_v55  ;;  %v1471_v29 = vadd.f32 %v1470_v35, %v1310_v60  ;;  %v2173_v41 = vpop.f32.mrb[74].mxu1  ;;  %v2237_v42 = vpop.f32.mrb[74].mxu0 }
 0x18c   : > { %v1527_v23 = vmax.f32 %v1479_v61, 0.0  ;;  %v1482_v7 = vadd.f32 %v2237_v42, %v1321_v18  ;;  %v2174_v51 = vpop.f32.mrb[75].mxu1  ;;  %v1473_v59 = vpop.f32.mrb[75].mxu0 }
 0x18d   : > { %v1525_v63 = vmax.f32 %v1471_v29, 0.0  ;;  %v2175_v5 = vadd.f32 %v2174_v51, %v2173_v41  ;;  %v1474_v8 = vadd.f32 %v1473_v59, %v1313_v1  ;;  %v1326_v16 = vadd.f32 %v2172_v17, %v1165_v44 }
 0x18e   : > { %v1952_v32 = vpack.c.bf16 %v1527_v23, %v1527_v23  ;;  %v1528_v25 = vmax.f32 %v1482_v7, 0.0 }
 0x18f   : > { %v1950_v49 = vpack.c.bf16 %v1525_v63, %v1525_v63  ;;  %v1526_v57 = vmax.f32 %v1474_v8, 0.0  ;;  %v1329_v58 = vadd.f32 %v2175_v5, %v1168_v30 }
 0x190   : > { %1688 = vst.msk [vmem:[%s2756_s21 + $0x68] sm:$0xf] %vm1661_vm1, %v1952_v32  ;;  %v1953_v56 = vpack.c.bf16 %v1528_v25, %v1528_v25 }
 0x191   : > { %1686 = vst.msk [vmem:[%s2756_s21 + $0x60] sm:$0xf] %vm1661_vm1, %v1950_v49  ;;  %v1951_v22 = vpack.c.bf16 %v1526_v57, %v1526_v57  ;;  %v2176_v43 = vpop.f32.mrb[76].mxu1  ;;  %v2240_v60 = vpop.f32.mrb[76].mxu0 }
 0x192   : > { %1689 = vst.msk [vmem:[%s2756_s21 + $0x6c] sm:$0xf] %vm1661_vm1, %v1953_v56  ;;  %v2177_v3 = vpop.f32.mrb[77].mxu1  ;;  %v1486_v45 = vpop.f32.mrb[77].mxu0 }
 0x193   : > { %1687 = vst.msk [vmem:[%s2756_s21 + $0x64] sm:$0xf] %vm1661_vm1, %v1951_v22  ;;  %v2178_v0 = vadd.f32 %v2177_v3, %v2176_v43  ;;  %v1487_v1 = vadd.f32 %v1486_v45, %v1326_v16  ;;  %v2179_v62 = vpop.f32.mrb[78].mxu1  ;;  %v2241_v37 = vpop.f32.mrb[78].mxu0 }
 0x194   : > { %v2180_v33 = vpop.f32.mrb[79].mxu1  ;;  %v1489_v12 = vpop.f32.mrb[79].mxu0 }
 0x195   : > { %v1334_v26 = vadd.f32 %v2178_v0, %v1173_v52  ;;  %v1529_v53 = vmax.f32 %v1487_v1, 0.0  ;;  %v2181_v9 = vadd.f32 %v2180_v33, %v2179_v62  ;;  %v1490_v13 = vadd.f32 %v1489_v12, %v1329_v58 }
 0x197   : > { %v1495_v28 = vadd.f32 %v2240_v60, %v1334_v26  ;;  %v1954_v14 = vpack.c.bf16 %v1529_v53, %v1529_v53  ;;  %v1337_v6 = vadd.f32 %v2181_v9, %v1176_v54  ;;  %v1530_v21 = vmax.f32 %v1490_v13, 0.0 }
 0x199   : > { %v1531_v47 = vmax.f32 %v1495_v28, 0.0  ;;  %1690 = vst.msk [vmem:[%s2756_s21 + $0x70] sm:$0xf] %vm1661_vm1, %v1954_v14  ;;  %v1498_v24 = vadd.f32 %v2241_v37, %v1337_v6  ;;  %v1955_v40 = vpack.c.bf16 %v1530_v21, %v1530_v21 }
 0x19b   : > { %v1956_v11 = vpack.c.bf16 %v1531_v47, %v1531_v47  ;;  %v1532_v34 = vmax.f32 %v1498_v24, 0.0  ;;  %1691 = vst.msk [vmem:[%s2756_s21 + $0x74] sm:$0xf] %vm1661_vm1, %v1955_v40 }
 0x19d   : > { %1692 = vst.msk [vmem:[%s2756_s21 + $0x78] sm:$0xf] %vm1661_vm1, %v1956_v11  ;;  %v1957_v38 = vpack.c.bf16 %v1532_v34, %v1532_v34 }
 0x19f   : > { %1693 = vst.msk [vmem:[%s2756_s21 + $0x7c] sm:$0xf] %vm1661_vm1, %v1957_v38 }
 0x1a0 PF: > { %s13_s12 = sadd.s32 1, %s2421_s12  }
 0x1a1   : > { %p10_p4 = scmp.ge.s32.totalorder %s13_s12, 4  }
 0x1a3   :  { %12 = sbr.rel (!%p10_p4) target bundleno = 1 (0x1), region = 62 }

// kernel: koopman_forward.9
= control target key start
LH: loop header
LB: loop body
LE: loop exit
PB: predicated region body
PF: predicated region fallthrough
CT: control target
= control target key end

     0   :  { %vm1606_vm0 = vcmask 785408   ;;  %s2620_s1 = inlined_call_operand.vmem [shape: bf16[2304,96], index: 1, kind: input, shape index: {}]   ;;  %s2621_s0 = inlined_call_operand.vmem [shape: bf16[8,2304], index: 0, kind: input, shape index: {}]   ;;  %s2622_s2 = inlined_call_operand.vmem [shape: f32[1,96], index: 2, kind: input, shape index: {}]   ;;  %s2623_s3 = inlined_call_operand.vmem [shape: f32[8,96], index: 3, kind: output, shape index: {}]  }
   0x1   :  { %v1973_v0 = vld [vmem:[%s2620_s1 + $0x40] sm:$0xff]   ;;  %v1977_v4 = vld [vmem:[%s2620_s1 + $0x48] sm:$0xff]   ;;  %v1981_v8 = vld [vmem:[%s2620_s1 + $0x50] sm:$0xff]  }
   0x2   :  { %v1974_v1 = vld [vmem:[%s2620_s1] sm:$0xff]   ;;  %1775 = vmatprep.subr.bf16.mxu0 %v1973_v0  ;;  %v1978_v5 = vld [vmem:[%s2620_s1 + $0x8] sm:$0xff]   ;;  %v1982_v9 = vld [vmem:[%s2620_s1 + $0x10] sm:$0xff]  }
   0x3   :  { %v1975_v2 = vld [vmem:[%s2620_s1 + $0xc0] sm:$0xff]   ;;  %1776 = vmatpush3.bf16.msra.mxu0 %v1974_v1  ;;  %v1979_v6 = vld [vmem:[%s2620_s1 + $0xc8] sm:$0xff]   ;;  %v1983_v10 = vld [vmem:[%s2620_s1 + $0xd0] sm:$0xff]  }
   0x4   :  { %v1976_v3 = vld [vmem:[%s2620_s1 + $0x80] sm:$0xff]   ;;  %1797 = vmatprep.subr.bf16.mxu1 %v1975_v2  ;;  %1777 = vmatprep.subr.bf16.mxu0 %v1977_v4  ;;  %v1980_v7 = vld [vmem:[%s2620_s1 + $0x88] sm:$0xff]   ;;  %v1984_v11 = vld [vmem:[%s2620_s1 + $0x90] sm:$0xff]  }
   0x5   :  { %1798 = vmatpush3.bf16.msra.mxu1 %v1976_v3  ;;  %v1985_v12 = vld [vmem:[%s2620_s1 + $0x58] sm:$0xff]   ;;  %v1989_v16 = vld [vmem:[%s2620_s1 + $0x60] sm:$0xff]   ;;  %v1993_v20 = vld [vmem:[%s2620_s1 + $0x68] sm:$0xff]  }
   0x6   :  { %1799 = vmatprep.subr.bf16.mxu1 %v1979_v6  ;;  %v1986_v13 = vld [vmem:[%s2620_s1 + $0x18] sm:$0xff]   ;;  %v1990_v17 = vld [vmem:[%s2620_s1 + $0x20] sm:$0xff]   ;;  %v1994_v21 = vld [vmem:[%s2620_s1 + $0x28] sm:$0xff]  }
   0x7   :  { %1778 = vmatpush3.bf16.msra.mxu0 %v1978_v5  ;;  %v1987_v14 = vld [vmem:[%s2620_s1 + $0xd8] sm:$0xff]   ;;  %v1991_v18 = vld [vmem:[%s2620_s1 + $0xe0] sm:$0xff]   ;;  %v1995_v22 = vld [vmem:[%s2620_s1 + $0xe8] sm:$0xff]  }
   0x8   :  { %1779 = vmatprep.subr.bf16.mxu0 %v1981_v8  ;;  %v1988_v15 = vld [vmem:[%s2620_s1 + $0x98] sm:$0xff]   ;;  %v1992_v19 = vld [vmem:[%s2620_s1 + $0xa0] sm:$0xff]   ;;  %v1996_v23 = vld [vmem:[%s2620_s1 + $0xa8] sm:$0xff]  }
   0x9   :  { %1800 = vmatpush3.bf16.msra.mxu1 %v1980_v7  ;;  %v1997_v24 = vld [vmem:[%s2620_s1 + $0x70] sm:$0xff]   ;;  %v2001_v28 = vld [vmem:[%s2620_s1 + $0x78] sm:$0xff]   ;;  %v15_v31 = vld [vmem:[%s2621_s0] sm:$0xff] }
   0xa   :  { %1801 = vmatprep.subr.bf16.mxu1 %v1983_v10  ;;  %v1998_v25 = vld [vmem:[%s2620_s1 + $0x30] sm:$0xff]   ;;  %v2002_v29 = vld [vmem:[%s2620_s1 + $0x38] sm:$0xff]   ;;  %v1613_v32 = vcombine.low %v15_v31, %v15_v31  ;;  %v1614_v33 = vcombine.high %v15_v31, %v15_v31  ;;  %v2007_v35 = vld [vmem:[%s2620_s1 + $0x140] sm:$0xff]  }
   0xb   :  { %1780 = vmatpush3.bf16.msra.mxu0 %v1982_v9  ;;  %v1999_v26 = vld [vmem:[%s2620_s1 + $0xf0] sm:$0xff]   ;;  %v2003_v30 = vld [vmem:[%s2620_s1 + $0xf8] sm:$0xff]   ;;  %v16_v36 = vld [vmem:[%s2621_s0 + $0x8] sm:$0xff] }
   0xc   :  { %1781 = vmatprep.subr.bf16.mxu0 %v1985_v12  ;;  %v2000_v27 = vld [vmem:[%s2620_s1 + $0xb0] sm:$0xff]   ;;  %v2006_v34 = vld [vmem:[%s2620_s1 + $0xb8] sm:$0xff]   ;;  %1278 = vmatprep.mubr.bf16.mxu0 %v1614_v33  ;;  %v1615_v37 = vcombine.low %v16_v36, %v16_v36  ;;  %v1616_v38 = vcombine.high %v16_v36, %v16_v36  ;;  %v2010_v39 = vld [vmem:[%s2620_s1 + $0x100] sm:$0xff]  }
   0xd   :  { %1802 = vmatpush3.bf16.msra.mxu1 %v1984_v11  ;;  %v2011_v40 = vld [vmem:[%s2620_s1 + $0x1c0] sm:$0xff]   ;;  %v2013_v42 = vld [vmem:[%s2620_s1 + $0x148] sm:$0xff]   ;;  %v2017_v46 = vld [vmem:[%s2620_s1 + $0x150] sm:$0xff]  }
   0xe   :  { %1803 = vmatprep.subr.bf16.mxu1 %v1987_v14  ;;  %1318 = vmatprep.mubr.bf16.mxu1 %v1616_v38  ;;  %v2012_v41 = vld [vmem:[%s2620_s1 + $0x180] sm:$0xff]   ;;  %v2014_v43 = vld [vmem:[%s2620_s1 + $0x108] sm:$0xff]   ;;  %v2018_v47 = vld [vmem:[%s2620_s1 + $0x110] sm:$0xff]  }
   0xf   :  { %1782 = vmatpush3.bf16.msra.mxu0 %v1986_v13  ;;  %v2015_v44 = vld [vmem:[%s2620_s1 + $0x1c8] sm:$0xff]   ;;  %v2019_v48 = vld [vmem:[%s2620_s1 + $0x1d0] sm:$0xff]   ;;  %v2021_v50 = vld [vmem:[%s2620_s1 + $0x158] sm:$0xff]  }
  0x10   :  { %1783 = vmatprep.subr.bf16.mxu0 %v1989_v16  ;;  %v2016_v45 = vld [vmem:[%s2620_s1 + $0x188] sm:$0xff]   ;;  %v2020_v49 = vld [vmem:[%s2620_s1 + $0x190] sm:$0xff]   ;;  %v2022_v51 = vld [vmem:[%s2620_s1 + $0x118] sm:$0xff]  }
  0x11   :  { %1804 = vmatpush3.bf16.msra.mxu1 %v1988_v15  ;;  %v2023_v52 = vld [vmem:[%s2620_s1 + $0x1d8] sm:$0xff]   ;;  %v2025_v54 = vld [vmem:[%s2620_s1 + $0x160] sm:$0xff]   ;;  %v2029_v58 = vld [vmem:[%s2620_s1 + $0x168] sm:$0xff]  }
  0x12   :  { %1805 = vmatprep.subr.bf16.mxu1 %v1991_v18  ;;  %v2024_v53 = vld [vmem:[%s2620_s1 + $0x198] sm:$0xff]   ;;  %v2026_v55 = vld [vmem:[%s2620_s1 + $0x120] sm:$0xff]   ;;  %v2030_v59 = vld [vmem:[%s2620_s1 + $0x128] sm:$0xff]  }
  0x13   :  { %1784 = vmatpush3.bf16.msra.mxu0 %v1990_v17  ;;  %v2027_v56 = vld [vmem:[%s2620_s1 + $0x1e0] sm:$0xff]   ;;  %v2031_v60 = vld [vmem:[%s2620_s1 + $0x1e8] sm:$0xff]   ;;  %v2033_v62 = vld [vmem:[%s2620_s1 + $0x170] sm:$0xff]  }
  0x14   :  { %1785 = vmatprep.subr.bf16.mxu0 %v1993_v20  ;;  %v2028_v57 = vld [vmem:[%s2620_s1 + $0x1a0] sm:$0xff]   ;;  %v2032_v61 = vld [vmem:[%s2620_s1 + $0x1a8] sm:$0xff]   ;;  %v2034_v63 = vld [vmem:[%s2620_s1 + $0x130] sm:$0xff]  }
  0x15   :  { %1806 = vmatpush3.bf16.msra.mxu1 %v1992_v19  ;;  %v2035_v0 = vld [vmem:[%s2620_s1 + $0x1f0] sm:$0xff]   ;;  %v2037_v2 = vld [vmem:[%s2620_s1 + $0x178] sm:$0xff]   ;;  %v2043_v9 = vld [vmem:[%s2620_s1 + $0x240] sm:$0xff]  }
  0x16   :  { %1807 = vmatprep.subr.bf16.mxu1 %v1995_v22  ;;  %v2036_v1 = vld [vmem:[%s2620_s1 + $0x1b0] sm:$0xff]   ;;  %v2038_v3 = vld [vmem:[%s2620_s1 + $0x138] sm:$0xff]   ;;  %v2046_v13 = vld [vmem:[%s2620_s1 + $0x200] sm:$0xff]  }
  0x17   :  { %1786 = vmatpush3.bf16.msra.mxu0 %v1994_v21  ;;  %v2039_v4 = vld [vmem:[%s2620_s1 + $0x1f8] sm:$0xff]   ;;  %v17_v5 = vld [vmem:[%s2621_s0 + $0x10] sm:$0xff]  ;;  %v2047_v14 = vld [vmem:[%s2620_s1 + $0x2c0] sm:$0xff]  }
  0x18   :  { %1787 = vmatprep.subr.bf16.mxu0 %v1997_v24  ;;  %v1617_v6 = vcombine.low %v17_v5, %v17_v5  ;;  %v1618_v7 = vcombine.high %v17_v5, %v17_v5  ;;  %v2042_v8 = vld [vmem:[%s2620_s1 + $0x1b8] sm:$0xff]   ;;  %v2048_v15 = vld [vmem:[%s2620_s1 + $0x280] sm:$0xff]   ;;  %v2049_v16 = vld [vmem:[%s2620_s1 + $0x248] sm:$0xff]  }
  0x19   :  { %1808 = vmatpush3.bf16.msra.mxu1 %v1996_v23  ;;  %v18_v10 = vld [vmem:[%s2621_s0 + $0x18] sm:$0xff]  ;;  %v2050_v17 = vld [vmem:[%s2620_s1 + $0x208] sm:$0xff]   ;;  %v2053_v20 = vld [vmem:[%s2620_s1 + $0x250] sm:$0xff]  }
  0x1a   :  { %1809 = vmatprep.subr.bf16.mxu1 %v1999_v26  ;;  %v1619_v11 = vcombine.low %v18_v10, %v18_v10  ;;  %v1620_v12 = vcombine.high %v18_v10, %v18_v10  ;;  %v2051_v18 = vld [vmem:[%s2620_s1 + $0x2c8] sm:$0xff]   ;;  %v2054_v21 = vld [vmem:[%s2620_s1 + $0x210] sm:$0xff]   ;;  %v2057_v24 = vld [vmem:[%s2620_s1 + $0x258] sm:$0xff]  }
  0x1b   :  { %1788 = vmatpush3.bf16.msra.mxu0 %v1998_v25  ;;  %v2052_v19 = vld [vmem:[%s2620_s1 + $0x288] sm:$0xff]   ;;  %v2055_v22 = vld [vmem:[%s2620_s1 + $0x2d0] sm:$0xff]   ;;  %v2058_v25 = vld [vmem:[%s2620_s1 + $0x218] sm:$0xff]  }
  0x1c   :  { %1789 = vmatprep.subr.bf16.mxu0 %v2001_v28  ;;  %v2056_v23 = vld [vmem:[%s2620_s1 + $0x290] sm:$0xff]   ;;  %v2059_v26 = vld [vmem:[%s2620_s1 + $0x2d8] sm:$0xff]   ;;  %v2061_v28 = vld [vmem:[%s2620_s1 + $0x260] sm:$0xff]  }
  0x1d   :  { %1810 = vmatpush3.bf16.msra.mxu1 %v2000_v27  ;;  %v2060_v27 = vld [vmem:[%s2620_s1 + $0x298] sm:$0xff]   ;;  %v2064_v31 = vld [vmem:[%s2620_s1 + $0x2a0] sm:$0xff]   ;;  %v2066_v33 = vld [vmem:[%s2620_s1 + $0x228] sm:$0xff]  }
  0x1e   :  { %1811 = vmatprep.subr.bf16.mxu1 %v2003_v30  ;;  %v2063_v30 = vld [vmem:[%s2620_s1 + $0x2e0] sm:$0xff]   ;;  %v2069_v36 = vld [vmem:[%s2620_s1 + $0x270] sm:$0xff]  }
  0x1f   :  { %1790 = vmatpush3.bf16.msra.mxu0 %v2002_v29  ;;  %v2062_v29 = vld [vmem:[%s2620_s1 + $0x220] sm:$0xff]   ;;  %v2071_v38 = vld [vmem:[%s2620_s1 + $0x2f0] sm:$0xff]  }
  0x20   :  { %1819 = vmatprep.subr.bf16.mxu0 %v2007_v35  ;;  %v2068_v35 = vld [vmem:[%s2620_s1 + $0x2a8] sm:$0xff]   ;;  %v2100_v5 = vld [vmem:[%s2620_s1 + $0x3a0] sm:$0xff]   ;;  %v2105_v10 = vld [vmem:[%s2620_s1 + $0x370] sm:$0xff]  }
  0x21   :  { %1812 = vmatpush3.bf16.msra.mxu1 %v2006_v34  ;;  %v2067_v34 = vld [vmem:[%s2620_s1 + $0x2e8] sm:$0xff]  }
  0x22   :  { %1279 = vmatmul.mubr.bf16.vlgmr.msra.gmra.mrb[0].mxu0 %v1613_v32  ;;  %1841 = vmatprep.subr.bf16.mxu1 %v2011_v40  ;;  %v2065_v32 = vld [vmem:[%s2620_s1 + $0x268] sm:$0xff]   ;;  %v2073_v40 = vld [vmem:[%s2620_s1 + $0x278] sm:$0xff]  }
  0x23   :  { %1820 = vmatpush3.bf16.msra.mxu0 %v2010_v39  ;;  %1358 = vmatprep.mubr.bf16.mxu0 %v1618_v7  ;;  %v2072_v39 = vld [vmem:[%s2620_s1 + $0x2b0] sm:$0xff]   ;;  %v2102_v7 = vld [vmem:[%s2620_s1 + $0x328] sm:$0xff]  }
  0x24   :  { %1319 = vmatmul.mubr.bf16.vlgmr.msra.gmra.mrb[0].mxu1 %v1615_v37  ;;  %1821 = vmatprep.subr.bf16.mxu0 %v2013_v42  ;;  %v2070_v37 = vld [vmem:[%s2620_s1 + $0x230] sm:$0xff]   ;;  %v2075_v42 = vld [vmem:[%s2620_s1 + $0x2f8] sm:$0xff]  }
  0x25   :  { %1842 = vmatpush3.bf16.msra.mxu1 %v2012_v41  ;;  %1398 = vmatprep.mubr.bf16.mxu1 %v1620_v12  ;;  %v2074_v41 = vld [vmem:[%s2620_s1 + $0x238] sm:$0xff]   ;;  %v2107_v12 = vld [vmem:[%s2620_s1 + $0x3f0] sm:$0xff]  }
  0x26   :  { %1843 = vmatprep.subr.bf16.mxu1 %v2015_v44 }
  0x27   :  { %1822 = vmatpush3.bf16.msra.mxu0 %v2014_v43  ;;  %v19_v43 = vld [vmem:[%s2621_s0 + $0x20] sm:$0xff] }
  0x28   :  { %1823 = vmatprep.subr.bf16.mxu0 %v2017_v46  ;;  %v1621_v44 = vcombine.low %v19_v43, %v19_v43  ;;  %v2078_v46 = vld [vmem:[%s2620_s1 + $0x2b8] sm:$0xff]  }
  0x29   :  { %1844 = vmatpush3.bf16.msra.mxu1 %v2016_v45  ;;  %v1622_v45 = vcombine.high %v19_v43, %v19_v43 }
  0x2a   :  { %1845 = vmatprep.subr.bf16.mxu1 %v2019_v48  ;;  %v20_v48 = vld [vmem:[%s2621_s0 + $0x28] sm:$0xff] }
  0x2b   :  { %1824 = vmatpush3.bf16.msra.mxu0 %v2018_v47  ;;  %v2079_v47 = vld [vmem:[%s2620_s1 + $0x340] sm:$0xff]  }
  0x2c   :  { %1825 = vmatprep.subr.bf16.mxu0 %v2021_v50  ;;  %v1624_v50 = vcombine.high %v20_v48, %v20_v48 }
  0x2d   :  { %1846 = vmatpush3.bf16.msra.mxu1 %v2020_v49  ;;  %v1623_v49 = vcombine.low %v20_v48, %v20_v48 }
  0x2e   :  { %1847 = vmatprep.subr.bf16.mxu1 %v2023_v52  ;;  %v2083_v52 = vld [vmem:[%s2620_s1 + $0x3c0] sm:$0xff]  }
  0x2f   :  { %1826 = vmatpush3.bf16.msra.mxu0 %v2022_v51  ;;  %v2082_v51 = vld [vmem:[%s2620_s1 + $0x300] sm:$0xff]  }
  0x30   :  { %1827 = vmatprep.subr.bf16.mxu0 %v2025_v54  ;;  %v2085_v54 = vld [vmem:[%s2620_s1 + $0x348] sm:$0xff]  }
  0x31   :  { %1848 = vmatpush3.bf16.msra.mxu1 %v2024_v53  ;;  %v2084_v53 = vld [vmem:[%s2620_s1 + $0x380] sm:$0xff]  }
  0x32   :  { %1849 = vmatprep.subr.bf16.mxu1 %v2027_v56  ;;  %v2087_v56 = vld [vmem:[%s2620_s1 + $0x3c8] sm:$0xff]  }
  0x33   :  { %1828 = vmatpush3.bf16.msra.mxu0 %v2026_v55  ;;  %v2086_v55 = vld [vmem:[%s2620_s1 + $0x308] sm:$0xff]  }
  0x34   :  { %1829 = vmatprep.subr.bf16.mxu0 %v2029_v58  ;;  %v2089_v58 = vld [vmem:[%s2620_s1 + $0x350] sm:$0xff]  }
  0x35   :  { %1850 = vmatpush3.bf16.msra.mxu1 %v2028_v57  ;;  %v2088_v57 = vld [vmem:[%s2620_s1 + $0x388] sm:$0xff]  }
  0x36   :  { %1851 = vmatprep.subr.bf16.mxu1 %v2031_v60  ;;  %v2091_v60 = vld [vmem:[%s2620_s1 + $0x3d0] sm:$0xff]  }
  0x37   :  { %1830 = vmatpush3.bf16.msra.mxu0 %v2030_v59  ;;  %v2090_v59 = vld [vmem:[%s2620_s1 + $0x310] sm:$0xff]  }
  0x38   :  { %1831 = vmatprep.subr.bf16.mxu0 %v2033_v62  ;;  %v2093_v62 = vld [vmem:[%s2620_s1 + $0x358] sm:$0xff]  }
  0x39   :  { %1852 = vmatpush3.bf16.msra.mxu1 %v2032_v61  ;;  %v2092_v61 = vld [vmem:[%s2620_s1 + $0x390] sm:$0xff]  }
  0x3a   :  { %1853 = vmatprep.subr.bf16.mxu1 %v2035_v0  ;;  %v2095_v0 = vld [vmem:[%s2620_s1 + $0x3d8] sm:$0xff]  }
  0x3b   :  { %1832 = vmatpush3.bf16.msra.mxu0 %v2034_v63  ;;  %v2094_v63 = vld [vmem:[%s2620_s1 + $0x318] sm:$0xff]  }
  0x3c   :  { %1833 = vmatprep.subr.bf16.mxu0 %v2037_v2  ;;  %v2097_v2 = vld [vmem:[%s2620_s1 + $0x360] sm:$0xff]  }
  0x3d   :  { %1854 = vmatpush3.bf16.msra.mxu1 %v2036_v1  ;;  %v2096_v1 = vld [vmem:[%s2620_s1 + $0x398] sm:$0xff]  }
  0x3e   :  { %1855 = vmatprep.subr.bf16.mxu1 %v2039_v4  ;;  %v2099_v4 = vld [vmem:[%s2620_s1 + $0x3e0] sm:$0xff]  }
  0x3f   :  { %1834 = vmatpush3.bf16.msra.mxu0 %v2038_v3  ;;  %v2098_v3 = vld [vmem:[%s2620_s1 + $0x320] sm:$0xff]  }
  0x40   :  { %1863 = vmatprep.subr.bf16.mxu0 %v2043_v9  ;;  %v2104_v9 = vld [vmem:[%s2620_s1 + $0x3a8] sm:$0xff]  }
  0x41   :  { %1856 = vmatpush3.bf16.msra.mxu1 %v2042_v8  ;;  %v2103_v8 = vld [vmem:[%s2620_s1 + $0x3e8] sm:$0xff]  }
  0x42   :  { %1359 = vmatmul.mubr.bf16.vlgmr.msra.gmra.mrb[4].mxu0 %v1617_v6  ;;  %1885 = vmatprep.subr.bf16.mxu1 %v2047_v14  ;;  %v2101_v6 = vld [vmem:[%s2620_s1 + $0x368] sm:$0xff]   ;;  %v2109_v14 = vld [vmem:[%s2620_s1 + $0x378] sm:$0xff]  }
  0x43   :  { %1864 = vmatpush3.bf16.msra.mxu0 %v2046_v13  ;;  %1438 = vmatprep.mubr.bf16.mxu0 %v1622_v45  ;;  %v2108_v13 = vld [vmem:[%s2620_s1 + $0x3b0] sm:$0xff]  }
  0x44   :  { %1399 = vmatmul.mubr.bf16.vlgmr.msra.gmra.mrb[4].mxu1 %v1619_v11  ;;  %1865 = vmatprep.subr.bf16.mxu0 %v2049_v16  ;;  %v2106_v11 = vld [vmem:[%s2620_s1 + $0x330] sm:$0xff]   ;;  %v2111_v16 = vld [vmem:[%s2620_s1 + $0x3f8] sm:$0xff]  }
  0x45   :  { %1886 = vmatpush3.bf16.msra.mxu1 %v2048_v15  ;;  %1478 = vmatprep.mubr.bf16.mxu1 %v1624_v50  ;;  %v2110_v15 = vld [vmem:[%s2620_s1 + $0x338] sm:$0xff]  }
  0x46   :  { %1887 = vmatprep.subr.bf16.mxu1 %v2051_v18 }
  0x47   :  { %1866 = vmatpush3.bf16.msra.mxu0 %v2050_v17  ;;  %v21_v17 = vld [vmem:[%s2621_s0 + $0x30] sm:$0xff] }
  0x48   :  { %1867 = vmatprep.subr.bf16.mxu0 %v2053_v20  ;;  %v1625_v18 = vcombine.low %v21_v17, %v21_v17  ;;  %v2114_v20 = vld [vmem:[%s2620_s1 + $0x3b8] sm:$0xff]  }
  0x49   :  { %1888 = vmatpush3.bf16.msra.mxu1 %v2052_v19  ;;  %v1626_v19 = vcombine.high %v21_v17, %v21_v17 }
  0x4a   :  { %1889 = vmatprep.subr.bf16.mxu1 %v2055_v22  ;;  %v22_v22 = vld [vmem:[%s2621_s0 + $0x38] sm:$0xff] }
  0x4b   :  { %1868 = vmatpush3.bf16.msra.mxu0 %v2054_v21  ;;  %v2115_v21 = vld [vmem:[%s2620_s1 + $0x440] sm:$0xff]  }
  0x4c   :  { %1869 = vmatprep.subr.bf16.mxu0 %v2057_v24  ;;  %v1628_v24 = vcombine.high %v22_v22, %v22_v22 }
  0x4d   :  { %1890 = vmatpush3.bf16.msra.mxu1 %v2056_v23  ;;  %v1627_v23 = vcombine.low %v22_v22, %v22_v22 }
  0x4e   :  { %1891 = vmatprep.subr.bf16.mxu1 %v2059_v26  ;;  %v2119_v26 = vld [vmem:[%s2620_s1 + $0x448] sm:$0xff]  }
  0x4f   :  { %1870 = vmatpush3.bf16.msra.mxu0 %v2058_v25  ;;  %v2118_v25 = vld [vmem:[%s2620_s1 + $0x400] sm:$0xff]  }
  0x50   :  { %1871 = vmatprep.subr.bf16.mxu0 %v2061_v28  ;;  %v2121_v28 = vld [vmem:[%s2620_s1 + $0x450] sm:$0xff]  }
  0x51   :  { %1892 = vmatpush3.bf16.msra.mxu1 %v2060_v27  ;;  %v2120_v27 = vld [vmem:[%s2620_s1 + $0x408] sm:$0xff]  }
  0x52   :  { %1893 = vmatprep.subr.bf16.mxu1 %v2063_v30  ;;  %v2123_v30 = vld [vmem:[%s2620_s1 + $0x458] sm:$0xff]  }
  0x53   :  { %1872 = vmatpush3.bf16.msra.mxu0 %v2062_v29  ;;  %v2122_v29 = vld [vmem:[%s2620_s1 + $0x410] sm:$0xff]  }
  0x54   :  { %1873 = vmatprep.subr.bf16.mxu0 %v2065_v32  ;;  %v2125_v32 = vld [vmem:[%s2620_s1 + $0x460] sm:$0xff]  }
  0x55   :  { %1894 = vmatpush3.bf16.msra.mxu1 %v2064_v31  ;;  %v2124_v31 = vld [vmem:[%s2620_s1 + $0x418] sm:$0xff]  }
  0x56   :  { %1895 = vmatprep.subr.bf16.mxu1 %v2067_v34  ;;  %v23_v34 = vld [vmem:[%s2621_s0 + $0x40] sm:$0xff] }
  0x57   :  { %1874 = vmatpush3.bf16.msra.mxu0 %v2066_v33  ;;  %v2126_v33 = vld [vmem:[%s2620_s1 + $0x420] sm:$0xff]  }
  0x58   :  { %1875 = vmatprep.subr.bf16.mxu0 %v2069_v36  ;;  %v1630_v36 = vcombine.high %v23_v34, %v23_v34 }
  0x59   :  { %1896 = vmatpush3.bf16.msra.mxu1 %v2068_v35  ;;  %v2127_v35 = vld [vmem:[%s2620_s1 + $0x468] sm:$0xff]  }
  0x5a   :  { %1897 = vmatprep.subr.bf16.mxu1 %v2071_v38  ;;  %v2129_v38 = vld [vmem:[%s2620_s1 + $0x470] sm:$0xff]  }
  0x5b   :  { %1876 = vmatpush3.bf16.msra.mxu0 %v2070_v37  ;;  %v2128_v37 = vld [vmem:[%s2620_s1 + $0x428] sm:$0xff]  }
  0x5c   :  { %1877 = vmatprep.subr.bf16.mxu0 %v2073_v40  ;;  %v2131_v40 = vld [vmem:[%s2620_s1 + $0x478] sm:$0xff]  }
  0x5d   :  { %1898 = vmatpush3.bf16.msra.mxu1 %v2072_v39  ;;  %v2130_v39 = vld [vmem:[%s2620_s1 + $0x430] sm:$0xff]  }
  0x5e   :  { %1899 = vmatprep.subr.bf16.mxu1 %v2075_v42  ;;  %v1629_v42 = vcombine.low %v23_v34, %v23_v34 }
  0x5f   :  { %1878 = vmatpush3.bf16.msra.mxu0 %v2074_v41  ;;  %v2132_v41 = vld [vmem:[%s2620_s1 + $0x438] sm:$0xff]  }
  0x60   :  { %1907 = vmatprep.subr.bf16.mxu0 %v2079_v47 }
  0x61   :  { %1900 = vmatpush3.bf16.msra.mxu1 %v2078_v46 }
  0x62   :  { %1439 = vmatmul.mubr.bf16.vlgmr.msra.gmra.mrb[8].mxu0 %v1621_v44  ;;  %1929 = vmatprep.subr.bf16.mxu1 %v2083_v52  ;;  %v1612_v44 = vld [vmem:[%s2622_s2] ss:$0 sm:$0xff] }
  0x63   :  { %1908 = vmatpush3.bf16.msra.mxu0 %v2082_v51  ;;  %1518 = vmatprep.mubr.bf16.mxu0 %v1626_v19 }
  0x64   :  { %1479 = vmatmul.mubr.bf16.vlgmr.msra.gmra.mrb[8].mxu1 %v1623_v49  ;;  %1909 = vmatprep.subr.bf16.mxu0 %v2085_v54 }
  0x65   :  { %1930 = vmatpush3.bf16.msra.mxu1 %v2084_v53  ;;  %1558 = vmatprep.mubr.bf16.mxu1 %v1628_v24 }
  0x66   :  { %1931 = vmatprep.subr.bf16.mxu1 %v2087_v56 }
  0x67   :  { %1910 = vmatpush3.bf16.msra.mxu0 %v2086_v55 }
  0x68   :  { %1911 = vmatprep.subr.bf16.mxu0 %v2089_v58 }
  0x69   :  { %1932 = vmatpush3.bf16.msra.mxu1 %v2088_v57 }
  0x6a   :  { %1933 = vmatprep.subr.bf16.mxu1 %v2091_v60 }
  0x6b   :  { %1912 = vmatpush3.bf16.msra.mxu0 %v2090_v59 }
  0x6c   :  { %1913 = vmatprep.subr.bf16.mxu0 %v2093_v62 }
  0x6d   :  { %1934 = vmatpush3.bf16.msra.mxu1 %v2092_v61 }
  0x6e   :  { %1935 = vmatprep.subr.bf16.mxu1 %v2095_v0 }
  0x6f   :  { %1914 = vmatpush3.bf16.msra.mxu0 %v2094_v63 }
  0x70   :  { %1915 = vmatprep.subr.bf16.mxu0 %v2097_v2 }
  0x71   :  { %1936 = vmatpush3.bf16.msra.mxu1 %v2096_v1 }
  0x72   :  { %1937 = vmatprep.subr.bf16.mxu1 %v2099_v4 }
  0x73   :  { %1916 = vmatpush3.bf16.msra.mxu0 %v2098_v3 }
  0x74   :  { %1917 = vmatprep.subr.bf16.mxu0 %v2101_v6 }
  0x75   :  { %1938 = vmatpush3.bf16.msra.mxu1 %v2100_v5 }
  0x76   :  { %1939 = vmatprep.subr.bf16.mxu1 %v2103_v8 }
  0x77   :  { %1918 = vmatpush3.bf16.msra.mxu0 %v2102_v7 }
  0x78   :  { %1919 = vmatprep.subr.bf16.mxu0 %v2105_v10 }
  0x79   :  { %1940 = vmatpush3.bf16.msra.mxu1 %v2104_v9 }
  0x7a   :  { %1941 = vmatprep.subr.bf16.mxu1 %v2107_v12 }
  0x7b   :  { %1920 = vmatpush3.bf16.msra.mxu0 %v2106_v11 }
  0x7c   :  { %1921 = vmatprep.subr.bf16.mxu0 %v2109_v14 }
  0x7d   :  { %1942 = vmatpush3.bf16.msra.mxu1 %v2108_v13 }
  0x7e   :  { %1943 = vmatprep.subr.bf16.mxu1 %v2111_v16 }
  0x7f   :  { %1922 = vmatpush3.bf16.msra.mxu0 %v2110_v15 }
  0x80   :  { %1951 = vmatprep.subr.bf16.mxu0 %v2115_v21 }
  0x81   :  { %1944 = vmatpush3.bf16.msra.mxu1 %v2114_v20 }
  0x82   :  { %1519 = vmatmul.mubr.bf16.vlgmr.msra.gmra.mrb[12].mxu0 %v1625_v18 }
  0x83   :  { %1952 = vmatpush3.bf16.msra.mxu0 %v2118_v25  ;;  %1598 = vmatprep.mubr.bf16.mxu0 %v1630_v36 }
  0x84   :  { %1559 = vmatmul.mubr.bf16.vlgmr.msra.gmra.mrb[12].mxu1 %v1627_v23  ;;  %1953 = vmatprep.subr.bf16.mxu0 %v2119_v26 }
  0x87   :  { %1954 = vmatpush3.bf16.msra.mxu0 %v2120_v27 }
  0x88   :  { %1955 = vmatprep.subr.bf16.mxu0 %v2121_v28 }
  0x8b   :  { %1956 = vmatpush3.bf16.msra.mxu0 %v2122_v29 }
  0x8c   :  { %1957 = vmatprep.subr.bf16.mxu0 %v2123_v30 }
  0x8f   :  { %1958 = vmatpush3.bf16.msra.mxu0 %v2124_v31 }
  0x90   :  { %1959 = vmatprep.subr.bf16.mxu0 %v2125_v32 }
  0x93   :  { %1960 = vmatpush3.bf16.msra.mxu0 %v2126_v33 }
  0x94   :  { %1961 = vmatprep.subr.bf16.mxu0 %v2127_v35 }
  0x97   :  { %1962 = vmatpush3.bf16.msra.mxu0 %v2128_v37 }
  0x98   :  { %1963 = vmatprep.subr.bf16.mxu0 %v2129_v38 }
  0x9b   :  { %1964 = vmatpush3.bf16.msra.mxu0 %v2130_v39 }
  0x9c   :  { %1965 = vmatprep.subr.bf16.mxu0 %v2131_v40 }
  0x9f   :  { %1966 = vmatpush3.bf16.msra.mxu0 %v2132_v41 }
  0xa2   :  { %1599 = vmatmul.mubr.bf16.vlgmr.msra.gmra.mrb[16].mxu0 %v1629_v42 }
  0xf5   :  { %v1791_v43 = vpop.f32.mrb[0].mxu0 }
  0xf6   :  { %v1792_v45 = vpop.f32.mrb[1].mxu0 }
  0xf7   :  { %v1793_v46 = vadd.f32 %v1792_v45, %v1791_v43  ;;  %v1794_v47 = vpop.f32.mrb[2].mxu0  ;;  %v1813_v48 = vpop.f32.mrb[0].mxu1 }
  0xf8   :  { %v1795_v49 = vpop.f32.mrb[3].mxu0  ;;  %v1814_v50 = vpop.f32.mrb[1].mxu1 }
  0xf9   :  { %v1281_v51 = vadd.f32 %v1793_v46, %v1612_v44  ;;  %v1815_v52 = vadd.f32 %v1814_v50, %v1813_v48  ;;  %v1816_v53 = vpop.f32.mrb[2].mxu1 }
  0xfa   :  { %v1817_v54 = vpop.f32.mrb[3].mxu1 }
  0xfb   :  { %v1321_v55 = vadd.f32 %v1815_v52, %v1281_v51 }
 0x115   :  { %v1835_v56 = vpop.f32.mrb[4].mxu0 }
 0x116   :  { %v1836_v57 = vpop.f32.mrb[5].mxu0 }
 0x117   :  { %v1837_v58 = vadd.f32 %v1836_v57, %v1835_v56  ;;  %v1838_v59 = vpop.f32.mrb[6].mxu0  ;;  %v1857_v60 = vpop.f32.mrb[4].mxu1 }
 0x118   :  { %v1839_v61 = vpop.f32.mrb[7].mxu0  ;;  %v1858_v63 = vpop.f32.mrb[5].mxu1 }
 0x119   :  { %v1361_v62 = vadd.f32 %v1837_v58, %v1321_v55  ;;  %v1859_v0 = vadd.f32 %v1858_v63, %v1857_v60  ;;  %v1860_v1 = vpop.f32.mrb[6].mxu1 }
 0x11a   :  { %v1861_v2 = vpop.f32.mrb[7].mxu1 }
 0x11b   :  { %v1401_v3 = vadd.f32 %v1859_v0, %v1361_v62 }
 0x135   :  { %v1879_v4 = vpop.f32.mrb[8].mxu0 }
 0x136   :  { %v1880_v5 = vpop.f32.mrb[9].mxu0 }
 0x137   :  { %v1881_v6 = vadd.f32 %v1880_v5, %v1879_v4  ;;  %v1882_v7 = vpop.f32.mrb[10].mxu0  ;;  %v1901_v8 = vpop.f32.mrb[8].mxu1 }
 0x138   :  { %v1883_v9 = vpop.f32.mrb[11].mxu0  ;;  %v1902_v10 = vpop.f32.mrb[9].mxu1 }
 0x139   :  { %v1441_v11 = vadd.f32 %v1881_v6, %v1401_v3  ;;  %v1903_v12 = vadd.f32 %v1902_v10, %v1901_v8  ;;  %v1904_v13 = vpop.f32.mrb[10].mxu1 }
 0x13a   :  { %v1905_v14 = vpop.f32.mrb[11].mxu1 }
 0x13b   :  { %v1481_v15 = vadd.f32 %v1903_v12, %v1441_v11 }
 0x155   :  { %v1923_v16 = vpop.f32.mrb[12].mxu0 }
 0x156   :  { %v1924_v17 = vpop.f32.mrb[13].mxu0 }
 0x157   :  { %v1925_v18 = vadd.f32 %v1924_v17, %v1923_v16  ;;  %v1926_v19 = vpop.f32.mrb[14].mxu0  ;;  %v1945_v20 = vpop.f32.mrb[12].mxu1 }
 0x158   :  { %v1927_v21 = vpop.f32.mrb[15].mxu0  ;;  %v1946_v22 = vpop.f32.mrb[13].mxu1 }
 0x159   :  { %v1521_v23 = vadd.f32 %v1925_v18, %v1481_v15  ;;  %v1947_v24 = vadd.f32 %v1946_v22, %v1945_v20  ;;  %v1948_v25 = vpop.f32.mrb[14].mxu1 }
 0x15a   :  { %v1949_v26 = vpop.f32.mrb[15].mxu1 }
 0x15b   :  { %v1561_v27 = vadd.f32 %v1947_v24, %v1521_v23 }
 0x175   :  { %v1967_v28 = vpop.f32.mrb[16].mxu0 }
 0x176   :  { %v1968_v29 = vpop.f32.mrb[17].mxu0 }
 0x177   :  { %v1969_v30 = vadd.f32 %v1968_v29, %v1967_v28  ;;  %v1970_v31 = vpop.f32.mrb[18].mxu0 }
 0x178   :  { %v1971_v32 = vpop.f32.mrb[19].mxu0 }
 0x179   :  { %v1601_v33 = vadd.f32 %v1969_v30, %v1561_v27 }
 0x17b   :  { %1607 = vst.msk [vmem:[%s2623_s3] sm:$0xff] %vm1606_vm0, %v1601_v33 }

// kernel: koopman_forward.10
= control target key start
LH: loop header
LB: loop body
LE: loop exit
PB: predicated region body
PF: predicated region fallthrough
CT: control target
= control target key end

     0   :  { %s268_s27 = smov 0   ;;  %s288_s0 = inlined_call_operand.vmem [shape: f32[4,2,96], index: 0, kind: input, shape index: {}]   ;;  %s289_s1 = inlined_call_operand.vmem [shape: bf16[32,96], index: 1, kind: input, shape index: {}]   ;;  %s290_s2 = inlined_call_operand.vmem [shape: f32[1,96], index: 2, kind: input, shape index: {}]   ;;  %s291_s3 = inlined_call_operand.vmem [shape: f32[2,32], index: 3, kind: input, shape index: {}]   ;;  %s292_s4 = inlined_call_operand.vmem [shape: f32[4,2,32], index: 4, kind: output, shape index: {}]  }
   0x1   :  { %v243_v0 = vld [vmem:[%s289_s1] sm:$0xf]  ;;  %v248_v1 = vld [vmem:[%s289_s1 + $0x4] sm:$0xf]  ;;  %v253_v2 = vld [vmem:[%s289_s1 + $0x8] sm:$0xf] }
   0x2   :  { %v258_v3 = vld [vmem:[%s289_s1 + $0xc] sm:$0xf]  ;;  %v263_v4 = vld [vmem:[%s290_s2] ss:$0 sm:$0xff] }
   0x3   :  { %v23_v5 = vld [vmem:[%s291_s3] sm:$0x3]  }
   0x4   :  { %v202_v6 = vmov %v23_v5  }
   0x5 LB: > { %v152_v7 = vcombine.low %v243_v0, %v248_v1  ;;  %v210_v8 = vmov 0.0   ;;  %vm211_vm0 = vmmov 0   ;;  %v153_v9 = vcombine.low %v253_v2, %v258_v3  ;;  %s212_s1 = smov 64   ;;  %s150_s2 = sshll.u32 %s208_s27, 1  ;;  %s208_s27 = sphi %s268_s27, %s29_s27   ;;  %v204_v6 = vphi %v202_v6, %v129_v6  }
   0x6   : > { %159 = vmatprep.subr.bf16.mxu0 %v210_v8  ;;  %163 = vmatprep.mubr.msk.bf16.mxu0 %vm211_vm0, %v210_v8  ;;  %v34_v10 = vpack.c.bf16 %v204_v6, %v204_v6  ;;  %vm53_vm1 = vcmask 261120   ;;  %s32_s29 = scalar_lea.vmem %s288_s0, %s150_s2  ;;  %s213_s30 = smov 96   ;;  %vm132_vm2 = vcmask 254976  }
   0x7   : > { %160 = vmatpush3.bf16.msra.mxu0 %v152_v7  ;;  %v33_v16 = vld [vmem:[%s32_s29] sm:$0x3]  ;;  %s214_s5 = smov 32   ;;  %s131_s8 = scalar_lea.vmem %s292_s4, %s150_s2 }
   0x8   : > { %161 = vmatprep.subr.bf16.mxu0 %v210_v8  ;;  %s29_s27 = sadd.s32 1, %s208_s27  }
   0x9   : > { %p26_p0 = scmp.ge.s32.totalorder %s29_s27, 4  }
   0xb   : > { %162 = vmatpush3.bf16.msra.mxu0 %v153_v9 }
   0xe   : > { %164 = vmatmul.mubr.msk.bf16.vlgmr.msra.gmra.mrb[0].mxu0 %vm53_vm1, %v34_v10 }
  0xe1   : > { %v91_v11 = vpop.f32.mrb[0].mxu0 }
  0xe2   : > { %v92_v12 = vadd.f32 %v263_v4, %v91_v11  ;;  %v165_v13 = vpop.f32.mrb[1].mxu0 }
  0xe3   : > { %v94_v14 = vpop.f32.mrb[2].mxu0 }
  0xe4   : > { %105 = vrot.lane.b32.xlu0 %v92_v12, %s212_s1  ;;  %v166_v15 = vpop.f32.mrb[3].mxu0  ;;  %v97_v17 = vadd.f32 %v92_v12, %v33_v16 }
  0xe6   : > { %v155_v18 = vmul.f32 -1.442695, %v97_v17 }
  0xe8   : > { %188 = vpow2.f32 %v155_v18 }
  0xf2   : > { %v189_v19 = vpop.eup %188 }
  0xf3   : > { %v101_v20 = vadd.f32 1.0, %v189_v19 }
  0xf5   : > { %190 = vrcp.f32 %v101_v20 }
  0xff   : > { %v191_v21 = vpop.eup %190 }
 0x100   : > { %v115_v28 = vsub.f32 1.0, %v191_v21 }
 0x156   : > { %v106_v22 = vpop.permute.xlu0 %105 }
 0x157   : > { %v108_v23 = vmul.f32 %v191_v21, %v106_v22 }
 0x159   : > { %110 = vrot.lane.b32.xlu0 %v108_v23, %s212_s1 }
 0x1cb   : > { %v111_v24 = vpop.permute.xlu0 %110 }
 0x1cc   : > { %v113_v25 = vadd.f32 %v111_v24, %v33_v16 }
 0x1ce   : > { %192 = vtanh.f32 %v113_v25 }
 0x1d8   : > { %v193_v26 = vpop.eup %192 }
 0x1d9   : > { %117 = vrot.lane.b32.xlu1 %v193_v26, %s213_s30 }
 0x1dd   : > { %122 = vrot.lane.b32.xlu1 %v204_v6, %s214_s5 }
 0x24b   : > { %v118_v27 = vpop.permute.xlu1 %117 }
 0x24c   : > { %v120_v30 = vmul.f32 %v118_v27, %v115_v28 }
 0x24f   : > { %v123_v29 = vpop.permute.xlu1 %122 }
 0x250   : > { %v125_v31 = vmul.f32 %v191_v21, %v123_v29 }
 0x252   : > { %v126_v32 = vadd.f32 %v125_v31, %v120_v30 }
 0x254   : > { %128 = vrot.lane.b32.xlu0 %v126_v32, %s213_s30 }
 0x2c1   :  { %28 = sbr.rel (!%p26_p0) target bundleno = 5 (0x5), region = 45 }
 0x2c6   : > { %v129_v6 = vpop.permute.xlu0 %128  }
 0x2c7   : > { %133 = vst.msk [vmem:[%s131_s8] sm:$0x3] %vm132_vm2, %v129_v6 }

// kernel: koopman_forward.11
= control target key start
LH: loop header
LB: loop body
LE: loop exit
PB: predicated region body
PF: predicated region fallthrough
CT: control target
= control target key end

     0   :  { %v1275_v2 = vmov 0   ;;  %vm65_vm0 = vcmask 261120   ;;  %s1655_s0 = inlined_call_operand.vmem [shape: bf16[8,32], index: 0, kind: input, shape index: {}]   ;;  %s1656_s1 = inlined_call_operand.vmem [shape: bf16[32,256], index: 1, kind: input, shape index: {}]   ;;  %s1657_s2 = inlined_call_operand.vmem [shape: f32[1,256], index: 2, kind: input, shape index: {}]   ;;  %s1658_s3 = inlined_call_operand.vmem [shape: bf16[256,512], index: 3, kind: input, shape index: {}]   ;;  %s1659_s4 = inlined_call_operand.vmem [shape: f32[1,512], index: 4, kind: input, shape index: {}]   ;;  %s1660_s5 = inlined_call_operand.vmem [shape: bf16[512,16], index: 5, kind: input, shape index: {}]   ;;  %s1661_s6 = inlined_call_operand.vmem [shape: f32[1,16], index: 6, kind: input, shape index: {}]   ;;  %s1662_s7 = inlined_call_operand.hbm [shape: f32[8,16], index: 7, kind: output, shape index: {}]  }
   0x1   :  { %v1117_v0 = vld [vmem:[%s1656_s1 + $0x4] ss:$8 sps:$4 sm:$0xff]   ;;  %v1119_v1 = vld [vmem:[%s1656_s1] ss:$8 sps:$4 sm:$0xff]   ;;  %101 = vmatprep.mubr.bf16.mxu0 %v1275_v2  ;;  %v1120_v3 = vld [vmem:[%s1656_s1 + $0x14] ss:$8 sps:$4 sm:$0xff]  }
   0x2   :  { %69 = vmatprep.subr.bf16.mxu0 %v1117_v0  ;;  %v1122_v4 = vld [vmem:[%s1656_s1 + $0x10] ss:$8 sps:$4 sm:$0xff]   ;;  %v1123_v5 = vld [vmem:[%s1658_s3 + $0x4] ss:$16 sps:$4 sm:$0xff]   ;;  %v28_v6 = vld [vmem:[%s1655_s0] sm:$0xf] }
   0x3   :  { %70 = vmatpush1.bf16.msra.mxu0 %v1119_v1  ;;  %520 = vmatprep.subr.bf16.mxu1 %v1123_v5  ;;  %v1127_v7 = vld [vmem:[%s1658_s3 + $0xc] ss:$16 sps:$4 sm:$0xff]   ;;  %v1128_v8 = vld [vmem:[%s1658_s3] ss:$16 sps:$4 sm:$0xff]   ;;  %v1129_v9 = vld [vmem:[%s1658_s3 + $0x24] ss:$16 sps:$4 sm:$0xff]  }
   0x4   :  { %71 = vmatprep.subr.bf16.mxu0 %v1120_v3  ;;  %v1125_v10 = vld [vmem:[%s1658_s3 + $0x8] ss:$16 sps:$4 sm:$0xff]   ;;  %521 = vmatpush1.bf16.msra.mxu1 %v1128_v8  ;;  %v1133_v11 = vld [vmem:[%s1658_s3 + $0x2c] ss:$16 sps:$4 sm:$0xff]   ;;  %v1134_v12 = vld [vmem:[%s1658_s3 + $0x20] ss:$16 sps:$4 sm:$0xff]  }
   0x5   :  { %522 = vmatprep.subr.bf16.mxu1 %v1129_v9  ;;  %v1135_v13 = vld [vmem:[%s1658_s3 + $0x44] ss:$16 sps:$4 sm:$0xff]   ;;  %v1131_v14 = vld [vmem:[%s1658_s3 + $0x28] ss:$16 sps:$4 sm:$0xff]   ;;  %v1139_v15 = vld [vmem:[%s1658_s3 + $0x4c] ss:$16 sps:$4 sm:$0xff]  }
   0x6   :  { %v1140_v16 = vld [vmem:[%s1658_s3 + $0x40] ss:$16 sps:$4 sm:$0xff]   ;;  %v1141_v17 = vld [vmem:[%s1658_s3 + $0x64] ss:$16 sps:$4 sm:$0xff]   ;;  %v1137_v18 = vld [vmem:[%s1658_s3 + $0x48] ss:$16 sps:$4 sm:$0xff]  }
   0x7   :  { %72 = vmatpush1.bf16.msra.mxu0 %v1122_v4  ;;  %v1145_v19 = vld [vmem:[%s1658_s3 + $0x6c] ss:$16 sps:$4 sm:$0xff]   ;;  %v1146_v20 = vld [vmem:[%s1658_s3 + $0x60] ss:$16 sps:$4 sm:$0xff]   ;;  %v1147_v21 = vld [vmem:[%s1658_s3 + $0x84] ss:$16 sps:$4 sm:$0xff]  }
   0x8   :  { %561 = vmatprep.subr.bf16.mxu0 %v1127_v7  ;;  %523 = vmatpush1.bf16.msra.mxu1 %v1134_v12  ;;  %v1143_v22 = vld [vmem:[%s1658_s3 + $0x68] ss:$16 sps:$4 sm:$0xff]   ;;  %v1151_v23 = vld [vmem:[%s1658_s3 + $0x8c] ss:$16 sps:$4 sm:$0xff]   ;;  %v1152_v24 = vld [vmem:[%s1658_s3 + $0x80] ss:$16 sps:$4 sm:$0xff]  }
   0x9   :  { %524 = vmatprep.subr.bf16.mxu1 %v1135_v13  ;;  %v1153_v25 = vld [vmem:[%s1658_s3 + $0xa4] ss:$16 sps:$4 sm:$0xff]   ;;  %v1149_v26 = vld [vmem:[%s1658_s3 + $0x88] ss:$16 sps:$4 sm:$0xff]   ;;  %v1157_v27 = vld [vmem:[%s1658_s3 + $0xac] ss:$16 sps:$4 sm:$0xff]  }
   0xa   :  { %973 = vmatmul.mubr.msk.bf16.vlgmr.msra.gmra.mrb[0].mxu0 %vm65_vm0, %v28_v6  ;;  %v1158_v28 = vld [vmem:[%s1658_s3 + $0xa0] ss:$16 sps:$4 sm:$0xff]   ;;  %v1159_v29 = vld [vmem:[%s1658_s3 + $0xc4] ss:$16 sps:$4 sm:$0xff]   ;;  %v1155_v30 = vld [vmem:[%s1658_s3 + $0xa8] ss:$16 sps:$4 sm:$0xff]  }
   0xb   :  { %562 = vmatpush1.bf16.msra.mxu0 %v1125_v10  ;;  %v1163_v31 = vld [vmem:[%s1658_s3 + $0xcc] ss:$16 sps:$4 sm:$0xff]   ;;  %v1164_v32 = vld [vmem:[%s1658_s3 + $0xc0] ss:$16 sps:$4 sm:$0xff]   ;;  %v1165_v33 = vld [vmem:[%s1658_s3 + $0xe4] ss:$16 sps:$4 sm:$0xff]  }
   0xc   :  { %563 = vmatprep.subr.bf16.mxu0 %v1133_v11  ;;  %525 = vmatpush1.bf16.msra.mxu1 %v1140_v16  ;;  %v1161_v34 = vld [vmem:[%s1658_s3 + $0xc8] ss:$16 sps:$4 sm:$0xff]   ;;  %v1169_v35 = vld [vmem:[%s1658_s3 + $0xec] ss:$16 sps:$4 sm:$0xff]   ;;  %v1170_v36 = vld [vmem:[%s1658_s3 + $0xe0] ss:$16 sps:$4 sm:$0xff]  }
   0xd   :  { %526 = vmatprep.subr.bf16.mxu1 %v1141_v17  ;;  %v1171_v37 = vld [vmem:[%s1658_s3 + $0x104] ss:$16 sps:$4 sm:$0xff]   ;;  %v1167_v38 = vld [vmem:[%s1658_s3 + $0xe8] ss:$16 sps:$4 sm:$0xff]   ;;  %v1175_v39 = vld [vmem:[%s1658_s3 + $0x10c] ss:$16 sps:$4 sm:$0xff]  }
   0xe   :  { %v1176_v40 = vld [vmem:[%s1658_s3 + $0x100] ss:$16 sps:$4 sm:$0xff]   ;;  %v1177_v41 = vld [vmem:[%s1658_s3 + $0x124] ss:$16 sps:$4 sm:$0xff]   ;;  %v1173_v42 = vld [vmem:[%s1658_s3 + $0x108] ss:$16 sps:$4 sm:$0xff]  }
   0xf   :  { %564 = vmatpush1.bf16.msra.mxu0 %v1131_v14  ;;  %v1182_v43 = vld [vmem:[%s1658_s3 + $0x120] ss:$16 sps:$4 sm:$0xff]   ;;  %v1181_v44 = vld [vmem:[%s1658_s3 + $0x12c] ss:$16 sps:$4 sm:$0xff]   ;;  %v1183_v45 = vld [vmem:[%s1658_s3 + $0x144] ss:$16 sps:$4 sm:$0xff]  }
  0x10   :  { %565 = vmatprep.subr.bf16.mxu0 %v1139_v15  ;;  %527 = vmatpush1.bf16.msra.mxu1 %v1146_v20  ;;  %v1179_v46 = vld [vmem:[%s1658_s3 + $0x128] ss:$16 sps:$4 sm:$0xff]   ;;  %v1188_v47 = vld [vmem:[%s1658_s3 + $0x140] ss:$16 sps:$4 sm:$0xff]   ;;  %v1187_v48 = vld [vmem:[%s1658_s3 + $0x14c] ss:$16 sps:$4 sm:$0xff]  }
  0x11   :  { %528 = vmatprep.subr.bf16.mxu1 %v1147_v21  ;;  %v1189_v49 = vld [vmem:[%s1658_s3 + $0x164] ss:$16 sps:$4 sm:$0xff]   ;;  %v1185_v50 = vld [vmem:[%s1658_s3 + $0x148] ss:$16 sps:$4 sm:$0xff]   ;;  %v1194_v51 = vld [vmem:[%s1658_s3 + $0x160] ss:$16 sps:$4 sm:$0xff]  }
  0x12   :  { %v1193_v52 = vld [vmem:[%s1658_s3 + $0x16c] ss:$16 sps:$4 sm:$0xff]   ;;  %v1195_v53 = vld [vmem:[%s1658_s3 + $0x184] ss:$16 sps:$4 sm:$0xff]   ;;  %v1191_v54 = vld [vmem:[%s1658_s3 + $0x168] ss:$16 sps:$4 sm:$0xff]  }
  0x13   :  { %566 = vmatpush1.bf16.msra.mxu0 %v1137_v18  ;;  %v1200_v55 = vld [vmem:[%s1658_s3 + $0x180] ss:$16 sps:$4 sm:$0xff]   ;;  %v1199_v56 = vld [vmem:[%s1658_s3 + $0x18c] ss:$16 sps:$4 sm:$0xff]   ;;  %v1201_v57 = vld [vmem:[%s1658_s3 + $0x1a4] ss:$16 sps:$4 sm:$0xff]  }
  0x14   :  { %567 = vmatprep.subr.bf16.mxu0 %v1145_v19  ;;  %529 = vmatpush1.bf16.msra.mxu1 %v1152_v24  ;;  %v1197_v58 = vld [vmem:[%s1658_s3 + $0x188] ss:$16 sps:$4 sm:$0xff]   ;;  %v1206_v59 = vld [vmem:[%s1658_s3 + $0x1a0] ss:$16 sps:$4 sm:$0xff]   ;;  %v1205_v60 = vld [vmem:[%s1658_s3 + $0x1ac] ss:$16 sps:$4 sm:$0xff]  }
  0x15   :  { %530 = vmatprep.subr.bf16.mxu1 %v1153_v25  ;;  %v1203_v61 = vld [vmem:[%s1658_s3 + $0x1a8] ss:$16 sps:$4 sm:$0xff]  }
  0x17   :  { %568 = vmatpush1.bf16.msra.mxu0 %v1143_v22 }
  0x18   :  { %569 = vmatprep.subr.bf16.mxu0 %v1151_v23  ;;  %531 = vmatpush1.bf16.msra.mxu1 %v1158_v28 }
  0x19   :  { %532 = vmatprep.subr.bf16.mxu1 %v1159_v29 }
  0x1b   :  { %570 = vmatpush1.bf16.msra.mxu0 %v1149_v26 }
  0x1c   :  { %571 = vmatprep.subr.bf16.mxu0 %v1157_v27  ;;  %533 = vmatpush1.bf16.msra.mxu1 %v1164_v32 }
  0x1d   :  { %534 = vmatprep.subr.bf16.mxu1 %v1165_v33 }
  0x1f   :  { %572 = vmatpush1.bf16.msra.mxu0 %v1155_v30 }
  0x20   :  { %573 = vmatprep.subr.bf16.mxu0 %v1163_v31  ;;  %535 = vmatpush1.bf16.msra.mxu1 %v1170_v36 }
  0x21   :  { %536 = vmatprep.subr.bf16.mxu1 %v1171_v37 }
  0x23   :  { %574 = vmatpush1.bf16.msra.mxu0 %v1161_v34 }
  0x24   :  { %575 = vmatprep.subr.bf16.mxu0 %v1169_v35  ;;  %537 = vmatpush1.bf16.msra.mxu1 %v1176_v40 }
  0x25   :  { %538 = vmatprep.subr.bf16.mxu1 %v1177_v41 }
  0x27   :  { %576 = vmatpush1.bf16.msra.mxu0 %v1167_v38 }
  0x28   :  { %577 = vmatprep.subr.bf16.mxu0 %v1175_v39  ;;  %539 = vmatpush1.bf16.msra.mxu1 %v1182_v43 }
  0x29   :  { %540 = vmatprep.subr.bf16.mxu1 %v1183_v45 }
  0x2b   :  { %578 = vmatpush1.bf16.msra.mxu0 %v1173_v42 }
  0x2c   :  { %579 = vmatprep.subr.bf16.mxu0 %v1181_v44  ;;  %541 = vmatpush1.bf16.msra.mxu1 %v1188_v47 }
  0x2d   :  { %542 = vmatprep.subr.bf16.mxu1 %v1189_v49 }
  0x2f   :  { %580 = vmatpush1.bf16.msra.mxu0 %v1179_v46 }
  0x30   :  { %581 = vmatprep.subr.bf16.mxu0 %v1187_v48  ;;  %543 = vmatpush1.bf16.msra.mxu1 %v1194_v51 }
  0x31   :  { %544 = vmatprep.subr.bf16.mxu1 %v1195_v53 }
  0x33   :  { %582 = vmatpush1.bf16.msra.mxu0 %v1185_v50 }
  0x34   :  { %583 = vmatprep.subr.bf16.mxu0 %v1193_v52  ;;  %545 = vmatpush1.bf16.msra.mxu1 %v1200_v55 }
  0x35   :  { %546 = vmatprep.subr.bf16.mxu1 %v1201_v57 }
  0x37   :  { %584 = vmatpush1.bf16.msra.mxu0 %v1191_v54 }
  0x38   :  { %585 = vmatprep.subr.bf16.mxu0 %v1199_v56  ;;  %547 = vmatpush1.bf16.msra.mxu1 %v1206_v59 }
  0x3b   :  { %586 = vmatpush1.bf16.msra.mxu0 %v1197_v58 }
  0x3c   :  { %587 = vmatprep.subr.bf16.mxu0 %v1205_v60 }
  0x3f   :  { %588 = vmatpush1.bf16.msra.mxu0 %v1203_v61 }
  0x40   :  { %12 = vsyncpa [#allocation3], 0  ;;  %v1207_v62 = vld [vmem:[%s1658_s3 + $0x1c4] ss:$16 sps:$4 sm:$0xff]   ;;  %v1211_v63 = vld [vmem:[%s1658_s3 + $0x1cc] ss:$16 sps:$4 sm:$0xff]   ;;  %v35_v8 = vlaneseq }
  0x41   :  { %v1209_v0 = vld [vmem:[%s1658_s3 + $0x1c8] ss:$16 sps:$4 sm:$0xff]   ;;  %v1212_v1 = vld [vmem:[%s1658_s3 + $0x1c0] ss:$16 sps:$4 sm:$0xff]   ;;  %548 = vmatprep.subr.bf16.mxu1 %v1207_v62  ;;  %589 = vmatprep.subr.bf16.mxu0 %v1211_v63  ;;  %v1213_v2 = vld [vmem:[%s1658_s3 + $0x1e4] ss:$16 sps:$4 sm:$0xff]  }
  0x42   :  { %549 = vmatpush1.bf16.msra.mxu1 %v1212_v1  ;;  %v1217_v3 = vld [vmem:[%s1658_s3 + $0x1ec] ss:$16 sps:$4 sm:$0xff]   ;;  %v1215_v4 = vld [vmem:[%s1658_s3 + $0x1e8] ss:$16 sps:$4 sm:$0xff]   ;;  %v1218_v5 = vld [vmem:[%s1658_s3 + $0x1e0] ss:$16 sps:$4 sm:$0xff]  }
  0x43   :  { %590 = vmatpush1.bf16.msra.mxu0 %v1209_v0  ;;  %550 = vmatprep.subr.bf16.mxu1 %v1213_v2  ;;  %v1219_v6 = vld [vmem:[%s1660_s5 + $0x40] sm:$0xff]   ;;  %v1530_v9 = vshrl.u32 %v35_v8, 7  ;;  %v1223_v27 = vld [vmem:[%s1660_s5 + $0x48] sm:$0xff]   ;;  %v1227_v31 = vld [vmem:[%s1660_s5 + $0x50] sm:$0xff]   ;;  %s1276_s24 = smov [#allocation2]   ;;  %vm953_vm1 = vcmask 130048  }
  0x44   :  { %591 = vmatprep.subr.bf16.mxu0 %v1217_v3  ;;  %v1220_v7 = vld [vmem:[%s1660_s5 + $0xc0] sm:$0xff]   ;;  %v1224_v28 = vld [vmem:[%s1660_s5 + $0xc8] sm:$0xff]   ;;  %v1228_v32 = vld [vmem:[%s1660_s5 + $0xd0] sm:$0xff]   ;;  %s961_s25 = sshll.u32 %s1276_s24, 4  ;;  %s962_s25 = int_to_ptr.vmem [resolvable:$true] %s961_s25 }
  0x45   :  { %v37_v10 = vsub.s32 0, %v1530_v9  ;;  %v33_v11 = vld [vmem:[%s1657_s2] sm:$0x3]  ;;  %v41_v12 = vsub.s32 1, %v1530_v9  ;;  %v1225_v29 = vld [vmem:[%s1660_s5 + $0x8] sm:$0xff]   ;;  %v1229_v33 = vld [vmem:[%s1660_s5 + $0x10] sm:$0xff]   ;;  %p1256_p1 = scmp.lt.s32.totalorder %s962_s25, %s962_s25 }
  0x46   :  { %551 = vmatpush1.bf16.msra.mxu1 %v1218_v5  ;;  %v1221_v24 = vld [vmem:[%s1660_s5] sm:$0xff]   ;;  %v1226_v30 = vld [vmem:[%s1660_s5 + $0x88] sm:$0xff]   ;;  %v1230_v34 = vld [vmem:[%s1660_s5 + $0x90] sm:$0xff]   ;;  %v190_v55 = vsub.s32 2, %v1530_v9  ;;  %v194_v57 = vsub.s32 3, %v1530_v9  ;;  %s1251_s26 = scalar_lea.vmem %s962_s25, 128 }
  0x47   :  { %592 = vmatpush1.bf16.msra.mxu0 %v1215_v4  ;;  %1071 = vmatprep.subr.bf16.mxu1 %v1219_v6  ;;  %v38_v13 = vrot.slane %v33_v11, %v37_v10  ;;  %v42_v14 = vrot.slane %v33_v11, %v41_v12  ;;  %v1222_v25 = vld [vmem:[%s1660_s5 + $0x80] sm:$0xff]   ;;  %v1231_v35 = vld [vmem:[%s1660_s5 + $0x58] sm:$0xff]   ;;  %v1239_v43 = vld [vmem:[%s1660_s5 + $0x68] sm:$0xff]   ;;  %p1252_p0 = scmp.ne.s32.totalorder %s962_s25, %s1251_s26  ;;  %p1257_p2 = scmp.lt.s32.totalorder %s1251_s26, %s1251_s26 }
  0x48   :  { %1093 = vmatprep.subr.bf16.mxu0 %v1220_v7  ;;  %v1232_v36 = vld [vmem:[%s1660_s5 + $0xd8] sm:$0xff]   ;;  %v1235_v39 = vld [vmem:[%s1660_s5 + $0x60] sm:$0xff]   ;;  %v1240_v44 = vld [vmem:[%s1660_s5 + $0xe8] sm:$0xff]  }
  0x49   :  { %v1233_v37 = vld [vmem:[%s1660_s5 + $0x18] sm:$0xff]   ;;  %v1236_v40 = vld [vmem:[%s1660_s5 + $0xe0] sm:$0xff]   ;;  %v1241_v45 = vld [vmem:[%s1660_s5 + $0x28] sm:$0xff]   ;;  %p1258_p3 = por %p1257_p2, %p1256_p1 }
  0x4a   :  { %v1234_v38 = vld [vmem:[%s1660_s5 + $0x98] sm:$0xff]   ;;  %v1237_v41 = vld [vmem:[%s1660_s5 + $0x20] sm:$0xff]   ;;  %v1242_v46 = vld [vmem:[%s1660_s5 + $0xa8] sm:$0xff]  }
  0x4b   :  { %v1238_v42 = vld [vmem:[%s1660_s5 + $0xa0] sm:$0xff]   ;;  %v1243_v47 = vld [vmem:[%s1660_s5 + $0x70] sm:$0xff]   ;;  %v1247_v51 = vld [vmem:[%s1660_s5 + $0x78] sm:$0xff]   ;;  %p1259_p4 = pnand %p1258_p3, %p1252_p0 }
  0x4c   :  { %v1244_v48 = vld [vmem:[%s1660_s5 + $0xf0] sm:$0xff]   ;;  %v1248_v52 = vld [vmem:[%s1660_s5 + $0xf8] sm:$0xff]   ;;  %v178_v56 = vld [vmem:[%s1659_s4] sm:$0xf] }
  0x4d   :  { %v1245_v49 = vld [vmem:[%s1660_s5 + $0x30] sm:$0xff]   ;;  %v1249_v53 = vld [vmem:[%s1660_s5 + $0x38] sm:$0xff]   ;;  %v183_v58 = vrot.slane %v178_v56, %v37_v10  ;;  %v191_v59 = vrot.slane %v178_v56, %v190_v55  ;;  %v187_v60 = vrot.slane %v178_v56, %v41_v12  ;;  %v195_v61 = vrot.slane %v178_v56, %v194_v57 }
  0x4e   :  { %v1246_v50 = vld [vmem:[%s1660_s5 + $0xb0] sm:$0xff]   ;;  %v1250_v54 = vld [vmem:[%s1660_s5 + $0xb8] sm:$0xff]  }
  0xdd   :  { %v103_v15 = vpop.f32.mrb[0].mxu0 }
  0xde   :  { %v104_v16 = vadd.f32 %v103_v15, %v38_v13  ;;  %v105_v17 = vpop.f32.mrb[1].mxu0 }
  0xdf   :  { %v106_v18 = vadd.f32 %v105_v17, %v42_v14  ;;  %v107_v19 = vpop.f32.mrb[2].mxu0 }
  0xe0   :  { %v110_v20 = vmax.f32 %v104_v16, 0.0  ;;  %v108_v21 = vpop.f32.mrb[3].mxu0 }
  0xe1   :  { %v111_v22 = vmax.f32 %v106_v18, 0.0 }
  0xe2   :  { %v112_v26 = vpack.c.bf16 %v110_v20, %v110_v20  ;;  %v1038_v20 = vld [vmem:[%s1661_s6] ss:$0 sm:$0xff] }
  0xe3   :  { %v113_v23 = vpack.c.bf16 %v111_v22, %v111_v22 }
  0xe5   :  { %552 = vmatprep.mubr.bf16.mxu1 %v113_v23  ;;  %593 = vmatprep.mubr.bf16.mxu0 %v113_v23 }
  0xe6   :  { %553 = vmatmul.mubr.bf16.vlgmr.msra.gmra.mrb[0].mxu1 %v112_v26  ;;  %594 = vmatmul.mubr.bf16.vlgmr.msra.gmra.mrb[4].mxu0 %v112_v26 }
  0xe7   :  { %1072 = vmatpush3.bf16.msra.mxu1 %v1221_v24  ;;  %1094 = vmatpush3.bf16.msra.mxu0 %v1222_v25 }
  0xe8   :  { %1073 = vmatprep.subr.bf16.mxu1 %v1223_v27  ;;  %1095 = vmatprep.subr.bf16.mxu0 %v1224_v28 }
  0xeb   :  { %1074 = vmatpush3.bf16.msra.mxu1 %v1225_v29  ;;  %1096 = vmatpush3.bf16.msra.mxu0 %v1226_v30 }
  0xec   :  { %1075 = vmatprep.subr.bf16.mxu1 %v1227_v31  ;;  %1097 = vmatprep.subr.bf16.mxu0 %v1228_v32 }
  0xef   :  { %1076 = vmatpush3.bf16.msra.mxu1 %v1229_v33  ;;  %1098 = vmatpush3.bf16.msra.mxu0 %v1230_v34 }
  0xf0   :  { %1077 = vmatprep.subr.bf16.mxu1 %v1231_v35  ;;  %1099 = vmatprep.subr.bf16.mxu0 %v1232_v36 }
  0xf3   :  { %1078 = vmatpush3.bf16.msra.mxu1 %v1233_v37  ;;  %1100 = vmatpush3.bf16.msra.mxu0 %v1234_v38 }
  0xf4   :  { %1079 = vmatprep.subr.bf16.mxu1 %v1235_v39  ;;  %1101 = vmatprep.subr.bf16.mxu0 %v1236_v40 }
  0xf7   :  { %1080 = vmatpush3.bf16.msra.mxu1 %v1237_v41  ;;  %1102 = vmatpush3.bf16.msra.mxu0 %v1238_v42 }
  0xf8   :  { %1081 = vmatprep.subr.bf16.mxu1 %v1239_v43  ;;  %1103 = vmatprep.subr.bf16.mxu0 %v1240_v44 }
  0xfb   :  { %1082 = vmatpush3.bf16.msra.mxu1 %v1241_v45  ;;  %1104 = vmatpush3.bf16.msra.mxu0 %v1242_v46 }
  0xfc   :  { %1083 = vmatprep.subr.bf16.mxu1 %v1243_v47  ;;  %1105 = vmatprep.subr.bf16.mxu0 %v1244_v48 }
  0xff   :  { %1084 = vmatpush3.bf16.msra.mxu1 %v1245_v49  ;;  %1106 = vmatpush3.bf16.msra.mxu0 %v1246_v50 }
 0x100   :  { %1085 = vmatprep.subr.bf16.mxu1 %v1247_v51  ;;  %1107 = vmatprep.subr.bf16.mxu0 %v1248_v52 }
 0x103   :  { %1086 = vmatpush3.bf16.msra.mxu1 %v1249_v53  ;;  %1108 = vmatpush3.bf16.msra.mxu0 %v1250_v54 }
 0x1b9   :  { %v554_v62 = vpop.f32.mrb[0].mxu1  ;;  %v595_v63 = vpop.f32.mrb[4].mxu0 }
 0x1ba   :  { %v555_v0 = vadd.f32 %v554_v62, %v183_v58  ;;  %v596_v1 = vadd.f32 %v595_v63, %v191_v59  ;;  %v556_v2 = vpop.f32.mrb[1].mxu1  ;;  %v597_v3 = vpop.f32.mrb[5].mxu0 }
 0x1bb   :  { %v557_v4 = vadd.f32 %v556_v2, %v187_v60  ;;  %v598_v5 = vadd.f32 %v597_v3, %v195_v61  ;;  %v558_v6 = vpop.f32.mrb[2].mxu1  ;;  %v599_v7 = vpop.f32.mrb[6].mxu0 }
 0x1bc   :  { %v602_v8 = vmax.f32 %v555_v0, 0.0  ;;  %v604_v11 = vmax.f32 %v596_v1, 0.0  ;;  %v559_v13 = vpop.f32.mrb[3].mxu1  ;;  %v600_v14 = vpop.f32.mrb[7].mxu0 }
 0x1bd   :  { %v603_v10 = vmax.f32 %v557_v4, 0.0  ;;  %v605_v15 = vmax.f32 %v598_v5, 0.0 }
 0x1be   :  { %v606_v12 = vpack.c.bf16 %v602_v8, %v602_v8  ;;  %v608_v17 = vpack.c.bf16 %v604_v11, %v604_v11 }
 0x1bf   :  { %v607_v16 = vpack.c.bf16 %v603_v10, %v603_v10  ;;  %v609_v9 = vpack.c.bf16 %v605_v15, %v605_v15 }
 0x1c1   :  { %905 = vmatprep.mubr.bf16.mxu1 %v607_v16  ;;  %945 = vmatprep.mubr.bf16.mxu0 %v609_v9 }
 0x1c2   :  { %906 = vmatmul.mubr.bf16.vlgmr.msra.gmra.mrb[4].mxu1 %v606_v12  ;;  %946 = vmatmul.mubr.bf16.vlgmr.msra.gmra.mrb[8].mxu0 %v608_v17 }
 0x295   :  { %v1087_v18 = vpop.f32.mrb[4].mxu1  ;;  %v1109_v19 = vpop.f32.mrb[8].mxu0 }
 0x296   :  { %v1088_v21 = vpop.f32.mrb[5].mxu1  ;;  %v1110_v22 = vpop.f32.mrb[9].mxu0 }
 0x297   :  { %v1089_v23 = vadd.f32 %v1088_v21, %v1087_v18  ;;  %v1111_v24 = vadd.f32 %v1110_v22, %v1109_v19  ;;  %v1090_v25 = vpop.f32.mrb[6].mxu1  ;;  %v1112_v26 = vpop.f32.mrb[10].mxu0 }
 0x298   :  { %v1091_v27 = vpop.f32.mrb[7].mxu1  ;;  %v1113_v28 = vpop.f32.mrb[11].mxu0 }
 0x299   :  { %v908_v29 = vadd.f32 %v1089_v23, %v1038_v20 }
 0x29b   :  { %v948_v30 = vadd.f32 %v1111_v24, %v908_v29 }
 0x29d   :  { %954 = vst.msk [vmem:[#allocation2] sm:$0xff] %vm953_vm1, %v948_v30 }
 0x29e   :  { %1262 = shalt.err (!%p1259_p4)
}
 0x29f   :  { %s1263_s28 = scalar_lea.hbm %s1662_s7, 128 }
 0x2a0   :  { %p1264_p5 = scmp.ne.s32.totalorder %s1662_s7, %s1263_s28  ;;  %p1267_p6 = scmp.lt.u32.totalorder %s1263_s28, %s1662_s7 }
 0x2a2   :  { %p1269_p7 = pnand %p1267_p6, %p1264_p5 }
 0x2a4   :  { %1272 = shalt.err (!%p1269_p7)
}
 0x2a5   :  { %964 = dma.vmem_to_hbm [thread:$0]  %s962_s25, 128, %s1662_s7, [#allocation3]  }
 0x2a6   :  { %1273 = dma.done.wait [#allocation3], 128  }
 0x2a7   :  { %1274 = vsyncadd [#allocation3], 4294967168 }
 0x2a8   :  { %968 = vsyncpa [#allocation3], 1 }

</bundles_post_ra>
